<compile_context>
chip_gen: v7x
topology: tpu7x:2x2x1
jax: 0.10.0
libtpu: 0.0.40
codegen_flags: <defaults>
</compile_context>

<pallas_src>
import math
import functools

import jax
import jax.numpy as jnp
from jax.experimental import pallas as pl
from jax.experimental.pallas import tpu as pltpu


# ----------------------------- fused MHA kernel -----------------------------
def _mha_kernel(*refs, h, scale, mm_dtype, shared_qkv):
    """One grid step: a block of (tbn) flattened batch rows, all heads, full S."""
    o_ref = refs[-1]
    (wq_ref, bq_ref, wk_ref, bk_ref,
     wv_ref, bv_ref, wo_ref, bo_ref) = refs[-9:-1]
    if shared_qkv:
        q_ref = k_ref = v_ref = refs[0]        # self-attention: one HBM input
    else:
        q_ref, k_ref, v_ref = refs[0], refs[1], refs[2]

    tbn, S, D = q_ref.shape
    d_k = D // h

    def project(x_ref, w_ref, b_ref):
        # (tbn*S, D) @ (D, D) on the MXU (operands in mm_dtype), f32 accumulate,
        # bias epilogue.  Leading-dim reshapes are layout no-ops.
        x2d = x_ref[...].reshape(tbn * S, D).astype(mm_dtype)
        y = jnp.dot(x2d, w_ref[...].astype(mm_dtype),
                    preferred_element_type=jnp.float32)
        return (y + b_ref[...]).reshape(tbn, S, D)          # f32

    # Fold 1/sqrt(d_k) into Q (softmax-invariant, one cheap fused pass).
    q = (project(q_ref, wq_ref, bq_ref) * scale).astype(mm_dtype)
    k = project(k_ref, wk_ref, bk_ref).astype(mm_dtype)
    v = project(v_ref, wv_ref, bv_ref).astype(mm_dtype)

    # NOTE: a single batched-over-heads einsum ('bqhd,bkhd->bhqk') would need a
    # (0,2,1,3) transpose / lane-splitting reshape that Mosaic does not lower
    # reliably, so heads are processed with static d_k-aligned lane slices in a
    # small unrolled loop (h is small); all matmuls accumulate in f32.
    ctx_heads = []
    for head in range(h):
        lo = head * d_k
        qh = q[:, :, lo:lo + d_k]                            # (tbn, S, d_k)
        kh = k[:, :, lo:lo + d_k]
        vh = v[:, :, lo:lo + d_k]

        # Contraction over d_k without materializing k^T.
        s = jnp.einsum('bqd,bkd->bqk', qh, kh,
                       preferred_element_type=jnp.float32)   # (tbn, S, S)
        m = jnp.max(s, axis=-1, keepdims=True)
        e = jnp.exp(s - m)                                   # EUP, f32
        denom = jnp.sum(e, axis=-1, keepdims=True)
        pv = jnp.einsum('bqk,bkd->bqd', e.astype(mm_dtype), vh,
                        preferred_element_type=jnp.float32)  # (tbn, S, d_k)
        # Softmax normalization folded into P@V via the EUP approx reciprocal
        # (keeps the divide off the VALU).
        ctx_heads.append(pv * pl.reciprocal(denom, approx=True))

    # Merge heads -> lane-dense (tbn, S, D) slab, then the output projection.
    ctx = jnp.concatenate(ctx_heads, axis=-1)
    out2d = jnp.dot(ctx.reshape(tbn * S, D).astype(mm_dtype),
                    wo_ref[...].astype(mm_dtype),
                    preferred_element_type=jnp.float32) + bo_ref[...]
    o_ref[...] = out2d.reshape(tbn, S, D).astype(o_ref.dtype)


# --------------------------- module forward ---------------------------------
def _vmem_capacity_bytes():
    cap = 64 * 1024 * 1024            # conservative default (v7x per-TC VMEM)
    try:
        info = pltpu.get_tpu_info()
        cap = int(getattr(info, "vmem_capacity_bytes", cap)) or cap
    except Exception:
        pass
    return cap


def multi_headed_attention_forward(params, query, key, value, mask=None, *,
                                   mxu_dtype=None, block_bn=None):
    """Pallas port of MultiHeadedAttention.forward (inference, mask=None)."""
    assert mask is None  # TODO(synk): mask support (masked_fill -1e9)
    B, N, S, D = query.shape
    h = params["h"]
    assert D % h == 0
    d_k = D // h
    BN = B * N

    shared_qkv = (key is query) and (value is query)
    n_act_in = 1 if shared_qkv else 3

    in_dtype = jnp.dtype(query.dtype)
    mm_dtype = jnp.dtype(mxu_dtype) if mxu_dtype is not None else in_dtype

    # ---- VMEM-budgeted, generation-aware tile size over the B*N axis --------
    vmem_cap = _vmem_capacity_bytes()          # 64 MiB v7x, 128 MiB v5e/v6e
    budget = 0.5 * vmem_cap                    # target ~50% of on-chip VMEM
    in_b, mm_b = in_dtype.itemsize, mm_dtype.itemsize

    def est_bytes(bn):
        act_io = (n_act_in + 1) * 2 * bn * S * D * in_b   # double-buffered I/O
        slabs = 4 * bn * S * D * 4                        # q, k, v, ctx in f32
        mmcpy = 3 * bn * S * D * mm_b                     # mm_dtype q/k/v copies
        scores = 2 * bn * S * S * 4                       # live score/exp tiles
        weights = 4 * D * D * mm_b + 4 * D * 4            # resident, 1-buffered
        return act_io + slabs + mmcpy + scores + weights

    if block_bn is None:
        divisors = [d for d in range(1, BN + 1) if BN % d == 0]
        fitting = [d for d in divisors if est_bytes(d) <= budget] or [1]
        # Prefer an even grid length so the "parallel" axis load-balances across
        # v7x's 2 TensorCores; among those pick the biggest tile that fits.
        even = [d for d in fitting if (BN // d) % 2 == 0]
        block_bn = max(even) if even else max(fitting)
    block_bn = max(1, min(int(block_bn), BN))
    while BN % block_bn:
        block_bn -= 1

    vmem_limit = int(min(0.9 * vmem_cap, 128 * 1024 * 1024))

    qf = query.reshape(BN, S, D)
    if shared_qkv:
        acts = [qf]
    else:
        acts = [qf, key.reshape(BN, S, D), value.reshape(BN, S, D)]

    # Weights in the MXU operand dtype (bf16 halves HBM/VMEM weight bytes);
    # biases stay f32 (added after the f32 accumulation).
    wq = params["wq"].astype(mm_dtype)
    wk = params["wk"].astype(mm_dtype)
    wv = params["wv"].astype(mm_dtype)
    wo = params["wo"].astype(mm_dtype)
    bq = params["bq"].reshape(1, D).astype(jnp.float32)
    bk = params["bk"].reshape(1, D).astype(jnp.float32)
    bv = params["bv"].reshape(1, D).astype(jnp.float32)
    bo = params["bo"].reshape(1, D).astype(jnp.float32)

    kernel = functools.partial(_mha_kernel, h=h, scale=1.0 / math.sqrt(d_k),
                               mm_dtype=mm_dtype, shared_qkv=shared_qkv)
    x_spec = pl.BlockSpec((block_bn, S, D), lambda i: (i, 0, 0))

    def run(single_buffer_weights):
        if single_buffer_weights:
            # Grid-invariant weights/biases: keep ONE resident VMEM buffer.
            def const_spec(shape):
                return pl.BlockSpec(shape, lambda i: (0, 0),
                                    pipeline_mode=pl.Buffered(1))
        else:
            def const_spec(shape):
                return pl.BlockSpec(shape, lambda i: (0, 0))
        w_spec, b_spec = const_spec((D, D)), const_spec((1, D))

        out = pl.pallas_call(
            kernel,
            out_shape=jax.ShapeDtypeStruct((BN, S, D), in_dtype),
            grid=(BN // block_bn,),
            in_specs=[x_spec] * n_act_in + [w_spec, b_spec] * 4,
            out_specs=x_spec,
            compiler_params=pltpu.CompilerParams(
                dimension_semantics=("parallel",),
                vmem_limit_bytes=vmem_limit),
        )(*acts, wq, bq, wk, bk, wv, bv, wo, bo)
        return jax.block_until_ready(out)

    try:
        out = run(single_buffer_weights=True)
    except Exception:
        # pipeline_mode=pl.Buffered(1) unsupported on this jax version: fall
        # back to default (double-buffered, but still resident) weight specs.
        out = run(single_buffer_weights=False)

    return out.reshape(B, N, S, D)


# ------------------------------ reference -----------------------------------
def reference_forward(params, query, key, value):
    B, N, S, D = query.shape
    h = params["h"]
    d_k = D // h
    P = jax.lax.Precision.HIGHEST

    def project(x, w, b):
        y = jnp.einsum("bnsd,de->bnse", x, w, precision=P) + b
        y = y.reshape(B, N, S, h, d_k)
        return jnp.swapaxes(y, -2, -3)                       # (B, N, h, S, d_k)

    q = project(query, params["wq"], params["bq"])
    k = project(key, params["wk"], params["bk"])
    v = project(value, params["wv"], params["bv"])
    scores = jnp.einsum("bnhqd,bnhkd->bnhqk", q, k, precision=P) / math.sqrt(d_k)
    p_attn = jax.nn.softmax(scores, axis=-1)
    ctx = jnp.einsum("bnhqk,bnhkd->bnhqd", p_attn, v, precision=P)
    ctx = jnp.swapaxes(ctx, -2, -3).reshape(B, N, S, D)
    return jnp.einsum("bnsd,de->bnse", ctx, params["wo"], precision=P) + params["bo"]


# -------------------------------- setup -------------------------------------
def init_params(key, d_model, h):
    ks = jax.random.split(key, 8)
    bound = 1.0 / math.sqrt(d_model)

    def u(k, shape):
        return jax.random.uniform(k, shape, jnp.float32, -bound, bound)

    return {
        "h": h,
        "wq": u(ks[0], (d_model, d_model)), "bq": u(ks[1], (d_model,)),
        "wk": u(ks[2], (d_model, d_model)), "bk": u(ks[3], (d_model,)),
        "wv": u(ks[4], (d_model, d_model)), "bv": u(ks[5], (d_model,)),
        "wo": u(ks[6], (d_model, d_model)), "bo": u(ks[7], (d_model,)),
    }


if __name__ == "__main__":
    # (nbatches, N, seq_len, d_model) as in the module's forward.
    B, N, S, d_model, h = 2, 4, 8, 128, 4
    root = jax.random.PRNGKey(0)
    kp, kx, kq, kk, kv = jax.random.split(root, 5)

    params = init_params(kp, d_model, h)

    # 1) Encoder-style self-attention (query is key is value): exercises the
    #    shared-input path; f32 MXU operands for a tight check.
    x = jax.random.normal(kx, (B, N, S, d_model), jnp.float32)
    out = multi_headed_attention_forward(params, x, x, x)
    out = jax.block_until_ready(out)
    ref = reference_forward(params, x, x, x)
    assert out.shape == (B, N, S, d_model)
    err = float(jnp.max(jnp.abs(out - ref)))
    assert err < 5e-2, f"self-attention mismatch (max abs err={err:.3e})"

    # 2) Distinct q/k/v with bf16 MXU operands (f32 accumulation): the
    #    higher-throughput / lower-VMEM configuration from the perf review.
    q_in = jax.random.normal(kq, (B, N, S, d_model), jnp.float32)
    k_in = jax.random.normal(kk, (B, N, S, d_model), jnp.float32)
    v_in = jax.random.normal(kv, (B, N, S, d_model), jnp.float32)
    out_bf = multi_headed_attention_forward(params, q_in, k_in, v_in,
                                            mxu_dtype=jnp.bfloat16)
    out_bf = jax.block_until_ready(out_bf)
    ref2 = reference_forward(params, q_in, k_in, v_in)
    err2 = float(jnp.max(jnp.abs(out_bf - ref2)))
    assert bool(jnp.all(jnp.isfinite(out_bf))) and err2 < 2.5e-1, (
        f"bf16 MXU mismatch (max abs err={err2:.3e})")

    print("KERNEL_OK")
</pallas_src>

<mosaic_0001>
module attributes {stable_mosaic.version = 11 : i64} {
  func.func @_mha_kernel(%arg0: i32, %arg1: memref<4x8x128xf32, #tpu.memory_space<vmem>>, %arg2: memref<128x128xf32, #tpu.memory_space<vmem>>, %arg3: memref<1x128xf32, #tpu.memory_space<vmem>>, %arg4: memref<128x128xf32, #tpu.memory_space<vmem>>, %arg5: memref<1x128xf32, #tpu.memory_space<vmem>>, %arg6: memref<128x128xf32, #tpu.memory_space<vmem>>, %arg7: memref<1x128xf32, #tpu.memory_space<vmem>>, %arg8: memref<128x128xf32, #tpu.memory_space<vmem>>, %arg9: memref<1x128xf32, #tpu.memory_space<vmem>>, %arg10: memref<4x8x128xf32, #tpu.memory_space<vmem>>) attributes {dimension_semantics = [#tpu.dimension_semantics<parallel>], iteration_bounds = array<i64: 2>, scalar_prefetch = 0 : i64, scratch_operands = 0 : i64, tpu.core_type = #tpu.core_type<tc>, window_params = [{transform_indices = @transform_0, window_bounds = array<i64: 4, 8, 128>}, {pipeline_mode = #tpu.pipeline_mode<synchronous>, transform_indices = @transform_1, window_bounds = array<i64: 128, 128>}, {pipeline_mode = #tpu.pipeline_mode<synchronous>, transform_indices = @transform_2, window_bounds = array<i64: 1, 128>}, {pipeline_mode = #tpu.pipeline_mode<synchronous>, transform_indices = @transform_3, window_bounds = array<i64: 128, 128>}, {pipeline_mode = #tpu.pipeline_mode<synchronous>, transform_indices = @transform_4, window_bounds = array<i64: 1, 128>}, {pipeline_mode = #tpu.pipeline_mode<synchronous>, transform_indices = @transform_5, window_bounds = array<i64: 128, 128>}, {pipeline_mode = #tpu.pipeline_mode<synchronous>, transform_indices = @transform_6, window_bounds = array<i64: 1, 128>}, {pipeline_mode = #tpu.pipeline_mode<synchronous>, transform_indices = @transform_7, window_bounds = array<i64: 128, 128>}, {pipeline_mode = #tpu.pipeline_mode<synchronous>, transform_indices = @transform_8, window_bounds = array<i64: 1, 128>}, {transform_indices = @transform_9, window_bounds = array<i64: 4, 8, 128>}]} {
    %c0 = arith.constant 0 : index
    %c0_0 = arith.constant 0 : index
    %c0_1 = arith.constant 0 : index
    %0 = vector.load %arg1[%c0, %c0_0, %c0_1] : memref<4x8x128xf32, #tpu.memory_space<vmem>>, vector<4x8x128xf32>
    %1 = vector.shape_cast %0 : vector<4x8x128xf32> to vector<32x128xf32>
    %c0_2 = arith.constant 0 : index
    %c0_3 = arith.constant 0 : index
    %2 = vector.load %arg2[%c0_2, %c0_3] : memref<128x128xf32, #tpu.memory_space<vmem>>, vector<128x128xf32>
    %cst = arith.constant dense<0.000000e+00> : vector<32x128xf32>
    %3 = tpu.matmul %1, %2, %cst {dimension_numbers = #tpu.dot_dimension_numbers<[1], [0], [0], [1], [0, 0, 1, 1], [], []>} : vector<32x128xf32>, vector<128x128xf32>, vector<32x128xf32> -> vector<32x128xf32>
    %c0_4 = arith.constant 0 : index
    %c0_5 = arith.constant 0 : index
    %4 = vector.load %arg3[%c0_4, %c0_5] : memref<1x128xf32, #tpu.memory_space<vmem>>, vector<1x128xf32>
    %5 = vector.broadcast %4 : vector<1x128xf32> to vector<32x128xf32>
    %6 = arith.addf %3, %5 : vector<32x128xf32>
    %7 = vector.shape_cast %6 : vector<32x128xf32> to vector<4x8x128xf32>
    %cst_6 = arith.constant 0.176776692 : f32
    %8 = vector.broadcast %cst_6 : f32 to vector<4x8x128xf32>
    %9 = arith.mulf %7, %8 : vector<4x8x128xf32>
    %c0_7 = arith.constant 0 : index
    %c0_8 = arith.constant 0 : index
    %c0_9 = arith.constant 0 : index
    %10 = vector.load %arg1[%c0_7, %c0_8, %c0_9] : memref<4x8x128xf32, #tpu.memory_space<vmem>>, vector<4x8x128xf32>
    %11 = vector.shape_cast %10 : vector<4x8x128xf32> to vector<32x128xf32>
    %c0_10 = arith.constant 0 : index
    %c0_11 = arith.constant 0 : index
    %12 = vector.load %arg4[%c0_10, %c0_11] : memref<128x128xf32, #tpu.memory_space<vmem>>, vector<128x128xf32>
    %cst_12 = arith.constant dense<0.000000e+00> : vector<32x128xf32>
    %13 = tpu.matmul %11, %12, %cst_12 {dimension_numbers = #tpu.dot_dimension_numbers<[1], [0], [0], [1], [0, 0, 1, 1], [], []>} : vector<32x128xf32>, vector<128x128xf32>, vector<32x128xf32> -> vector<32x128xf32>
    %c0_13 = arith.constant 0 : index
    %c0_14 = arith.constant 0 : index
    %14 = vector.load %arg5[%c0_13, %c0_14] : memref<1x128xf32, #tpu.memory_space<vmem>>, vector<1x128xf32>
    %15 = vector.broadcast %14 : vector<1x128xf32> to vector<32x128xf32>
    %16 = arith.addf %13, %15 : vector<32x128xf32>
    %17 = vector.shape_cast %16 : vector<32x128xf32> to vector<4x8x128xf32>
    %c0_15 = arith.constant 0 : index
    %c0_16 = arith.constant 0 : index
    %c0_17 = arith.constant 0 : index
    %18 = vector.load %arg1[%c0_15, %c0_16, %c0_17] : memref<4x8x128xf32, #tpu.memory_space<vmem>>, vector<4x8x128xf32>
    %19 = vector.shape_cast %18 : vector<4x8x128xf32> to vector<32x128xf32>
    %c0_18 = arith.constant 0 : index
    %c0_19 = arith.constant 0 : index
    %20 = vector.load %arg6[%c0_18, %c0_19] : memref<128x128xf32, #tpu.memory_space<vmem>>, vector<128x128xf32>
    %cst_20 = arith.constant dense<0.000000e+00> : vector<32x128xf32>
    %21 = tpu.matmul %19, %20, %cst_20 {dimension_numbers = #tpu.dot_dimension_numbers<[1], [0], [0], [1], [0, 0, 1, 1], [], []>} : vector<32x128xf32>, vector<128x128xf32>, vector<32x128xf32> -> vector<32x128xf32>
    %c0_21 = arith.constant 0 : index
    %c0_22 = arith.constant 0 : index
    %22 = vector.load %arg7[%c0_21, %c0_22] : memref<1x128xf32, #tpu.memory_space<vmem>>, vector<1x128xf32>
    %23 = vector.broadcast %22 : vector<1x128xf32> to vector<32x128xf32>
    %24 = arith.addf %21, %23 : vector<32x128xf32>
    %25 = vector.shape_cast %24 : vector<32x128xf32> to vector<4x8x128xf32>
    %26 = vector.extract_strided_slice %9 {offsets = [0, 0, 0], sizes = [4, 8, 32], strides = [1, 1, 1]} : vector<4x8x128xf32> to vector<4x8x32xf32>
    %27 = vector.extract_strided_slice %17 {offsets = [0, 0, 0], sizes = [4, 8, 32], strides = [1, 1, 1]} : vector<4x8x128xf32> to vector<4x8x32xf32>
    %28 = vector.extract_strided_slice %25 {offsets = [0, 0, 0], sizes = [4, 8, 32], strides = [1, 1, 1]} : vector<4x8x128xf32> to vector<4x8x32xf32>
    "tpu.trace_start"() <{level = 10 : i32, message = "bqd,bkd->bqk"}> : () -> ()
    %cst_23 = arith.constant dense<0.000000e+00> : vector<4x8x8xf32>
    %29 = tpu.matmul %26, %27, %cst_23 {dimension_numbers = #tpu.dot_dimension_numbers<[2], [2], [1], [1], [0, 0, 0, 1, 1, 1], [0], [0]>} : vector<4x8x32xf32>, vector<4x8x32xf32>, vector<4x8x8xf32> -> vector<4x8x8xf32>
    "tpu.trace_stop"() : () -> ()
    %cst_24 = arith.constant dense<0xFF800000> : vector<4x8xf32>
    %30 = vector.multi_reduction <maximumf>, %29, %cst_24 [2] : vector<4x8x8xf32> to vector<4x8xf32>
    %31 = vector.shape_cast %30 : vector<4x8xf32> to vector<4x8x1xf32>
    %32 = vector.broadcast %31 : vector<4x8x1xf32> to vector<4x8x8xf32>
    %33 = arith.subf %29, %32 : vector<4x8x8xf32>
    %34 = math.exp %33 : vector<4x8x8xf32>
    %cst_25 = arith.constant dense<0.000000e+00> : vector<4x8xf32>
    %35 = vector.multi_reduction <add>, %34, %cst_25 [2] : vector<4x8x8xf32> to vector<4x8xf32>
    %36 = vector.shape_cast %35 : vector<4x8xf32> to vector<4x8x1xf32>
    "tpu.trace_start"() <{level = 10 : i32, message = "bqk,bkd->bqd"}> : () -> ()
    %cst_26 = arith.constant dense<0.000000e+00> : vector<4x8x32xf32>
    %37 = tpu.matmul %34, %28, %cst_26 {dimension_numbers = #tpu.dot_dimension_numbers<[2], [1], [1], [2], [0, 0, 0, 1, 1, 2], [0], [0]>} : vector<4x8x8xf32>, vector<4x8x32xf32>, vector<4x8x32xf32> -> vector<4x8x32xf32>
    "tpu.trace_stop"() : () -> ()
    %38 = tpu.reciprocal %36 {approx = true} : vector<4x8x1xf32> -> vector<4x8x1xf32>
    %39 = vector.broadcast %38 : vector<4x8x1xf32> to vector<4x8x32xf32>
    %40 = arith.mulf %37, %39 : vector<4x8x32xf32>
    %41 = vector.extract_strided_slice %9 {offsets = [0, 0, 32], sizes = [4, 8, 32], strides = [1, 1, 1]} : vector<4x8x128xf32> to vector<4x8x32xf32>
    %42 = vector.extract_strided_slice %17 {offsets = [0, 0, 32], sizes = [4, 8, 32], strides = [1, 1, 1]} : vector<4x8x128xf32> to vector<4x8x32xf32>
    %43 = vector.extract_strided_slice %25 {offsets = [0, 0, 32], sizes = [4, 8, 32], strides = [1, 1, 1]} : vector<4x8x128xf32> to vector<4x8x32xf32>
    "tpu.trace_start"() <{level = 10 : i32, message = "bqd,bkd->bqk"}> : () -> ()
    %cst_27 = arith.constant dense<0.000000e+00> : vector<4x8x8xf32>
    %44 = tpu.matmul %41, %42, %cst_27 {dimension_numbers = #tpu.dot_dimension_numbers<[2], [2], [1], [1], [0, 0, 0, 1, 1, 1], [0], [0]>} : vector<4x8x32xf32>, vector<4x8x32xf32>, vector<4x8x8xf32> -> vector<4x8x8xf32>
    "tpu.trace_stop"() : () -> ()
    %cst_28 = arith.constant dense<0xFF800000> : vector<4x8xf32>
    %45 = vector.multi_reduction <maximumf>, %44, %cst_28 [2] : vector<4x8x8xf32> to vector<4x8xf32>
    %46 = vector.shape_cast %45 : vector<4x8xf32> to vector<4x8x1xf32>
    %47 = vector.broadcast %46 : vector<4x8x1xf32> to vector<4x8x8xf32>
    %48 = arith.subf %44, %47 : vector<4x8x8xf32>
    %49 = math.exp %48 : vector<4x8x8xf32>
    %cst_29 = arith.constant dense<0.000000e+00> : vector<4x8xf32>
    %50 = vector.multi_reduction <add>, %49, %cst_29 [2] : vector<4x8x8xf32> to vector<4x8xf32>
    %51 = vector.shape_cast %50 : vector<4x8xf32> to vector<4x8x1xf32>
    "tpu.trace_start"() <{level = 10 : i32, message = "bqk,bkd->bqd"}> : () -> ()
    %cst_30 = arith.constant dense<0.000000e+00> : vector<4x8x32xf32>
    %52 = tpu.matmul %49, %43, %cst_30 {dimension_numbers = #tpu.dot_dimension_numbers<[2], [1], [1], [2], [0, 0, 0, 1, 1, 2], [0], [0]>} : vector<4x8x8xf32>, vector<4x8x32xf32>, vector<4x8x32xf32> -> vector<4x8x32xf32>
    "tpu.trace_stop"() : () -> ()
    %53 = tpu.reciprocal %51 {approx = true} : vector<4x8x1xf32> -> vector<4x8x1xf32>
    %54 = vector.broadcast %53 : vector<4x8x1xf32> to vector<4x8x32xf32>
    %55 = arith.mulf %52, %54 : vector<4x8x32xf32>
    %56 = vector.extract_strided_slice %9 {offsets = [0, 0, 64], sizes = [4, 8, 32], strides = [1, 1, 1]} : vector<4x8x128xf32> to vector<4x8x32xf32>
    %57 = vector.extract_strided_slice %17 {offsets = [0, 0, 64], sizes = [4, 8, 32], strides = [1, 1, 1]} : vector<4x8x128xf32> to vector<4x8x32xf32>
    %58 = vector.extract_strided_slice %25 {offsets = [0, 0, 64], sizes = [4, 8, 32], strides = [1, 1, 1]} : vector<4x8x128xf32> to vector<4x8x32xf32>
    "tpu.trace_start"() <{level = 10 : i32, message = "bqd,bkd->bqk"}> : () -> ()
    %cst_31 = arith.constant dense<0.000000e+00> : vector<4x8x8xf32>
    %59 = tpu.matmul %56, %57, %cst_31 {dimension_numbers = #tpu.dot_dimension_numbers<[2], [2], [1], [1], [0, 0, 0, 1, 1, 1], [0], [0]>} : vector<4x8x32xf32>, vector<4x8x32xf32>, vector<4x8x8xf32> -> vector<4x8x8xf32>
    "tpu.trace_stop"() : () -> ()
    %cst_32 = arith.constant dense<0xFF800000> : vector<4x8xf32>
    %60 = vector.multi_reduction <maximumf>, %59, %cst_32 [2] : vector<4x8x8xf32> to vector<4x8xf32>
    %61 = vector.shape_cast %60 : vector<4x8xf32> to vector<4x8x1xf32>
    %62 = vector.broadcast %61 : vector<4x8x1xf32> to vector<4x8x8xf32>
    %63 = arith.subf %59, %62 : vector<4x8x8xf32>
    %64 = math.exp %63 : vector<4x8x8xf32>
    %cst_33 = arith.constant dense<0.000000e+00> : vector<4x8xf32>
    %65 = vector.multi_reduction <add>, %64, %cst_33 [2] : vector<4x8x8xf32> to vector<4x8xf32>
    %66 = vector.shape_cast %65 : vector<4x8xf32> to vector<4x8x1xf32>
    "tpu.trace_start"() <{level = 10 : i32, message = "bqk,bkd->bqd"}> : () -> ()
    %cst_34 = arith.constant dense<0.000000e+00> : vector<4x8x32xf32>
    %67 = tpu.matmul %64, %58, %cst_34 {dimension_numbers = #tpu.dot_dimension_numbers<[2], [1], [1], [2], [0, 0, 0, 1, 1, 2], [0], [0]>} : vector<4x8x8xf32>, vector<4x8x32xf32>, vector<4x8x32xf32> -> vector<4x8x32xf32>
    "tpu.trace_stop"() : () -> ()
    %68 = tpu.reciprocal %66 {approx = true} : vector<4x8x1xf32> -> vector<4x8x1xf32>
    %69 = vector.broadcast %68 : vector<4x8x1xf32> to vector<4x8x32xf32>
    %70 = arith.mulf %67, %69 : vector<4x8x32xf32>
    %71 = vector.extract_strided_slice %9 {offsets = [0, 0, 96], sizes = [4, 8, 32], strides = [1, 1, 1]} : vector<4x8x128xf32> to vector<4x8x32xf32>
    %72 = vector.extract_strided_slice %17 {offsets = [0, 0, 96], sizes = [4, 8, 32], strides = [1, 1, 1]} : vector<4x8x128xf32> to vector<4x8x32xf32>
    %73 = vector.extract_strided_slice %25 {offsets = [0, 0, 96], sizes = [4, 8, 32], strides = [1, 1, 1]} : vector<4x8x128xf32> to vector<4x8x32xf32>
    "tpu.trace_start"() <{level = 10 : i32, message = "bqd,bkd->bqk"}> : () -> ()
    %cst_35 = arith.constant dense<0.000000e+00> : vector<4x8x8xf32>
    %74 = tpu.matmul %71, %72, %cst_35 {dimension_numbers = #tpu.dot_dimension_numbers<[2], [2], [1], [1], [0, 0, 0, 1, 1, 1], [0], [0]>} : vector<4x8x32xf32>, vector<4x8x32xf32>, vector<4x8x8xf32> -> vector<4x8x8xf32>
    "tpu.trace_stop"() : () -> ()
    %cst_36 = arith.constant dense<0xFF800000> : vector<4x8xf32>
    %75 = vector.multi_reduction <maximumf>, %74, %cst_36 [2] : vector<4x8x8xf32> to vector<4x8xf32>
    %76 = vector.shape_cast %75 : vector<4x8xf32> to vector<4x8x1xf32>
    %77 = vector.broadcast %76 : vector<4x8x1xf32> to vector<4x8x8xf32>
    %78 = arith.subf %74, %77 : vector<4x8x8xf32>
    %79 = math.exp %78 : vector<4x8x8xf32>
    %cst_37 = arith.constant dense<0.000000e+00> : vector<4x8xf32>
    %80 = vector.multi_reduction <add>, %79, %cst_37 [2] : vector<4x8x8xf32> to vector<4x8xf32>
    %81 = vector.shape_cast %80 : vector<4x8xf32> to vector<4x8x1xf32>
    "tpu.trace_start"() <{level = 10 : i32, message = "bqk,bkd->bqd"}> : () -> ()
    %cst_38 = arith.constant dense<0.000000e+00> : vector<4x8x32xf32>
    %82 = tpu.matmul %79, %73, %cst_38 {dimension_numbers = #tpu.dot_dimension_numbers<[2], [1], [1], [2], [0, 0, 0, 1, 1, 2], [0], [0]>} : vector<4x8x8xf32>, vector<4x8x32xf32>, vector<4x8x32xf32> -> vector<4x8x32xf32>
    "tpu.trace_stop"() : () -> ()
    %83 = tpu.reciprocal %81 {approx = true} : vector<4x8x1xf32> -> vector<4x8x1xf32>
    %84 = vector.broadcast %83 : vector<4x8x1xf32> to vector<4x8x32xf32>
    %85 = arith.mulf %82, %84 : vector<4x8x32xf32>
    %86 = tpu.concatenate %40, %55, %70, %85 in 2 : vector<4x8x32xf32>, vector<4x8x32xf32>, vector<4x8x32xf32>, vector<4x8x32xf32> -> vector<4x8x128xf32>
    %87 = vector.shape_cast %86 : vector<4x8x128xf32> to vector<32x128xf32>
    %c0_39 = arith.constant 0 : index
    %c0_40 = arith.constant 0 : index
    %88 = vector.load %arg8[%c0_39, %c0_40] : memref<128x128xf32, #tpu.memory_space<vmem>>, vector<128x128xf32>
    %cst_41 = arith.constant dense<0.000000e+00> : vector<32x128xf32>
    %89 = tpu.matmul %87, %88, %cst_41 {dimension_numbers = #tpu.dot_dimension_numbers<[1], [0], [0], [1], [0, 0, 1, 1], [], []>} : vector<32x128xf32>, vector<128x128xf32>, vector<32x128xf32> -> vector<32x128xf32>
    %c0_42 = arith.constant 0 : index
    %c0_43 = arith.constant 0 : index
    %90 = vector.load %arg9[%c0_42, %c0_43] : memref<1x128xf32, #tpu.memory_space<vmem>>, vector<1x128xf32>
    %91 = vector.broadcast %90 : vector<1x128xf32> to vector<32x128xf32>
    %92 = arith.addf %89, %91 : vector<32x128xf32>
    %93 = vector.shape_cast %92 : vector<32x128xf32> to vector<4x8x128xf32>
    %c0_44 = arith.constant 0 : index
    %c0_45 = arith.constant 0 : index
    %c0_46 = arith.constant 0 : index
    %94 = vector.load %arg10[%c0_44, %c0_45, %c0_46] : memref<4x8x128xf32, #tpu.memory_space<vmem>>, vector<4x8x128xf32>
    tpu.vector_store %arg10[%c0_44, %c0_45, %c0_46], %93 {strides = array<i32>} : memref<4x8x128xf32, #tpu.memory_space<vmem>>, vector<4x8x128xf32>,
    return
  }
  func.func @transform_0(%arg0: i32) -> (i32, i32, i32) {
    %c0_i32 = arith.constant 0 : i32
    %c0_i32_0 = arith.constant 0 : i32
    %c0_i32_1 = arith.constant 0 : i32
    return %arg0, %c0_i32, %c0_i32_0 : i32, i32, i32
  }
  func.func @transform_1(%arg0: i32) -> (i32, i32) {
    %c0_i32 = arith.constant 0 : i32
    %c0_i32_0 = arith.constant 0 : i32
    %c0_i32_1 = arith.constant 0 : i32
    return %c0_i32, %c0_i32_0 : i32, i32
  }
  func.func @transform_2(%arg0: i32) -> (i32, i32) {
    %c0_i32 = arith.constant 0 : i32
    %c0_i32_0 = arith.constant 0 : i32
    %c0_i32_1 = arith.constant 0 : i32
    return %c0_i32, %c0_i32_0 : i32, i32
  }
  func.func @transform_3(%arg0: i32) -> (i32, i32) {
    %c0_i32 = arith.constant 0 : i32
    %c0_i32_0 = arith.constant 0 : i32
    %c0_i32_1 = arith.constant 0 : i32
    return %c0_i32, %c0_i32_0 : i32, i32
  }
  func.func @transform_4(%arg0: i32) -> (i32, i32) {
    %c0_i32 = arith.constant 0 : i32
    %c0_i32_0 = arith.constant 0 : i32
    %c0_i32_1 = arith.constant 0 : i32
    return %c0_i32, %c0_i32_0 : i32, i32
  }
  func.func @transform_5(%arg0: i32) -> (i32, i32) {
    %c0_i32 = arith.constant 0 : i32
    %c0_i32_0 = arith.constant 0 : i32
    %c0_i32_1 = arith.constant 0 : i32
    return %c0_i32, %c0_i32_0 : i32, i32
  }
  func.func @transform_6(%arg0: i32) -> (i32, i32) {
    %c0_i32 = arith.constant 0 : i32
    %c0_i32_0 = arith.constant 0 : i32
    %c0_i32_1 = arith.constant 0 : i32
    return %c0_i32, %c0_i32_0 : i32, i32
  }
  func.func @transform_7(%arg0: i32) -> (i32, i32) {
    %c0_i32 = arith.constant 0 : i32
    %c0_i32_0 = arith.constant 0 : i32
    %c0_i32_1 = arith.constant 0 : i32
    return %c0_i32, %c0_i32_0 : i32, i32
  }
  func.func @transform_8(%arg0: i32) -> (i32, i32) {
    %c0_i32 = arith.constant 0 : i32
    %c0_i32_0 = arith.constant 0 : i32
    %c0_i32_1 = arith.constant 0 : i32
    return %c0_i32, %c0_i32_0 : i32, i32
  }
  func.func @transform_9(%arg0: i32) -> (i32, i32, i32) {
    %c0_i32 = arith.constant 0 : i32
    %c0_i32_0 = arith.constant 0 : i32
    %c0_i32_1 = arith.constant 0 : i32
    return %arg0, %c0_i32, %c0_i32_0 : i32, i32, i32
  }
}

module attributes {stable_mosaic.version = 11 : i64} {
  func.func @_mha_kernel(%arg0: i32, %arg1: memref<4x8x128xf32, #tpu.memory_space<vmem>>, %arg2: memref<128x128xf32, #tpu.memory_space<vmem>>, %arg3: memref<1x128xf32, #tpu.memory_space<vmem>>, %arg4: memref<128x128xf32, #tpu.memory_space<vmem>>, %arg5: memref<1x128xf32, #tpu.memory_space<vmem>>, %arg6: memref<128x128xf32, #tpu.memory_space<vmem>>, %arg7: memref<1x128xf32, #tpu.memory_space<vmem>>, %arg8: memref<128x128xf32, #tpu.memory_space<vmem>>, %arg9: memref<1x128xf32, #tpu.memory_space<vmem>>, %arg10: memref<4x8x128xf32, #tpu.memory_space<vmem>>) attributes {dimension_semantics = [#tpu.dimension_semantics<parallel>], iteration_bounds = array<i64: 2>, scalar_prefetch = 0 : i64, scratch_operands = 0 : i64, tpu.core_type = #tpu.core_type<tc>, window_params = [{transform_indices = @transform_0, window_bounds = array<i64: 4, 8, 128>}, {pipeline_mode = #tpu.pipeline_mode<synchronous>, transform_indices = @transform_1, window_bounds = array<i64: 128, 128>}, {pipeline_mode = #tpu.pipeline_mode<synchronous>, transform_indices = @transform_2, window_bounds = array<i64: 1, 128>}, {pipeline_mode = #tpu.pipeline_mode<synchronous>, transform_indices = @transform_3, window_bounds = array<i64: 128, 128>}, {pipeline_mode = #tpu.pipeline_mode<synchronous>, transform_indices = @transform_4, window_bounds = array<i64: 1, 128>}, {pipeline_mode = #tpu.pipeline_mode<synchronous>, transform_indices = @transform_5, window_bounds = array<i64: 128, 128>}, {pipeline_mode = #tpu.pipeline_mode<synchronous>, transform_indices = @transform_6, window_bounds = array<i64: 1, 128>}, {pipeline_mode = #tpu.pipeline_mode<synchronous>, transform_indices = @transform_7, window_bounds = array<i64: 128, 128>}, {pipeline_mode = #tpu.pipeline_mode<synchronous>, transform_indices = @transform_8, window_bounds = array<i64: 1, 128>}, {transform_indices = @transform_9, window_bounds = array<i64: 4, 8, 128>}]} {
    %c0 = arith.constant 0 : index
    %c0_0 = arith.constant 0 : index
    %c0_1 = arith.constant 0 : index
    %0 = vector.load %arg1[%c0, %c0_0, %c0_1] : memref<4x8x128xf32, #tpu.memory_space<vmem>>, vector<4x8x128xf32>
    %1 = vector.shape_cast %0 : vector<4x8x128xf32> to vector<32x128xf32>
    %c0_2 = arith.constant 0 : index
    %c0_3 = arith.constant 0 : index
    %2 = vector.load %arg2[%c0_2, %c0_3] : memref<128x128xf32, #tpu.memory_space<vmem>>, vector<128x128xf32>
    %cst = arith.constant dense<0.000000e+00> : vector<32x128xf32>
    %3 = tpu.matmul %1, %2, %cst {dimension_numbers = #tpu.dot_dimension_numbers<[1], [0], [0], [1], [0, 0, 1, 1], [], []>} : vector<32x128xf32>, vector<128x128xf32>, vector<32x128xf32> -> vector<32x128xf32>
    %c0_4 = arith.constant 0 : index
    %c0_5 = arith.constant 0 : index
    %4 = vector.load %arg3[%c0_4, %c0_5] : memref<1x128xf32, #tpu.memory_space<vmem>>, vector<1x128xf32>
    %5 = vector.broadcast %4 : vector<1x128xf32> to vector<32x128xf32>
    %6 = arith.addf %3, %5 : vector<32x128xf32>
    %7 = vector.shape_cast %6 : vector<32x128xf32> to vector<4x8x128xf32>
    %cst_6 = arith.constant 0.176776692 : f32
    %8 = vector.broadcast %cst_6 : f32 to vector<4x8x128xf32>
    %9 = arith.mulf %7, %8 : vector<4x8x128xf32>
    %c0_7 = arith.constant 0 : index
    %c0_8 = arith.constant 0 : index
    %c0_9 = arith.constant 0 : index
    %10 = vector.load %arg1[%c0_7, %c0_8, %c0_9] : memref<4x8x128xf32, #tpu.memory_space<vmem>>, vector<4x8x128xf32>
    %11 = vector.shape_cast %10 : vector<4x8x128xf32> to vector<32x128xf32>
    %c0_10 = arith.constant 0 : index
    %c0_11 = arith.constant 0 : index
    %12 = vector.load %arg4[%c0_10, %c0_11] : memref<128x128xf32, #tpu.memory_space<vmem>>, vector<128x128xf32>
    %cst_12 = arith.constant dense<0.000000e+00> : vector<32x128xf32>
    %13 = tpu.matmul %11, %12, %cst_12 {dimension_numbers = #tpu.dot_dimension_numbers<[1], [0], [0], [1], [0, 0, 1, 1], [], []>} : vector<32x128xf32>, vector<128x128xf32>, vector<32x128xf32> -> vector<32x128xf32>
    %c0_13 = arith.constant 0 : index
    %c0_14 = arith.constant 0 : index
    %14 = vector.load %arg5[%c0_13, %c0_14] : memref<1x128xf32, #tpu.memory_space<vmem>>, vector<1x128xf32>
    %15 = vector.broadcast %14 : vector<1x128xf32> to vector<32x128xf32>
    %16 = arith.addf %13, %15 : vector<32x128xf32>
    %17 = vector.shape_cast %16 : vector<32x128xf32> to vector<4x8x128xf32>
    %c0_15 = arith.constant 0 : index
    %c0_16 = arith.constant 0 : index
    %c0_17 = arith.constant 0 : index
    %18 = vector.load %arg1[%c0_15, %c0_16, %c0_17] : memref<4x8x128xf32, #tpu.memory_space<vmem>>, vector<4x8x128xf32>
    %19 = vector.shape_cast %18 : vector<4x8x128xf32> to vector<32x128xf32>
    %c0_18 = arith.constant 0 : index
    %c0_19 = arith.constant 0 : index
    %20 = vector.load %arg6[%c0_18, %c0_19] : memref<128x128xf32, #tpu.memory_space<vmem>>, vector<128x128xf32>
    %cst_20 = arith.constant dense<0.000000e+00> : vector<32x128xf32>
    %21 = tpu.matmul %19, %20, %cst_20 {dimension_numbers = #tpu.dot_dimension_numbers<[1], [0], [0], [1], [0, 0, 1, 1], [], []>} : vector<32x128xf32>, vector<128x128xf32>, vector<32x128xf32> -> vector<32x128xf32>
    %c0_21 = arith.constant 0 : index
    %c0_22 = arith.constant 0 : index
    %22 = vector.load %arg7[%c0_21, %c0_22] : memref<1x128xf32, #tpu.memory_space<vmem>>, vector<1x128xf32>
    %23 = vector.broadcast %22 : vector<1x128xf32> to vector<32x128xf32>
    %24 = arith.addf %21, %23 : vector<32x128xf32>
    %25 = vector.shape_cast %24 : vector<32x128xf32> to vector<4x8x128xf32>
    %26 = vector.extract_strided_slice %9 {offsets = [0, 0, 0], sizes = [4, 8, 32], strides = [1, 1, 1]} : vector<4x8x128xf32> to vector<4x8x32xf32>
    %27 = vector.extract_strided_slice %17 {offsets = [0, 0, 0], sizes = [4, 8, 32], strides = [1, 1, 1]} : vector<4x8x128xf32> to vector<4x8x32xf32>
    %28 = vector.extract_strided_slice %25 {offsets = [0, 0, 0], sizes = [4, 8, 32], strides = [1, 1, 1]} : vector<4x8x128xf32> to vector<4x8x32xf32>
    "tpu.trace_start"() <{level = 10 : i32, message = "bqd,bkd->bqk"}> : () -> ()
    %cst_23 = arith.constant dense<0.000000e+00> : vector<4x8x8xf32>
    %29 = tpu.matmul %26, %27, %cst_23 {dimension_numbers = #tpu.dot_dimension_numbers<[2], [2], [1], [1], [0, 0, 0, 1, 1, 1], [0], [0]>} : vector<4x8x32xf32>, vector<4x8x32xf32>, vector<4x8x8xf32> -> vector<4x8x8xf32>
    "tpu.trace_stop"() : () -> ()
    %cst_24 = arith.constant dense<0xFF800000> : vector<4x8xf32>
    %30 = vector.multi_reduction <maximumf>, %29, %cst_24 [2] : vector<4x8x8xf32> to vector<4x8xf32>
    %31 = vector.shape_cast %30 : vector<4x8xf32> to vector<4x8x1xf32>
    %32 = vector.broadcast %31 : vector<4x8x1xf32> to vector<4x8x8xf32>
    %33 = arith.subf %29, %32 : vector<4x8x8xf32>
    %34 = math.exp %33 : vector<4x8x8xf32>
    %cst_25 = arith.constant dense<0.000000e+00> : vector<4x8xf32>
    %35 = vector.multi_reduction <add>, %34, %cst_25 [2] : vector<4x8x8xf32> to vector<4x8xf32>
    %36 = vector.shape_cast %35 : vector<4x8xf32> to vector<4x8x1xf32>
    "tpu.trace_start"() <{level = 10 : i32, message = "bqk,bkd->bqd"}> : () -> ()
    %cst_26 = arith.constant dense<0.000000e+00> : vector<4x8x32xf32>
    %37 = tpu.matmul %34, %28, %cst_26 {dimension_numbers = #tpu.dot_dimension_numbers<[2], [1], [1], [2], [0, 0, 0, 1, 1, 2], [0], [0]>} : vector<4x8x8xf32>, vector<4x8x32xf32>, vector<4x8x32xf32> -> vector<4x8x32xf32>
    "tpu.trace_stop"() : () -> ()
    %38 = tpu.reciprocal %36 {approx = true} : vector<4x8x1xf32> -> vector<4x8x1xf32>
    %39 = vector.broadcast %38 : vector<4x8x1xf32> to vector<4x8x32xf32>
    %40 = arith.mulf %37, %39 : vector<4x8x32xf32>
    %41 = vector.extract_strided_slice %9 {offsets = [0, 0, 32], sizes = [4, 8, 32], strides = [1, 1, 1]} : vector<4x8x128xf32> to vector<4x8x32xf32>
    %42 = vector.extract_strided_slice %17 {offsets = [0, 0, 32], sizes = [4, 8, 32], strides = [1, 1, 1]} : vector<4x8x128xf32> to vector<4x8x32xf32>
    %43 = vector.extract_strided_slice %25 {offsets = [0, 0, 32], sizes = [4, 8, 32], strides = [1, 1, 1]} : vector<4x8x128xf32> to vector<4x8x32xf32>
    "tpu.trace_start"() <{level = 10 : i32, message = "bqd,bkd->bqk"}> : () -> ()
    %cst_27 = arith.constant dense<0.000000e+00> : vector<4x8x8xf32>
    %44 = tpu.matmul %41, %42, %cst_27 {dimension_numbers = #tpu.dot_dimension_numbers<[2], [2], [1], [1], [0, 0, 0, 1, 1, 1], [0], [0]>} : vector<4x8x32xf32>, vector<4x8x32xf32>, vector<4x8x8xf32> -> vector<4x8x8xf32>
    "tpu.trace_stop"() : () -> ()
    %cst_28 = arith.constant dense<0xFF800000> : vector<4x8xf32>
    %45 = vector.multi_reduction <maximumf>, %44, %cst_28 [2] : vector<4x8x8xf32> to vector<4x8xf32>
    %46 = vector.shape_cast %45 : vector<4x8xf32> to vector<4x8x1xf32>
    %47 = vector.broadcast %46 : vector<4x8x1xf32> to vector<4x8x8xf32>
    %48 = arith.subf %44, %47 : vector<4x8x8xf32>
    %49 = math.exp %48 : vector<4x8x8xf32>
    %cst_29 = arith.constant dense<0.000000e+00> : vector<4x8xf32>
    %50 = vector.multi_reduction <add>, %49, %cst_29 [2] : vector<4x8x8xf32> to vector<4x8xf32>
    %51 = vector.shape_cast %50 : vector<4x8xf32> to vector<4x8x1xf32>
    "tpu.trace_start"() <{level = 10 : i32, message = "bqk,bkd->bqd"}> : () -> ()
    %cst_30 = arith.constant dense<0.000000e+00> : vector<4x8x32xf32>
    %52 = tpu.matmul %49, %43, %cst_30 {dimension_numbers = #tpu.dot_dimension_numbers<[2], [1], [1], [2], [0, 0, 0, 1, 1, 2], [0], [0]>} : vector<4x8x8xf32>, vector<4x8x32xf32>, vector<4x8x32xf32> -> vector<4x8x32xf32>
    "tpu.trace_stop"() : () -> ()
    %53 = tpu.reciprocal %51 {approx = true} : vector<4x8x1xf32> -> vector<4x8x1xf32>
    %54 = vector.broadcast %53 : vector<4x8x1xf32> to vector<4x8x32xf32>
    %55 = arith.mulf %52, %54 : vector<4x8x32xf32>
    %56 = vector.extract_strided_slice %9 {offsets = [0, 0, 64], sizes = [4, 8, 32], strides = [1, 1, 1]} : vector<4x8x128xf32> to vector<4x8x32xf32>
    %57 = vector.extract_strided_slice %17 {offsets = [0, 0, 64], sizes = [4, 8, 32], strides = [1, 1, 1]} : vector<4x8x128xf32> to vector<4x8x32xf32>
    %58 = vector.extract_strided_slice %25 {offsets = [0, 0, 64], sizes = [4, 8, 32], strides = [1, 1, 1]} : vector<4x8x128xf32> to vector<4x8x32xf32>
    "tpu.trace_start"() <{level = 10 : i32, message = "bqd,bkd->bqk"}> : () -> ()
    %cst_31 = arith.constant dense<0.000000e+00> : vector<4x8x8xf32>
    %59 = tpu.matmul %56, %57, %cst_31 {dimension_numbers = #tpu.dot_dimension_numbers<[2], [2], [1], [1], [0, 0, 0, 1, 1, 1], [0], [0]>} : vector<4x8x32xf32>, vector<4x8x32xf32>, vector<4x8x8xf32> -> vector<4x8x8xf32>
    "tpu.trace_stop"() : () -> ()
    %cst_32 = arith.constant dense<0xFF800000> : vector<4x8xf32>
    %60 = vector.multi_reduction <maximumf>, %59, %cst_32 [2] : vector<4x8x8xf32> to vector<4x8xf32>
    %61 = vector.shape_cast %60 : vector<4x8xf32> to vector<4x8x1xf32>
    %62 = vector.broadcast %61 : vector<4x8x1xf32> to vector<4x8x8xf32>
    %63 = arith.subf %59, %62 : vector<4x8x8xf32>
    %64 = math.exp %63 : vector<4x8x8xf32>
    %cst_33 = arith.constant dense<0.000000e+00> : vector<4x8xf32>
    %65 = vector.multi_reduction <add>, %64, %cst_33 [2] : vector<4x8x8xf32> to vector<4x8xf32>
    %66 = vector.shape_cast %65 : vector<4x8xf32> to vector<4x8x1xf32>
    "tpu.trace_start"() <{level = 10 : i32, message = "bqk,bkd->bqd"}> : () -> ()
    %cst_34 = arith.constant dense<0.000000e+00> : vector<4x8x32xf32>
    %67 = tpu.matmul %64, %58, %cst_34 {dimension_numbers = #tpu.dot_dimension_numbers<[2], [1], [1], [2], [0, 0, 0, 1, 1, 2], [0], [0]>} : vector<4x8x8xf32>, vector<4x8x32xf32>, vector<4x8x32xf32> -> vector<4x8x32xf32>
    "tpu.trace_stop"() : () -> ()
    %68 = tpu.reciprocal %66 {approx = true} : vector<4x8x1xf32> -> vector<4x8x1xf32>
    %69 = vector.broadcast %68 : vector<4x8x1xf32> to vector<4x8x32xf32>
    %70 = arith.mulf %67, %69 : vector<4x8x32xf32>
    %71 = vector.extract_strided_slice %9 {offsets = [0, 0, 96], sizes = [4, 8, 32], strides = [1, 1, 1]} : vector<4x8x128xf32> to vector<4x8x32xf32>
    %72 = vector.extract_strided_slice %17 {offsets = [0, 0, 96], sizes = [4, 8, 32], strides = [1, 1, 1]} : vector<4x8x128xf32> to vector<4x8x32xf32>
    %73 = vector.extract_strided_slice %25 {offsets = [0, 0, 96], sizes = [4, 8, 32], strides = [1, 1, 1]} : vector<4x8x128xf32> to vector<4x8x32xf32>
    "tpu.trace_start"() <{level = 10 : i32, message = "bqd,bkd->bqk"}> : () -> ()
    %cst_35 = arith.constant dense<0.000000e+00> : vector<4x8x8xf32>
    %74 = tpu.matmul %71, %72, %cst_35 {dimension_numbers = #tpu.dot_dimension_numbers<[2], [2], [1], [1], [0, 0, 0, 1, 1, 1], [0], [0]>} : vector<4x8x32xf32>, vector<4x8x32xf32>, vector<4x8x8xf32> -> vector<4x8x8xf32>
    "tpu.trace_stop"() : () -> ()
    %cst_36 = arith.constant dense<0xFF800000> : vector<4x8xf32>
    %75 = vector.multi_reduction <maximumf>, %74, %cst_36 [2] : vector<4x8x8xf32> to vector<4x8xf32>
    %76 = vector.shape_cast %75 : vector<4x8xf32> to vector<4x8x1xf32>
    %77 = vector.broadcast %76 : vector<4x8x1xf32> to vector<4x8x8xf32>
    %78 = arith.subf %74, %77 : vector<4x8x8xf32>
    %79 = math.exp %78 : vector<4x8x8xf32>
    %cst_37 = arith.constant dense<0.000000e+00> : vector<4x8xf32>
    %80 = vector.multi_reduction <add>, %79, %cst_37 [2] : vector<4x8x8xf32> to vector<4x8xf32>
    %81 = vector.shape_cast %80 : vector<4x8xf32> to vector<4x8x1xf32>
    "tpu.trace_start"() <{level = 10 : i32, message = "bqk,bkd->bqd"}> : () -> ()
    %cst_38 = arith.constant dense<0.000000e+00> : vector<4x8x32xf32>
    %82 = tpu.matmul %79, %73, %cst_38 {dimension_numbers = #tpu.dot_dimension_numbers<[2], [1], [1], [2], [0, 0, 0, 1, 1, 2], [0], [0]>} : vector<4x8x8xf32>, vector<4x8x32xf32>, vector<4x8x32xf32> -> vector<4x8x32xf32>
    "tpu.trace_stop"() : () -> ()
    %83 = tpu.reciprocal %81 {approx = true} : vector<4x8x1xf32> -> vector<4x8x1xf32>
    %84 = vector.broadcast %83 : vector<4x8x1xf32> to vector<4x8x32xf32>
    %85 = arith.mulf %82, %84 : vector<4x8x32xf32>
    %86 = tpu.concatenate %40, %55, %70, %85 in 2 : vector<4x8x32xf32>, vector<4x8x32xf32>, vector<4x8x32xf32>, vector<4x8x32xf32> -> vector<4x8x128xf32>
    %87 = vector.shape_cast %86 : vector<4x8x128xf32> to vector<32x128xf32>
    %c0_39 = arith.constant 0 : index
    %c0_40 = arith.constant 0 : index
    %88 = vector.load %arg8[%c0_39, %c0_40] : memref<128x128xf32, #tpu.memory_space<vmem>>, vector<128x128xf32>
    %cst_41 = arith.constant dense<0.000000e+00> : vector<32x128xf32>
    %89 = tpu.matmul %87, %88, %cst_41 {dimension_numbers = #tpu.dot_dimension_numbers<[1], [0], [0], [1], [0, 0, 1, 1], [], []>} : vector<32x128xf32>, vector<128x128xf32>, vector<32x128xf32> -> vector<32x128xf32>
    %c0_42 = arith.constant 0 : index
    %c0_43 = arith.constant 0 : index
    %90 = vector.load %arg9[%c0_42, %c0_43] : memref<1x128xf32, #tpu.memory_space<vmem>>, vector<1x128xf32>
    %91 = vector.broadcast %90 : vector<1x128xf32> to vector<32x128xf32>
    %92 = arith.addf %89, %91 : vector<32x128xf32>
    %93 = vector.shape_cast %92 : vector<32x128xf32> to vector<4x8x128xf32>
    %c0_44 = arith.constant 0 : index
    %c0_45 = arith.constant 0 : index
    %c0_46 = arith.constant 0 : index
    %94 = vector.load %arg10[%c0_44, %c0_45, %c0_46] : memref<4x8x128xf32, #tpu.memory_space<vmem>>, vector<4x8x128xf32>
    tpu.vector_store %arg10[%c0_44, %c0_45, %c0_46], %93 {strides = array<i32>} : memref<4x8x128xf32, #tpu.memory_space<vmem>>, vector<4x8x128xf32>,
    return
  }
  func.func @transform_0(%arg0: i32) -> (i32, i32, i32) {
    %c0_i32 = arith.constant 0 : i32
    %c0_i32_0 = arith.constant 0 : i32
    %c0_i32_1 = arith.constant 0 : i32
    return %arg0, %c0_i32, %c0_i32_0 : i32, i32, i32
  }
  func.func @transform_1(%arg0: i32) -> (i32, i32) {
    %c0_i32 = arith.constant 0 : i32
    %c0_i32_0 = arith.constant 0 : i32
    %c0_i32_1 = arith.constant 0 : i32
    return %c0_i32, %c0_i32_0 : i32, i32
  }
  func.func @transform_2(%arg0: i32) -> (i32, i32) {
    %c0_i32 = arith.constant 0 : i32
    %c0_i32_0 = arith.constant 0 : i32
    %c0_i32_1 = arith.constant 0 : i32
    return %c0_i32, %c0_i32_0 : i32, i32
  }
  func.func @transform_3(%arg0: i32) -> (i32, i32) {
    %c0_i32 = arith.constant 0 : i32
    %c0_i32_0 = arith.constant 0 : i32
    %c0_i32_1 = arith.constant 0 : i32
    return %c0_i32, %c0_i32_0 : i32, i32
  }
  func.func @transform_4(%arg0: i32) -> (i32, i32) {
    %c0_i32 = arith.constant 0 : i32
    %c0_i32_0 = arith.constant 0 : i32
    %c0_i32_1 = arith.constant 0 : i32
    return %c0_i32, %c0_i32_0 : i32, i32
  }
  func.func @transform_5(%arg0: i32) -> (i32, i32) {
    %c0_i32 = arith.constant 0 : i32
    %c0_i32_0 = arith.constant 0 : i32
    %c0_i32_1 = arith.constant 0 : i32
    return %c0_i32, %c0_i32_0 : i32, i32
  }
  func.func @transform_6(%arg0: i32) -> (i32, i32) {
    %c0_i32 = arith.constant 0 : i32
    %c0_i32_0 = arith.constant 0 : i32
    %c0_i32_1 = arith.constant 0 : i32
    return %c0_i32, %c0_i32_0 : i32, i32
  }
  func.func @transform_7(%arg0: i32) -> (i32, i32) {
    %c0_i32 = arith.constant 0 : i32
    %c0_i32_0 = arith.constant 0 : i32
    %c0_i32_1 = arith.constant 0 : i32
    return %c0_i32, %c0_i32_0 : i32, i32
  }
  func.func @transform_8(%arg0: i32) -> (i32, i32) {
    %c0_i32 = arith.constant 0 : i32
    %c0_i32_0 = arith.constant 0 : i32
    %c0_i32_1 = arith.constant 0 : i32
    return %c0_i32, %c0_i32_0 : i32, i32
  }
  func.func @transform_9(%arg0: i32) -> (i32, i32, i32) {
    %c0_i32 = arith.constant 0 : i32
    %c0_i32_0 = arith.constant 0 : i32
    %c0_i32_1 = arith.constant 0 : i32
    return %arg0, %c0_i32, %c0_i32_0 : i32, i32, i32
  }
}

</mosaic_0001>

<bundles_post_ra>
// kernel: tpu_custom_call.1
= control target key start
LH: loop header
LB: loop body
LE: loop exit
PB: predicated region body
PF: predicated region fallthrough
CT: control target
= control target key end

     0   :  { %s5508_s0 = inlined_call_operand.hbm [shape: f32[8,8,128], index: 0, kind: input, shape index: {}]   ;;  %s5509_s1 = inlined_call_operand.hbm [shape: f32[128,128], index: 1, kind: input, shape index: {}]   ;;  %s5510_s2 = inlined_call_operand.vmem [shape: f32[1,128], index: 2, kind: input, shape index: {}]   ;;  %s5511_s3 = inlined_call_operand.hbm [shape: f32[128,128], index: 3, kind: input, shape index: {}]   ;;  %s5512_s4 = inlined_call_operand.vmem [shape: f32[1,128], index: 4, kind: input, shape index: {}]   ;;  %s5513_s5 = inlined_call_operand.hbm [shape: f32[128,128], index: 5, kind: input, shape index: {}]   ;;  %s5514_s6 = inlined_call_operand.vmem [shape: f32[1,128], index: 6, kind: input, shape index: {}]   ;;  %s5515_s7 = inlined_call_operand.hbm [shape: f32[128,128], index: 7, kind: input, shape index: {}]   ;;  %s5516_s8 = inlined_call_operand.vmem [shape: f32[1,128], index: 8, kind: input, shape index: {}]   ;;  %s5517_s9 = inlined_call_operand.hbm [shape: f32[8,8,128], index: 9, kind: output, shape index: {}]  }
   0x1   :  { %5524 = sst [smem:[#allocation18_spill]] %s5517_s9 }
   0x2   :  { %14 = vsyncpa [#allocation3], 0 }
   0x3   :  { %16 = vsyncpa [#allocation3 + $0x1], 0 }
   0x4   :  { %17 = vsyncpa [#allocation6], 0 }
   0x5   :  { %18 = vsyncpa [#allocation9], 0 }
   0x6   :  { %19 = vsyncpa [#allocation4], 0 }
   0x7   :  { %21 = vsyncpa [#allocation4 + $0x1], 0  ;;  %s4801_s30 = smov 0   ;;  %s4803_s10 = smov 0  }
   0x8   :  { %s4805_s11 = smov 0   ;;  %s4807_s12 = smov 0  }
   0x9 LB: > { %5525 = sst [smem:[#allocation16_spill]] %s4722_s30  ;;  %s4822_s13 = sadd.s32 4294967295, %s4734_s12   ;;  %s4734_s12 = sphi %s4807_s12, %s5549_s12   ;;  %s4730_s11 = sphi %s4805_s11, %s5548_s11   ;;  %s4726_s10 = sphi %s4803_s10, %s5547_s10   ;;  %s4722_s30 = sphi %s4801_s30, %s5546_s30  }
   0xa   : > { %s3668_s14 = sadd.s32 4294967294, %s4734_s12   ;;  %p47_p0 = scmp.ne.s32.totalorder %s4726_s10, %s4722_s30 }
   0xb   : > { %p5518_p1 = scmp.eq.s32.totalorder %s4822_s13, 0  ;;  %p245_p3 = scmp.eq.s32.totalorder %s3668_s14, 1 }
   0xc   : > { %p3669_p5 = scmp.ge.s32.totalorder %s4734_s12, 1  ;;  %p252_p7 = scmp.lt.s32.totalorder %s4734_s12, 3 }
   0xd   : > { %p4831_p4 = por %p5518_p1, %p47_p0  ;;  %p4836_p6 = por %p245_p3, %p47_p0 }
   0xe   : > { %p4841_p8 = pnand %p3669_p5, %p252_p7  ;;  %s4736_s18 = smov [#allocation5]  }
   0xf   : > { %s5526_s15 = scalar_select %p4831_p4, 1, 0 }
  0x10   : > { %s5527_s16 = scalar_select %p4836_p6, 1, 0 }
  0x11   : > { %s5529_s17 = scalar_select %p4841_p8, 1, 0 }
  0x12   : > { %5528 = sst [smem:[#allocation17_spill]] %s5527_s16  ;;  %s264_s19 = sshll.u32 %s4736_s18, 4  ;;  %s4845_s19 = int_to_ptr.vmem [resolvable:$true] %s264_s19 }
  0x13   : > { %p4348_p9 = pneg %p4841_p8  ;;  %s4737_s21 = smov [#allocation8]  }
  0x14   : > { %s296_s22 = sshll.u32 %s4737_s21, 4  ;;  %s4738_s23 = smov [#allocation7]   ;;  %s4856_s22 = int_to_ptr.vmem [resolvable:$true] %s296_s22 }
  0x15   : > { %p4852_p11 = pnand %p4348_p9, %p5518_p1  ;;  %s4858_s24 = sshll.u32 %s4738_s23, 4  ;;  %s281_s24 = int_to_ptr.vmem [resolvable:$true] %s4858_s24 }
  0x16   : > { %s4518_s27 = scalar_lea.hbm %s5509_s1, 2048 }
  0x17   : > { %p4519_p12 = scmp.ne.s32.totalorder %s5509_s1, %s4518_s27  ;;  %p4868_p13 = pneg %p4852_p11 }
  0x18   : > { %p4525_p5 = scmp.lt.u32.totalorder %s4518_s27, %s5509_s1 }
  0x19   : > { %p4521_p0 = pnand %p4868_p13, %p4519_p12 }
  0x1b   : > { %p4522_p3 = pneg %p4521_p0 }
  0x1d   : > { %p4527_p7 = pnand %p4525_p5, %p4522_p3 }
  0x1f   : > { %4530 = shalt.err (!%p4527_p7)
}
  0x20   : > { %s4531_s23 = scalar_lea.vmem %s4845_s19, 2048  ;;  %p4539_p2 = scmp.lt.s32.totalorder %s4845_s19, %s4845_s19 }
  0x21   : > { %p4532_p9 = scmp.ne.s32.totalorder %s4845_s19, %s4531_s23  ;;  %p4540_p6 = scmp.lt.s32.totalorder %s4531_s23, %s4531_s23 }
  0x23   : > { %p4534_p10 = pnand %p4532_p9, %p4868_p13  ;;  %p4541_p12 = por %p4540_p6, %p4539_p2 }
  0x25   : > { %p4535_p1 = pneg %p4534_p10 }
  0x27   : > { %p4542_p0 = pnand %p4541_p12, %p4535_p1 }
  0x29   : > { %4545 = shalt.err (!%p4542_p0)
}
  0x2a   : > { %s4739_s25 = smov 128   ;;  %s4740_s26 = smov 8  }
  0x2b   : > { %4351 = dma.hbm_to_vmem [thread:$0]  (!%p4852_p11), %s5509_s1, 2048, %s4845_s19, [#allocation6], %s4739_s25, %s4739_s25, %s4740_s26  }
  0x2c   : > { %s4546_s21 = scalar_lea.hbm %s5513_s5, 2048 }
  0x2d   : > { %p4547_p1 = scmp.ne.s32.totalorder %s5513_s5, %s4546_s21  ;;  %p4553_p10 = scmp.lt.u32.totalorder %s4546_s21, %s5513_s5 }
  0x2f   : > { %p4549_p2 = pnand %p4547_p1, %p4868_p13 }
  0x31   : > { %p4550_p6 = pneg %p4549_p2 }
  0x33   : > { %p4555_p3 = pnand %p4553_p10, %p4550_p6 }
  0x35   : > { %4558 = shalt.err (!%p4555_p3)
}
  0x36   : > { %s4559_s19 = scalar_lea.vmem %s4856_s22, 2048  ;;  %p4567_p12 = scmp.lt.s32.totalorder %s4856_s22, %s4856_s22 }
  0x37   : > { %p4560_p5 = scmp.ne.s32.totalorder %s4856_s22, %s4559_s19  ;;  %p4568_p0 = scmp.lt.s32.totalorder %s4559_s19, %s4559_s19 }
  0x39   : > { %p4562_p7 = pnand %p4560_p5, %p4868_p13  ;;  %p4569_p1 = por %p4568_p0, %p4567_p12 }
  0x3b   : > { %p4563_p9 = pneg %p4562_p7 }
  0x3d   : > { %p4570_p2 = pnand %p4569_p1, %p4563_p9 }
  0x3f   : > { %4573 = shalt.err (!%p4570_p2)
}
  0x40   : > { %4357 = dma.hbm_to_vmem [thread:$0]  (!%p4852_p11), %s5513_s5, 2048, %s4856_s22, [#allocation9], %s4739_s25, %s4739_s25, %s4740_s26  }
  0x41   : > { %s4574_s28 = scalar_lea.hbm %s5511_s3, 2048 }
  0x42   : > { %p4575_p6 = scmp.ne.s32.totalorder %s5511_s3, %s4574_s28  ;;  %p4581_p5 = scmp.lt.u32.totalorder %s4574_s28, %s5511_s3 }
  0x44   : > { %p4577_p10 = pnand %p4575_p6, %p4868_p13 }
  0x46   : > { %p4578_p3 = pneg %p4577_p10 }
  0x48   : > { %p4583_p7 = pnand %p4581_p5, %p4578_p3 }
  0x4a   : > { %4586 = shalt.err (!%p4583_p7)
}
  0x4b   : > { %s4587_s19 = scalar_lea.vmem %s281_s24, 2048  ;;  %p4595_p1 = scmp.lt.s32.totalorder %s281_s24, %s281_s24 }
  0x4c   : > { %p4588_p9 = scmp.ne.s32.totalorder %s281_s24, %s4587_s19  ;;  %p4596_p2 = scmp.lt.s32.totalorder %s4587_s19, %s4587_s19 }
  0x4e   : > { %p4590_p12 = pnand %p4588_p9, %p4868_p13  ;;  %p4597_p4 = por %p4596_p2, %p4595_p1 }
  0x50   : > { %p4591_p0 = pneg %p4590_p12 }
  0x52   : > { %p4598_p8 = pnand %p4597_p4, %p4591_p0 }
  0x54   : > { %4601 = shalt.err (!%p4598_p8)
}
  0x55   : > { %4354 = dma.hbm_to_vmem [thread:$0]  (!%p4852_p11), %s5511_s3, 2048, %s281_s24, [#allocation6], %s4739_s25, %s4739_s25, %s4740_s26  }
  0x56   : > { %s4741_s30 = smov [#allocation10]   ;;  %s4602_s29 = scalar_lea.hbm %s5515_s7, 2048 }
  0x57   : > { %s312_s16 = sshll.u32 %s4741_s30, 4  ;;  %p4603_p4 = scmp.ne.s32.totalorder %s5515_s7, %s4602_s29  ;;  %s313_s16 = int_to_ptr.vmem [resolvable:$true] %s312_s16 }
  0x58   : > { %p4609_p10 = scmp.lt.u32.totalorder %s4602_s29, %s5515_s7 }
  0x59   : > { %p4605_p8 = pnand %p4603_p4, %p4868_p13 }
  0x5b   : > { %p4606_p6 = pneg %p4605_p8 }
  0x5d   : > { %p4611_p3 = pnand %p4609_p10, %p4606_p6 }
  0x5f   : > { %4614 = shalt.err (!%p4611_p3)
}
  0x60   : > { %s4615_s24 = scalar_lea.vmem %s313_s16, 2048  ;;  %p4623_p12 = scmp.lt.s32.totalorder %s313_s16, %s313_s16 }
  0x61   : > { %p4616_p5 = scmp.ne.s32.totalorder %s313_s16, %s4615_s24  ;;  %p4624_p0 = scmp.lt.s32.totalorder %s4615_s24, %s4615_s24 }
  0x63   : > { %p4618_p7 = pnand %p4616_p5, %p4868_p13  ;;  %p4625_p1 = por %p4624_p0, %p4623_p12 }
  0x65   : > { %p4619_p9 = pneg %p4618_p7 }
  0x67   : > { %p4626_p2 = pnand %p4625_p1, %p4619_p9 }
  0x69   : > { %4629 = shalt.err (!%p4626_p2)
}
  0x6a   : > { %4360 = dma.hbm_to_vmem [thread:$0]  (!%p4852_p11), %s5515_s7, 2048, %s313_s16, [#allocation9], %s4739_s25, %s4739_s25, %s4740_s26  }
  0x6b   : > { %s4962_s14 = sadd.s32 1, %s4734_s12   ;;  %s34_s20 = sadd.s32 1, %s4730_s11 }
  0x6c   : > { %s31_s30 = ssub.s32 %s4734_s12, %s4962_s14  ;;  %p41_p13 = scmp.ne.s32.totalorder %s4730_s11, %s4726_s10 }
  0x6d   : > { %p32_p4 = scmp.eq.s32.totalorder %s31_s30, 0  ;;  %p42_p8 = scmp.eq.s32.totalorder %s4734_s12, 0 }
  0x6e   : > { %p5532_p6 = scmp.eq.s32.totalorder %s4822_s13, 1  ;;  %p4373_p3 = scmp.lt.s32.totalorder %s4734_s12, 2 }
  0x6f   : > { %s4978_s28 = scalar_select %p32_p4, %s4730_s11, %s34_s20  }
  0x70   : > { %p4972_p10 = por %p5532_p6, %p41_p13  ;;  %p43_p5 = por %p42_p8, %p41_p13 }
  0x71   : > { %s329_s29 = sand.u32 1, %s4730_s11   ;;  %s3742_s16 = sshll.u32 %s4734_s12, 9 }
  0x72   : > { %s3675_s18 = sshll.u32 %s329_s29, 5  ;;  %s4985_s19 = scalar_lea.hbm %s5508_s0, %s3742_s16 }
  0x73   : > { %s333_s24 = scalar_lea.vmem [#allocation2], %s3675_s18  ;;  %p4989_p11 = pnand %p4373_p3, %p43_p5 }
  0x74   : > { %s340_s22 = sshll.u32 %s333_s24, 4  ;;  %s4993_s20 = scalar_lea.sflag [#allocation3], %s329_s29  ;;  %s4987_s22 = int_to_ptr.vmem [resolvable:$true] %s340_s22 }
  0x75   : > { %s4630_s30 = scalar_lea.hbm %s4985_s19, 512  ;;  %p4632_p9 = pneg %p4989_p11 }
  0x76   : > { %p4631_p7 = scmp.ne.s32.totalorder %s4985_s19, %s4630_s30  ;;  %s4635_s21 = scalar_lea.hbm %s5508_s0, 1024 }
  0x77   : > { %p4636_p1 = scmp.lt.u32.totalorder %s4985_s19, %s5508_s0  ;;  %p4637_p2 = scmp.lt.u32.totalorder %s4635_s21, %s4630_s30 }
  0x78   : > { %p4633_p12 = pnand %p4632_p9, %p4631_p7  ;;  %p4639_p4 = scmp.lt.u32.totalorder %s4630_s30, %s4985_s19 }
  0x79   : > { %p4638_p13 = por %p4637_p2, %p4636_p1 }
  0x7a   : > { %p4634_p0 = pneg %p4633_p12 }
  0x7b   : > { %p4640_p8 = por %p4639_p4, %p4638_p13 }
  0x7d   : > { %p4641_p6 = pnand %p4640_p8, %p4634_p0 }
  0x7f   : > { %4644 = shalt.err (!%p4641_p6)
}
  0x80   : > { %s4645_s29 = scalar_lea.vmem %s4987_s22, 512  ;;  %s4742_s18 = smov [#allocation2]  }
  0x81   : > { %p4646_p3 = scmp.ne.s32.totalorder %s4987_s22, %s4645_s29  ;;  %s4650_s16 = sshll.u32 %s4742_s18, 4  ;;  %s4651_s16 = int_to_ptr.vmem [resolvable:$false] %s4650_s16 }
  0x82   : > { %s4652_s23 = scalar_lea.vmem %s4651_s16, 1024  ;;  %p4653_p12 = scmp.lt.s32.totalorder %s4987_s22, %s4651_s16 }
  0x83   : > { %p4648_p5 = pnand %p4646_p3, %p4632_p9  ;;  %p4654_p1 = scmp.lt.s32.totalorder %s4652_s23, %s4645_s29 }
  0x85   : > { %p4649_p7 = pneg %p4648_p5  ;;  %p4655_p2 = por %p4654_p1, %p4653_p12 }
  0x87   : > { %p4656_p13 = pnand %p4655_p2, %p4649_p7 }
  0x89   : > { %4659 = shalt.err (!%p4656_p13)
}
  0x8a   : > { %4364 = dma.hbm_to_vmem [thread:$0]  (!%p4989_p11), %s4985_s19, 512, %s4987_s22, %s4993_s20, %s4739_s25, %s4739_s25, %s4740_s26  }
  0x8b   : > { %p5535_p9 = scmp.ne.s32.totalorder %s5529_s17, 0 }
  0x8c   : > { %s5027_s30 = sand.u32 (!%p5535_p9), 1, %s4726_s10   ;;  %p5536_p0 = scmp.ne.s32.totalorder (!%p5535_p9), %s5526_s15, 0 }
  0x8d   : > { %352 = sbr.rel (%p5535_p9) target bundleno = 2579 (0xa13), region = 56  ;;  %s3679_s21 = sshll.u32 (!%p5535_p9), %s5027_s30, 5 }
  0x8e   : > { %s355_s24 = scalar_lea.sflag (!%p5535_p9), [#allocation3], %s5027_s30  ;;  %s5033_s9 = scalar_lea.vmem (!%p5535_p9), [#allocation2], %s3679_s21 }
  0x94   : > { %4705 = dma.done.wait (%p5536_p0), %s355_s24, 512  }
  0x95   : > { %4707 = vsyncadd (%p5536_p0), %s355_s24, 4294966784  ;;  %p5537_p11 = scmp.eq.s32.totalorder %s4822_s13, 0 }
  0x97   : > { %4709 = dma.done.wait (%p5537_p11), [#allocation6], 4096   ;;  %p5538_p4 = pmov %p5537_p11 }
  0x99   : > { %4711 = vsyncadd (%p5538_p4), [#allocation6], 4294963200  ;;  %p5539_p8 = pmov %p5538_p4 }
  0x9a   : > { %p5540_p6 = pmov %p5538_p4 }
  0x9b   : > { %4713 = dma.done.wait (%p5539_p8), [#allocation9], 4096  }
  0x9c   : > { %4715 = vsyncadd (%p5540_p6), [#allocation9], 4294963200  ;;  %v415_v0 = vld [vmem:[#allocation5] sm:$0xff]  ;;  %v416_v1 = vld [vmem:[#allocation5 + $0x8] sm:$0xff]  ;;  %vm4744_vm0 = vmmov 0   ;;  %vm743_vm1 = vcmask 261120  }
  0x9d   : > { %v417_v2 = vld [vmem:[#allocation5 + $0x10] sm:$0xff]  ;;  %v4200_v3 = vpack.c.bf16 %v416_v1, %v415_v0  ;;  %v418_v4 = vld [vmem:[#allocation5 + $0x18] sm:$0xff]  ;;  %v419_v6 = vld [vmem:[#allocation5 + $0x20] sm:$0xff]  ;;  %vm1048_vm2 = vcmask 64512   ;;  %s4745_s20 = smov 96   ;;  %s4746_s29 = smov 64  }
  0x9e   : > { %v4204_v5 = vpack.c.bf16 %v418_v4, %v417_v2  ;;  %v420_v7 = vld [vmem:[#allocation5 + $0x28] sm:$0xff]  ;;  %v411_v9 = vld [vmem:[%s5033_s9] sm:$0xff]  ;;  %v421_v10 = vld [vmem:[#allocation5 + $0x30] sm:$0xff]  ;;  %s4747_s18 = smov 32   ;;  %vm3421_vm3 = vcmask 523264   ;;  %vm3426_vm4 = vcmask 785408  }
  0x9f   : > { %4201 = vmatprep.subr.bf16.mxu1 %v4200_v3  ;;  %v4208_v8 = vpack.c.bf16 %v420_v7, %v419_v6  ;;  %v422_v11 = vld [vmem:[#allocation5 + $0x38] sm:$0xff]  ;;  %3920 = vmatprep.mubr.f32.mxu1 %v411_v9  ;;  %v423_v13 = vld [vmem:[#allocation5 + $0x40] sm:$0xff]  ;;  %v424_v14 = vld [vmem:[#allocation5 + $0x48] sm:$0xff]  ;;  %s408_s24 = scalar_lea.vmem [#allocation11], %s3679_s21  ;;  %s3743_s15 = sshll.u32 %s4822_s13, 9 }
  0xa0   : > { %4203 = vmatpush3.bf16.msra.mxu1 %v4200_v3  ;;  %3996 = vmatprep.mubr.f32.mxu0 %v411_v9  ;;  %v4212_v12 = vpack.c.bf16 %v422_v11, %v421_v10  ;;  %v635_v15 = vld [vmem:[#allocation8] sm:$0xff]  ;;  %v636_v16 = vld [vmem:[#allocation8 + $0x8] sm:$0xff]  ;;  %v4216_v17 = vpack.c.bf16 %v424_v14, %v423_v13  ;;  %v425_v19 = vld [vmem:[#allocation5 + $0x50] sm:$0xff]  ;;  %s5541_s26 = sld [smem:[#allocation18_spill]]  ;;  %s3544_s21 = scalar_lea.sflag [#allocation4], %s5027_s30 }
  0xa1   : > { %4205 = vmatprep.subr.bf16.mxu1 %v4204_v5  ;;  %v4264_v18 = vpack.c.bf16 %v636_v16, %v635_v15  ;;  %v426_v20 = vld [vmem:[#allocation5 + $0x58] sm:$0xff]  ;;  %v427_v22 = vld [vmem:[#allocation5 + $0x60] sm:$0xff]  ;;  %v428_v23 = vld [vmem:[#allocation5 + $0x68] sm:$0xff]  ;;  %s4748_s22 = smov [#allocation11]  }
  0xa2   : > { %v4220_v21 = vpack.c.bf16 %v426_v20, %v425_v19  ;;  %v4224_v24 = vpack.c.bf16 %v428_v23, %v427_v22  ;;  %v429_v25 = vld [vmem:[#allocation5 + $0x70] sm:$0xff]  ;;  %v430_v26 = vld [vmem:[#allocation5 + $0x78] sm:$0xff]  ;;  %v527_v28 = vld [vmem:[#allocation7] sm:$0xff] }
  0xa3   : > { %4265 = vmatprep.subr.bf16.mxu0 %v4264_v18  ;;  %v4228_v27 = vpack.c.bf16 %v430_v26, %v429_v25  ;;  %v528_v29 = vld [vmem:[#allocation7 + $0x8] sm:$0xff]  ;;  %v529_v31 = vld [vmem:[#allocation7 + $0x10] sm:$0xff]  ;;  %v530_v32 = vld [vmem:[#allocation7 + $0x18] sm:$0xff] }
  0xa4   : > { %4207 = vmatpush3.bf16.msra.mxu1 %v4204_v5  ;;  %4267 = vmatpush3.bf16.msra.mxu0 %v4264_v18  ;;  %v4232_v30 = vpack.c.bf16 %v528_v29, %v527_v28  ;;  %v5049_v33 = vld [vmem:[%s5033_s9 + $0x8] sm:$0xff]  ;;  %v4236_v34 = vpack.c.bf16 %v530_v32, %v529_v31  ;;  %v5052_v35 = vld [vmem:[%s5033_s9 + $0x10] sm:$0xff]  ;;  %v531_v36 = vld [vmem:[#allocation7 + $0x20] sm:$0xff] }
  0xa5   : > { %4209 = vmatprep.subr.bf16.mxu1 %v4208_v8  ;;  %v532_v37 = vld [vmem:[#allocation7 + $0x28] sm:$0xff]  ;;  %v5057_v38 = vld [vmem:[%s5033_s9 + $0x18] sm:$0xff]  ;;  %v533_v40 = vld [vmem:[#allocation7 + $0x30] sm:$0xff]  ;;  %s3557_s9 = sshll.u32 %s408_s24, 4  ;;  %s5459_s9 = int_to_ptr.vmem [resolvable:$true] %s3557_s9 }
  0xa6   : > { %v4240_v39 = vpack.c.bf16 %v532_v37, %v531_v36  ;;  %v534_v41 = vld [vmem:[#allocation7 + $0x38] sm:$0xff]  ;;  %v535_v43 = vld [vmem:[#allocation7 + $0x40] sm:$0xff]  ;;  %v536_v44 = vld [vmem:[#allocation7 + $0x48] sm:$0xff]  ;;  %s5464_s19 = scalar_lea.hbm %s5541_s26, %s3743_s15  ;;  %s4660_s13 = scalar_lea.vmem %s5459_s9, 512 }
  0xa7   : > { %v4244_v42 = vpack.c.bf16 %v534_v41, %v533_v40  ;;  %v4248_v45 = vpack.c.bf16 %v536_v44, %v535_v43  ;;  %v537_v46 = vld [vmem:[#allocation7 + $0x50] sm:$0xff]  ;;  %v538_v47 = vld [vmem:[#allocation7 + $0x58] sm:$0xff]  ;;  %v539_v49 = vld [vmem:[#allocation7 + $0x60] sm:$0xff]  ;;  %p4661_p3 = scmp.ne.s32.totalorder %s5459_s9, %s4660_s13 }
  0xa8   : > { %4211 = vmatpush3.bf16.msra.mxu1 %v4208_v8  ;;  %v4252_v48 = vpack.c.bf16 %v538_v47, %v537_v46  ;;  %v540_v50 = vld [vmem:[#allocation7 + $0x68] sm:$0xff]  ;;  %v541_v52 = vld [vmem:[#allocation7 + $0x70] sm:$0xff]  ;;  %v542_v53 = vld [vmem:[#allocation7 + $0x78] sm:$0xff] }
  0xa9   : > { %4213 = vmatprep.subr.bf16.mxu1 %v4212_v12  ;;  %v4256_v51 = vpack.c.bf16 %v540_v50, %v539_v49  ;;  %v4260_v54 = vpack.c.bf16 %v542_v53, %v541_v52  ;;  %v637_v55 = vld [vmem:[#allocation8 + $0x10] sm:$0xff]  ;;  %v638_v56 = vld [vmem:[#allocation8 + $0x18] sm:$0xff]  ;;  %v639_v58 = vld [vmem:[#allocation8 + $0x20] sm:$0xff]  ;;  %p4662_p5 = pnand %p4661_p3, %p4972_p10 }
  0xaa   : > { %v4268_v57 = vpack.c.bf16 %v638_v56, %v637_v55  ;;  %v640_v59 = vld [vmem:[#allocation8 + $0x28] sm:$0xff]  ;;  %v641_v61 = vld [vmem:[#allocation8 + $0x30] sm:$0xff]  ;;  %v642_v62 = vld [vmem:[#allocation8 + $0x38] sm:$0xff] }
  0xab   : > { %v4272_v60 = vpack.c.bf16 %v640_v59, %v639_v58  ;;  %v4276_v63 = vpack.c.bf16 %v642_v62, %v641_v61  ;;  %v643_v0 = vld [vmem:[#allocation8 + $0x40] sm:$0xff]  ;;  %v644_v1 = vld [vmem:[#allocation8 + $0x48] sm:$0xff]  ;;  %v645_v3 = vld [vmem:[#allocation8 + $0x50] sm:$0xff]  ;;  %p4663_p7 = pneg %p4662_p5 }
  0xac   : > { %4215 = vmatpush3.bf16.msra.mxu1 %v4212_v12  ;;  %4269 = vmatprep.subr.bf16.mxu0 %v4268_v57  ;;  %v4280_v2 = vpack.c.bf16 %v644_v1, %v643_v0  ;;  %v646_v4 = vld [vmem:[#allocation8 + $0x58] sm:$0xff]  ;;  %v647_v6 = vld [vmem:[#allocation8 + $0x60] sm:$0xff]  ;;  %v648_v7 = vld [vmem:[#allocation8 + $0x68] sm:$0xff]  ;;  %v4743_v12 = vmov 0.0  }
  0xad   : > { %4217 = vmatprep.subr.bf16.mxu1 %v4216_v17  ;;  %4271 = vmatpush3.bf16.msra.mxu0 %v4268_v57  ;;  %v4284_v5 = vpack.c.bf16 %v646_v4, %v645_v3  ;;  %v4288_v8 = vpack.c.bf16 %v648_v7, %v647_v6  ;;  %v650_v10 = vld [vmem:[#allocation8 + $0x78] sm:$0xff]  ;;  %v3686_v18 = vld [vmem:[%s5512_s4] ss:$0 sm:$0xff] }
  0xae   : > { %4273 = vmatprep.subr.bf16.mxu0 %v4272_v60 }
  0xb0   : > { %4219 = vmatpush3.bf16.msra.mxu1 %v4216_v17  ;;  %v3685_v17 = vld [vmem:[%s5510_s2] ss:$0 sm:$0xff] }
  0xb1   : > { %4221 = vmatprep.subr.bf16.mxu1 %v4220_v21  ;;  %4275 = vmatpush3.bf16.msra.mxu0 %v4272_v60 }
  0xb2   : > { %4277 = vmatprep.subr.bf16.mxu0 %v4276_v63 }
  0xb4   : > { %4223 = vmatpush3.bf16.msra.mxu1 %v4220_v21 }
  0xb5   : > { %4225 = vmatprep.subr.bf16.mxu1 %v4224_v24  ;;  %4279 = vmatpush3.bf16.msra.mxu0 %v4276_v63 }
  0xb6   : > { %4281 = vmatprep.subr.bf16.mxu0 %v4280_v2 }
  0xb8   : > { %4227 = vmatpush3.bf16.msra.mxu1 %v4224_v24 }
  0xb9   : > { %4229 = vmatprep.subr.bf16.mxu1 %v4228_v27  ;;  %4283 = vmatpush3.bf16.msra.mxu0 %v4280_v2 }
  0xba   : > { %4285 = vmatprep.subr.bf16.mxu0 %v4284_v5 }
  0xbc   : > { %4231 = vmatpush3.bf16.msra.mxu1 %v4228_v27 }
  0xbd   : > { %4233 = vmatprep.subr.bf16.mxu1 %v4232_v30  ;;  %4287 = vmatpush3.bf16.msra.mxu0 %v4284_v5 }
  0xbe   : > { %4289 = vmatprep.subr.bf16.mxu0 %v4288_v8 }
  0xbf   : > { %3921 = vmatmul.mubr.f32.vlgmr.msra.gmra.mrb[0].mxu1 %v5049_v33 }
  0xc0   : > { %4235 = vmatpush3.bf16.msra.mxu1 %v4232_v30  ;;  %3923 = vmatprep.mubr.f32.mxu1 %v5052_v35 }
  0xc1   : > { %4237 = vmatprep.subr.bf16.mxu1 %v4236_v34  ;;  %4291 = vmatpush3.bf16.msra.mxu0 %v4288_v8 }
  0xc3   : > { %3924 = vmatmul.mubr.f32.gmra.mrb[2].mxu1 %v5057_v38 }
  0xc4   : > { %4239 = vmatpush3.bf16.msra.mxu1 %v4236_v34  ;;  %3958 = vmatprep.mubr.f32.mxu1 %v411_v9  ;;  %v649_v9 = vld [vmem:[#allocation8 + $0x70] sm:$0xff] }
  0xc5   : > { %4241 = vmatprep.subr.bf16.mxu1 %v4240_v39  ;;  %v4292_v11 = vpack.c.bf16 %v650_v10, %v649_v9 }
  0xc7   : > { %4293 = vmatprep.subr.bf16.mxu0 %v4292_v11 }
  0xc8   : > { %4243 = vmatpush3.bf16.msra.mxu1 %v4240_v39  ;;  %4295 = vmatpush3.bf16.msra.mxu0 %v4292_v11 }
  0xc9   : > { %4245 = vmatprep.subr.bf16.mxu1 %v4244_v42  ;;  %4002 = vmatprep.subr.mxu0 %v4743_v12 }
  0xcb   : > { %3997 = vmatmul.mubr.f32.vlgmr.msra.gmra.mrb[0].mxu0 %v5049_v33 }
  0xcc   : > { %4247 = vmatpush3.bf16.msra.mxu1 %v4244_v42  ;;  %3999 = vmatprep.mubr.f32.mxu0 %v5052_v35 }
  0xcd   : > { %4249 = vmatprep.subr.bf16.mxu1 %v4248_v45 }
  0xcf   : > { %4000 = vmatmul.mubr.f32.gmra.mrb[2].mxu0 %v5057_v38 }
  0xd0   : > { %4251 = vmatpush3.bf16.msra.mxu1 %v4248_v45  ;;  %4004 = vmatprep.mubr.msk.f32.mxu0 %vm4744_vm0, %v4743_v12 }
  0xd1   : > { %4253 = vmatprep.subr.bf16.mxu1 %v4252_v48 }
  0xd4   : > { %4255 = vmatpush3.bf16.msra.mxu1 %v4252_v48 }
  0xd5   : > { %4257 = vmatprep.subr.bf16.mxu1 %v4256_v51 }
  0xd8   : > { %4259 = vmatpush3.bf16.msra.mxu1 %v4256_v51 }
  0xd9   : > { %4261 = vmatprep.subr.bf16.mxu1 %v4260_v54 }
  0xdc   : > { %4263 = vmatpush3.bf16.msra.mxu1 %v4260_v54 }
  0xdd   : > { %4017 = vmatprep.subr.mxu1 %v4743_v12 }
  0xdf   : > { %3959 = vmatmul.mubr.f32.vlgmr.msra.gmra.mrb[4].mxu1 %v5049_v33 }
  0xe0   : > { %3961 = vmatprep.mubr.f32.mxu1 %v5052_v35  ;;  %v3687_v35 = vld [vmem:[%s5514_s6] ss:$0 sm:$0xff] }
  0xe3   : > { %3962 = vmatmul.mubr.f32.gmra.mrb[6].mxu1 %v5057_v38 }
  0xe4   : > { %4019 = vmatprep.mubr.msk.f32.mxu1 %vm4744_vm0, %v4743_v12 }
 0x192   : > { %v3922_v13 = vpop.f32.mrb[0].mxu1 }
 0x193   : > { %v504_v14 = vpop.f32.mrb[1].mxu1  ;;  %v510_v25 = vadd.f32 %v3922_v13, %v3685_v17 }
 0x194   : > { %v505_v20 = vadd.f32 %v3685_v17, %v504_v14 }
 0x195   : > { %v5099_v31 = vmul.f32 0.17677669, %v510_v25 }
 0x196   : > { %v3925_v15 = vpop.f32.mrb[2].mxu1  ;;  %v5082_v26 = vmul.f32 0.17677669, %v505_v20 }
 0x197   : > { %v514_v16 = vpop.f32.mrb[3].mxu1  ;;  %v520_v23 = vadd.f32 %v3925_v15, %v3685_v17 }
 0x198   : > { %v515_v32 = vadd.f32 %v3685_v17, %v514_v16 }
 0x199   : > { %v5093_v30 = vmul.f32 0.17677669, %v520_v23 }
 0x19a   : > { %v5115_v34 = vmul.f32 0.17677669, %v515_v32 }
 0x19e   : > { %v3998_v36 = vpop.f32.mrb[0].mxu0 }
 0x19f   : > { %v5125_v37 = vadd.f32 %v3998_v36, %v3687_v35  ;;  %v724_v38 = vpop.f32.mrb[1].mxu0 }
 0x1a0   : > { %v5127_v39 = vadd.f32 %v3687_v35, %v724_v38 }
 0x1a2   : > { %v4001_v40 = vpop.f32.mrb[2].mxu0 }
 0x1a3   : > { %v5130_v41 = vadd.f32 %v4001_v40, %v3687_v35  ;;  %v734_v42 = vpop.f32.mrb[3].mxu0 }
 0x1a4   : > { %v5133_v43 = vadd.f32 %v3687_v35, %v734_v42 }
 0x1b2   : > { %v3960_v19 = vpop.f32.mrb[4].mxu1 }
 0x1b3   : > { %v616_v21 = vpop.f32.mrb[5].mxu1  ;;  %v5087_v29 = vadd.f32 %v3960_v19, %v3686_v18 }
 0x1b4   : > { %v5078_v22 = vadd.f32 %v3686_v18, %v616_v21 }
 0x1b6   : > { %v3963_v24 = vpop.f32.mrb[6].mxu1  ;;  %4003 = vmatpush3.xpose.msk.msra.mxu0 %vm743_vm1, %v5078_v22 }
 0x1b7   : > { %v5084_v27 = vadd.f32 %v3963_v24, %v3686_v18  ;;  %v626_v28 = vpop.f32.mrb[7].mxu1  ;;  %4007 = vmatprep.subr.mxu0 %v4743_v12 }
 0x1b8   : > { %v5103_v33 = vadd.f32 %v3686_v18, %v626_v28 }
 0x1b9   : > { %4005 = vmatmul.mubr.msk.f32.vlgmr.msra.gmra.mrb[4].mxu0 %vm743_vm1, %v5082_v26  ;;  %4018 = vmatpush3.xpose.msk.msra.mxu1 %vm743_vm1, %v5084_v27 }
 0x1ba   : > { %4008 = vmatpush3.xpose.msk.msra.mxu0 %vm743_vm1, %v5087_v29  ;;  %4009 = vmatprep.mubr.msk.f32.mxu0 %vm4744_vm0, %v4743_v12 }
 0x1bb   : > { %4012 = vmatprep.subr.mxu0 %v4743_v12  ;;  %4022 = vmatprep.subr.mxu1 %v4743_v12 }
 0x1bc   : > { %4020 = vmatmul.mubr.msk.f32.vlgmr.msra.gmra.mrb[8].mxu1 %vm743_vm1, %v5093_v30 }
 0x1bd   : > { %4010 = vmatmul.mubr.msk.f32.vlgmr.msra.gmra.mrb[6].mxu0 %vm743_vm1, %v5099_v31  ;;  %4024 = vmatprep.mubr.msk.f32.mxu1 %vm4744_vm0, %v4743_v12 }
 0x1be   : > { %4013 = vmatpush3.xpose.msk.msra.mxu0 %vm743_vm1, %v5103_v33  ;;  %4014 = vmatprep.mubr.msk.f32.mxu0 %vm4744_vm0, %v4743_v12 }
 0x1bf   : > { %4042 = vmatprep.subr.mxu0 %v4743_v12  ;;  %4023 = vmatpush3.msra.mxu1 %v5127_v39 }
 0x1c0   : > { %4027 = vmatprep.subr.mxu1 %v4743_v12 }
 0x1c1   : > { %4015 = vmatmul.mubr.msk.f32.vlgmr.msra.gmra.mrb[8].mxu0 %vm743_vm1, %v5115_v34 }
 0x1c2   : > { %4044 = vmatprep.mubr.msk.f32.mxu0 %vm4744_vm0, %v4743_v12 }
 0x28c   : > { %v816_v44 = vpop.f32.mrb[4].mxu0 }
 0x28d   : > { %v4006_v45 = vpop.f32.mrb[5].mxu0  ;;  %v1049_v46 = vsel %vm1048_vm2, %v816_v44, -inf }
 0x28e   : > { %1050 = vmax.xlane.f32.xlu0 %v1049_v46 }
 0x28f   : > { %v1044_v47 = vpop.f32.mrb[8].mxu1 }
 0x290   : > { %v892_v48 = vpop.f32.mrb[6].mxu0  ;;  %v4021_v49 = vpop.f32.mrb[9].mxu1  ;;  %v1058_v50 = vsel %vm1048_vm2, %v1044_v47, -inf }
 0x291   : > { %1059 = vmax.xlane.f32.xlu1 %v1058_v50  ;;  %v4011_v51 = vpop.f32.mrb[7].mxu0  ;;  %v1052_v52 = vsel %vm1048_vm2, %v892_v48, -inf }
 0x292   : > { %1053 = vmax.xlane.f32.xlu0 %v1052_v52 }
 0x294   : > { %v968_v53 = vpop.f32.mrb[8].mxu0 }
 0x295   : > { %v4016_v54 = vpop.f32.mrb[9].mxu0  ;;  %v1055_v55 = vsel %vm1048_vm2, %v968_v53, -inf }
 0x2a2   : > { %1465 = vrot.lane.b32.xlu1 %v5087_v29, %s4745_s20 }
 0x2a8   : > { %1387 = vrot.lane.b32.xlu0 %v5078_v22, %s4745_s20 }
 0x2ac   : > { %1543 = vrot.lane.b32.xlu0 %v5103_v33, %s4745_s20 }
 0x2b0   : > { %1541 = vrot.lane.b32.xlu0 %v5115_v34, %s4745_s20 }
 0x2b4   : > { %1734 = vrot.lane.b32.xlu0 %v5127_v39, %s4745_s20 }
 0x2b8   : > { %2051 = vrot.lane.b32.xlu0 %v5078_v22, %s4746_s29 }
 0x2c6   : > { %1056 = vmax.xlane.f32.xlu1 %v1055_v55 }
 0x2d7   : > { %1385 = vrot.lane.b32.xlu1 %v5082_v26, %s4745_s20 }
 0x2db   : > { %1463 = vrot.lane.b32.xlu1 %v5099_v31, %s4745_s20 }
 0x2df   : > { %1621 = vrot.lane.b32.xlu1 %v5084_v27, %s4745_s20 }
 0x2e3   : > { %1619 = vrot.lane.b32.xlu1 %v5093_v30, %s4745_s20 }
 0x2e7   : > { %1811 = vrot.lane.b32.xlu1 %v5125_v37, %s4745_s20 }
 0x2eb   : > { %1888 = vrot.lane.b32.xlu1 %v5133_v43, %s4745_s20 }
 0x2ef   : > { %1965 = vrot.lane.b32.xlu1 %v5130_v41, %s4745_s20 }
 0x31b   : > { %v1051_v56 = vpop.xlane.xlu0 %1050 }
 0x31c   : > { %v1061_v57 = vsub.f32 %v816_v44, %v1051_v56 }
 0x31e   : > { %v1065_v58 = vmul.f32 1.442695, %v1061_v57  ;;  %v1060_v1 = vpop.xlane.xlu1 %1059 }
 0x31f   : > { %v1054_v59 = vpop.xlane.xlu0 %1053  ;;  %v1064_v5 = vsub.f32 %v1044_v47, %v1060_v1 }
 0x320   : > { %4454 = vpow2.f32 %v1065_v58  ;;  %v1062_v60 = vsub.f32 %v892_v48, %v1054_v59 }
 0x321   : > { %v1071_v10 = vmul.f32 1.442695, %v1064_v5 }
 0x322   : > { %v1067_v61 = vmul.f32 1.442695, %v1062_v60  ;;  %v1466_v2 = vpop.permute.xlu1 %1465 }
 0x323   : > { %v1388_v62 = vpop.permute.xlu0 %1387 }
 0x324   : > { %4456 = vpow2.f32 %v1067_v61  ;;  %4043 = vmatpush3.xpose.msk.msra.mxu0 %vm743_vm1, %v1388_v62 }
 0x325   : > { %4052 = vmatprep.subr.mxu0 %v4743_v12 }
 0x327   : > { %v1544_v3 = vpop.permute.xlu0 %1543 }
 0x32a   : > { %v5167_v63 = vpop.eup %4454 }
 0x32b   : > { %4025 = vmatmul.mubr.msk.f32.vlgmr.msra.gmra.mrb[10].mxu1 %vm1048_vm2, %v5167_v63  ;;  %v1542_v7 = vpop.permute.xlu0 %1541 }
 0x32c   : > { %4028 = vmatpush3.msra.mxu1 %v5125_v37  ;;  %4029 = vmatprep.mubr.msk.f32.mxu1 %vm4744_vm0, %v4743_v12 }
 0x32d   : > { %4032 = vmatprep.subr.mxu1 %v4743_v12 }
 0x32e   : > { %v5175_v0 = vpop.eup %4456 }
 0x32f   : > { %4030 = vmatmul.mubr.msk.f32.vlgmr.msra.gmra.mrb[12].mxu1 %vm1048_vm2, %v5175_v0  ;;  %v1735_v11 = vpop.permute.xlu0 %1734 }
 0x330   : > { %4033 = vmatpush3.msra.mxu1 %v5133_v43  ;;  %4034 = vmatprep.mubr.msk.f32.mxu1 %vm4744_vm0, %v4743_v12 }
 0x331   : > { %4037 = vmatprep.subr.mxu1 %v4743_v12 }
 0x333   : > { %v2052_v51 = vpop.permute.xlu0 %2051 }
 0x353   : > { %v1057_v4 = vpop.xlane.xlu1 %1056 }
 0x354   : > { %v1063_v6 = vsub.f32 %v968_v53, %v1057_v4 }
 0x356   : > { %v1069_v8 = vmul.f32 1.442695, %v1063_v6 }
 0x357   : > { %v1386_v9 = vpop.permute.xlu1 %1385 }
 0x358   : > { %4458 = vpow2.f32 %v1069_v8  ;;  %4045 = vmatmul.mubr.msk.f32.vlgmr.msra.gmra.mrb[10].mxu0 %vm743_vm1, %v1386_v9 }
 0x359   : > { %4053 = vmatpush3.xpose.msk.msra.mxu0 %vm743_vm1, %v1544_v3  ;;  %4054 = vmatprep.mubr.msk.f32.mxu0 %vm4744_vm0, %v4743_v12  ;;  %4460 = vpow2.f32 %v1071_v10 }
 0x35a   : > { %4062 = vmatprep.subr.mxu0 %v4743_v12 }
 0x35b   : > { %v1464_v13 = vpop.permute.xlu1 %1463 }
 0x35c   : > { %4055 = vmatmul.mubr.msk.f32.vlgmr.msra.gmra.mrb[12].mxu0 %vm743_vm1, %v1542_v7 }
 0x35d   : > { %4063 = vmatpush3.msra.mxu0 %v1735_v11  ;;  %4064 = vmatprep.mubr.msk.f32.mxu0 %vm4744_vm0, %v4743_v12 }
 0x35e   : > { %4072 = vmatprep.subr.mxu0 %v4743_v12 }
 0x35f   : > { %v1622_v16 = vpop.permute.xlu1 %1621 }
 0x362   : > { %v5192_v14 = vpop.eup %4458 }
 0x363   : > { %4035 = vmatmul.mubr.msk.f32.vlgmr.msra.gmra.mrb[14].mxu1 %vm1048_vm2, %v5192_v14  ;;  %v5200_v15 = vpop.eup %4460  ;;  %v1620_v17 = vpop.permute.xlu1 %1619 }
 0x364   : > { %4038 = vmatpush3.msra.mxu1 %v5130_v41  ;;  %4039 = vmatprep.mubr.msk.f32.mxu1 %vm4744_vm0, %v4743_v12 }
 0x365   : > { %4047 = vmatprep.subr.mxu1 %v4743_v12 }
 0x367   : > { %4040 = vmatmul.mubr.msk.f32.vlgmr.msra.gmra.mrb[16].mxu1 %vm1048_vm2, %v5200_v15  ;;  %v1812_v18 = vpop.permute.xlu1 %1811 }
 0x368   : > { %4049 = vmatprep.mubr.msk.f32.mxu1 %vm4744_vm0, %v4743_v12 }
 0x36b   : > { %4048 = vmatpush3.xpose.msk.msra.mxu1 %vm743_vm1, %v1466_v2  ;;  %v1889_v58 = vpop.permute.xlu1 %1888 }
 0x36c   : > { %4057 = vmatprep.subr.mxu1 %v4743_v12 }
 0x36e   : > { %4050 = vmatmul.mubr.msk.f32.vlgmr.msra.gmra.mrb[18].mxu1 %vm743_vm1, %v1464_v13 }
 0x36f   : > { %4058 = vmatpush3.xpose.msk.msra.mxu1 %vm743_vm1, %v1622_v16  ;;  %4059 = vmatprep.mubr.msk.f32.mxu1 %vm4744_vm0, %v4743_v12 }
 0x370   : > { %4067 = vmatprep.subr.mxu1 %v4743_v12 }
 0x372   : > { %4060 = vmatmul.mubr.msk.f32.vlgmr.msra.gmra.mrb[20].mxu1 %vm743_vm1, %v1620_v17 }
 0x373   : > { %4068 = vmatpush3.msra.mxu1 %v1812_v18  ;;  %4069 = vmatprep.mubr.msk.f32.mxu1 %vm4744_vm0, %v4743_v12 }
 0x374   : > { %4077 = vmatprep.subr.mxu1 %v4743_v12 }
 0x3fe   : > { %v5217_v19 = vpop.f32.mrb[10].mxu1 }
 0x3ff   : > { %v4026_v20 = vpop.f32.mrb[11].mxu1 }
 0x402   : > { %v5219_v21 = vpop.f32.mrb[12].mxu1 }
 0x403   : > { %v4031_v23 = vpop.f32.mrb[13].mxu1 }
 0x42b   : > { %v1459_v24 = vpop.f32.mrb[10].mxu0 }
 0x42c   : > { %v4046_v25 = vpop.f32.mrb[11].mxu0  ;;  %v1697_v28 = vsel %vm1048_vm2, %v1459_v24, -inf }
 0x42d   : > { %1698 = vmax.xlane.f32.xlu0 %v1697_v28 }
 0x42f   : > { %v1615_v32 = vpop.f32.mrb[12].mxu0 }
 0x430   : > { %v4056_v35 = vpop.f32.mrb[13].mxu0  ;;  %v1703_v36 = vsel %vm1048_vm2, %v1615_v32, -inf }
 0x431   : > { %1704 = vmax.xlane.f32.xlu0 %v1703_v36 }
 0x436   : > { %v5223_v38 = vpop.f32.mrb[14].mxu1 }
 0x437   : > { %v4036_v40 = vpop.f32.mrb[15].mxu1 }
 0x43a   : > { %v5225_v42 = vpop.f32.mrb[16].mxu1 }
 0x43b   : > { %v4041_v44 = vpop.f32.mrb[17].mxu1 }
 0x441   : > { %v1537_v45 = vpop.f32.mrb[18].mxu1 }
 0x442   : > { %v4051_v46 = vpop.f32.mrb[19].mxu1  ;;  %v1700_v47 = vsel %vm1048_vm2, %v1537_v45, -inf }
 0x443   : > { %1701 = vmax.xlane.f32.xlu1 %v1700_v47 }
 0x445   : > { %v1693_v48 = vpop.f32.mrb[20].mxu1 }
 0x446   : > { %v4061_v49 = vpop.f32.mrb[21].mxu1  ;;  %v1706_v50 = vsel %vm1048_vm2, %v1693_v48, -inf }
 0x447   : > { %1707 = vmax.xlane.f32.xlu0 %v1706_v50 }
 0x454   : > { %2129 = vrot.lane.b32.xlu1 %v5087_v29, %s4746_s29 }
 0x458   : > { %2127 = vrot.lane.b32.xlu1 %v5099_v31, %s4746_s29 }
 0x45c   : > { %2285 = vrot.lane.b32.xlu1 %v5084_v27, %s4746_s29 }
 0x45d   : > { %2049 = vrot.lane.b32.xlu0 %v5082_v26, %s4746_s29 }
 0x460   : > { %2283 = vrot.lane.b32.xlu1 %v5093_v30, %s4746_s29 }
 0x461   : > { %2207 = vrot.lane.b32.xlu0 %v5103_v33, %s4746_s29 }
 0x464   : > { %2473 = vrot.lane.b32.xlu1 %v5125_v37, %s4746_s29 }
 0x465   : > { %2205 = vrot.lane.b32.xlu0 %v5115_v34, %s4746_s29 }
 0x468   : > { %2549 = vrot.lane.b32.xlu1 %v5133_v43, %s4746_s29 }
 0x469   : > { %2397 = vrot.lane.b32.xlu0 %v5127_v39, %s4746_s29 }
 0x46c   : > { %2625 = vrot.lane.b32.xlu1 %v5130_v41, %s4746_s29 }
 0x46d   : > { %2711 = vrot.lane.b32.xlu0 %v5078_v22, %s4747_s18  ;;  %v1966_v22 = vpop.permute.xlu1 %1965 }
 0x470   : > { %2789 = vrot.lane.b32.xlu1 %v5087_v29, %s4747_s18 }
 0x4ba   : > { %v1699_v52 = vpop.xlane.xlu0 %1698 }
 0x4bb   : > { %v1709_v53 = vsub.f32 %v1459_v24, %v1699_v52 }
 0x4bd   : > { %v1713_v54 = vmul.f32 1.442695, %v1709_v53 }
 0x4be   : > { %v1705_v55 = vpop.xlane.xlu0 %1704 }
 0x4bf   : > { %4462 = vpow2.f32 %v1713_v54  ;;  %v1711_v56 = vsub.f32 %v1615_v32, %v1705_v55 }
 0x4c1   : > { %v1717_v57 = vmul.f32 1.442695, %v1711_v56 }
 0x4c3   : > { %4464 = vpow2.f32 %v1717_v57 }
 0x4c9   : > { %v5255_v59 = vpop.eup %4462 }
 0x4ca   : > { %4065 = vmatmul.mubr.msk.f32.vlgmr.msra.gmra.mrb[14].mxu0 %vm1048_vm2, %v5255_v59 }
 0x4cb   : > { %4073 = vmatpush3.msra.mxu0 %v1889_v58  ;;  %4074 = vmatprep.mubr.msk.f32.mxu0 %vm4744_vm0, %v4743_v12 }
 0x4cc   : > { %4082 = vmatprep.subr.mxu0 %v4743_v12 }
 0x4cd   : > { %v5262_v29 = vpop.eup %4464 }
 0x4ce   : > { %4075 = vmatmul.mubr.msk.f32.vlgmr.msra.gmra.mrb[16].mxu0 %vm1048_vm2, %v5262_v29 }
 0x4cf   : > { %4084 = vmatprep.mubr.msk.f32.mxu0 %vm4744_vm0, %v4743_v12 }
 0x4d0   : > { %v1702_v60 = vpop.xlane.xlu1 %1701 }
 0x4d1   : > { %v1710_v61 = vsub.f32 %v1537_v45, %v1702_v60 }
 0x4d2   : > { %4083 = vmatpush3.xpose.msk.msra.mxu0 %vm743_vm1, %v2052_v51 }
 0x4d3   : > { %v1715_v62 = vmul.f32 1.442695, %v1710_v61  ;;  %4092 = vmatprep.subr.mxu0 %v4743_v12 }
 0x4d4   : > { %v1708_v1 = vpop.xlane.xlu0 %1707  ;;  %v2130_v3 = vpop.permute.xlu1 %2129 }
 0x4d5   : > { %4466 = vpow2.f32 %v1715_v62  ;;  %v1712_v2 = vsub.f32 %v1693_v48, %v1708_v1 }
 0x4d7   : > { %v1719_v4 = vmul.f32 1.442695, %v1712_v2 }
 0x4d8   : > { %v2050_v5 = vpop.permute.xlu0 %2049  ;;  %v2128_v7 = vpop.permute.xlu1 %2127 }
 0x4d9   : > { %4468 = vpow2.f32 %v1719_v4  ;;  %4085 = vmatmul.mubr.msk.f32.vlgmr.msra.gmra.mrb[18].mxu0 %vm743_vm1, %v2050_v5 }
 0x4da   : > { %4094 = vmatprep.mubr.msk.f32.mxu0 %vm4744_vm0, %v4743_v12 }
 0x4dc   : > { %v2208_v6 = vpop.permute.xlu0 %2207  ;;  %v2286_v11 = vpop.permute.xlu1 %2285 }
 0x4dd   : > { %4093 = vmatpush3.xpose.msk.msra.mxu0 %vm743_vm1, %v2208_v6 }
 0x4de   : > { %4102 = vmatprep.subr.mxu0 %v4743_v12 }
 0x4df   : > { %v5275_v8 = vpop.eup %4466 }
 0x4e0   : > { %4070 = vmatmul.mubr.msk.f32.vlgmr.msra.gmra.mrb[22].mxu1 %vm1048_vm2, %v5275_v8  ;;  %v2206_v9 = vpop.permute.xlu0 %2205  ;;  %v2284_v16 = vpop.permute.xlu1 %2283 }
 0x4e1   : > { %4078 = vmatpush3.msra.mxu1 %v1966_v22  ;;  %4095 = vmatmul.mubr.msk.f32.vlgmr.msra.gmra.mrb[20].mxu0 %vm743_vm1, %v2206_v9 }
 0x4e2   : > { %4079 = vmatprep.mubr.msk.f32.mxu1 %vm4744_vm0, %v4743_v12  ;;  %4087 = vmatprep.subr.mxu1 %v4743_v12 }
 0x4e3   : > { %v5283_v10 = vpop.eup %4468  ;;  %4104 = vmatprep.mubr.msk.f32.mxu0 %vm4744_vm0, %v4743_v12 }
 0x4e4   : > { %4080 = vmatmul.mubr.msk.f32.vlgmr.msra.gmra.mrb[24].mxu1 %vm1048_vm2, %v5283_v10  ;;  %v2398_v13 = vpop.permute.xlu0 %2397  ;;  %v2474_v17 = vpop.permute.xlu1 %2473 }
 0x4e5   : > { %4103 = vmatpush3.msra.mxu0 %v2398_v13  ;;  %4089 = vmatprep.mubr.msk.f32.mxu1 %vm4744_vm0, %v4743_v12 }
 0x4e6   : > { %4112 = vmatprep.subr.mxu0 %v4743_v12 }
 0x4e8   : > { %4088 = vmatpush3.xpose.msk.msra.mxu1 %vm743_vm1, %v2130_v3  ;;  %v2712_v54 = vpop.permute.xlu0 %2711  ;;  %v2550_v57 = vpop.permute.xlu1 %2549 }
 0x4e9   : > { %4097 = vmatprep.subr.mxu1 %v4743_v12 }
 0x4eb   : > { %4090 = vmatmul.mubr.msk.f32.vlgmr.msra.gmra.mrb[26].mxu1 %vm743_vm1, %v2128_v7 }
 0x4ec   : > { %4098 = vmatpush3.xpose.msk.msra.mxu1 %vm743_vm1, %v2286_v11  ;;  %4099 = vmatprep.mubr.msk.f32.mxu1 %vm4744_vm0, %v4743_v12  ;;  %v2626_v58 = vpop.permute.xlu1 %2625 }
 0x4ed   : > { %4107 = vmatprep.subr.mxu1 %v4743_v12 }
 0x4ef   : > { %4100 = vmatmul.mubr.msk.f32.vlgmr.msra.gmra.mrb[28].mxu1 %vm743_vm1, %v2284_v16 }
 0x4f0   : > { %4108 = vmatpush3.msra.mxu1 %v2474_v17  ;;  %4109 = vmatprep.mubr.msk.f32.mxu1 %vm4744_vm0, %v4743_v12 }
 0x4f1   : > { %4117 = vmatprep.subr.mxu1 %v4743_v12 }
 0x59d   : > { %v5303_v18 = vpop.f32.mrb[14].mxu0 }
 0x59e   : > { %v4066_v20 = vpop.f32.mrb[15].mxu0 }
 0x5a1   : > { %v5305_v23 = vpop.f32.mrb[16].mxu0 }
 0x5a2   : > { %v4076_v24 = vpop.f32.mrb[17].mxu0 }
 0x5ac   : > { %v2123_v25 = vpop.f32.mrb[18].mxu0 }
 0x5ad   : > { %v4086_v28 = vpop.f32.mrb[19].mxu0  ;;  %v2361_v32 = vsel %vm1048_vm2, %v2123_v25, -inf }
 0x5ae   : > { %2362 = vmax.xlane.f32.xlu0 %v2361_v32 }
 0x5b3   : > { %v5308_v35 = vpop.f32.mrb[22].mxu1 }
 0x5b4   : > { %v4071_v36 = vpop.f32.mrb[23].mxu1  ;;  %v2279_v40 = vpop.f32.mrb[20].mxu0 }
 0x5b5   : > { %v4096_v44 = vpop.f32.mrb[21].mxu0  ;;  %v2367_v45 = vsel %vm1048_vm2, %v2279_v40, -inf }
 0x5b6   : > { %2368 = vmax.xlane.f32.xlu0 %v2367_v45 }
 0x5b7   : > { %v5311_v46 = vpop.f32.mrb[24].mxu1 }
 0x5b8   : > { %v4081_v47 = vpop.f32.mrb[25].mxu1 }
 0x5be   : > { %v2201_v48 = vpop.f32.mrb[26].mxu1 }
 0x5bf   : > { %v4091_v49 = vpop.f32.mrb[27].mxu1  ;;  %v2364_v50 = vsel %vm1048_vm2, %v2201_v48, -inf }
 0x5c0   : > { %2365 = vmax.xlane.f32.xlu1 %v2364_v50 }
 0x5c2   : > { %v2357_v51 = vpop.f32.mrb[28].mxu1 }
 0x5c3   : > { %v4101_v52 = vpop.f32.mrb[29].mxu1  ;;  %v2370_v53 = vsel %vm1048_vm2, %v2357_v51, -inf }
 0x5c4   : > { %2371 = vmax.xlane.f32.xlu0 %v2370_v53 }
 0x5d1   : > { %2787 = vrot.lane.b32.xlu1 %v5099_v31, %s4747_s18 }
 0x5d5   : > { %2945 = vrot.lane.b32.xlu1 %v5084_v27, %s4747_s18 }
 0x5d9   : > { %2943 = vrot.lane.b32.xlu1 %v5093_v30, %s4747_s18  ;;  %v2790_v30 = vpop.permute.xlu1 %2789 }
 0x5da   : > { %2709 = vrot.lane.b32.xlu0 %v5082_v26, %s4747_s18 }
 0x5de   : > { %2867 = vrot.lane.b32.xlu0 %v5103_v33, %s4747_s18 }
 0x5e2   : > { %2865 = vrot.lane.b32.xlu0 %v5115_v34, %s4747_s18 }
 0x63b   : > { %v2363_v55 = vpop.xlane.xlu0 %2362 }
 0x63c   : > { %v2373_v56 = vsub.f32 %v2123_v25, %v2363_v55 }
 0x63e   : > { %v2377_v31 = vmul.f32 1.442695, %v2373_v56 }
 0x640   : > { %4470 = vpow2.f32 %v2377_v31  ;;  %v1724_v31 = vsel %vm1048_vm2, %v5275_v8, 0.0 }
 0x643   : > { %v2369_v27 = vpop.xlane.xlu0 %2368 }
 0x644   : > { %v2375_v22 = vsub.f32 %v2279_v40, %v2369_v27 }
 0x646   : > { %v2381_v60 = vmul.f32 1.442695, %v2375_v22 }
 0x648   : > { %4472 = vpow2.f32 %v2381_v60 }
 0x64a   : > { %v5327_v61 = vpop.eup %4470 }
 0x64b   : > { %4105 = vmatmul.mubr.msk.f32.vlgmr.msra.gmra.mrb[22].mxu0 %vm1048_vm2, %v5327_v61 }
 0x64c   : > { %4113 = vmatpush3.msra.mxu0 %v2550_v57  ;;  %4114 = vmatprep.mubr.msk.f32.mxu0 %vm4744_vm0, %v4743_v12  ;;  %v1721_v57 = vsel %vm1048_vm2, %v5255_v59, 0.0 }
 0x64d   : > { %v2366_v26 = vpop.xlane.xlu1 %2365  ;;  %4122 = vmatprep.subr.mxu0 %v4743_v12 }
 0x64e   : > { %v2374_v33 = vsub.f32 %v2201_v48, %v2366_v26 }
 0x650   : > { %v2379_v34 = vmul.f32 1.442695, %v2374_v33 }
 0x651   : > { %v2372_v62 = vpop.xlane.xlu0 %2371  ;;  %v2788_v9 = vpop.permute.xlu1 %2787 }
 0x652   : > { %v5334_v1 = vpop.eup %4472  ;;  %4474 = vpow2.f32 %v2379_v34  ;;  %v2376_v2 = vsub.f32 %v2357_v51, %v2372_v62  ;;  %v1727_v34 = vsel %vm1048_vm2, %v5262_v29, 0.0 }
 0x653   : > { %4115 = vmatmul.mubr.msk.f32.vlgmr.msra.gmra.mrb[24].mxu0 %vm1048_vm2, %v5334_v1 }
 0x654   : > { %v2383_v3 = vmul.f32 1.442695, %v2376_v2  ;;  %4123 = vmatpush3.xpose.msk.msra.mxu0 %vm743_vm1, %v2712_v54  ;;  %4124 = vmatprep.mubr.msk.f32.mxu0 %vm4744_vm0, %v4743_v12 }
 0x655   : > { %v2710_v4 = vpop.permute.xlu0 %2709  ;;  %4132 = vmatprep.subr.mxu0 %v4743_v12  ;;  %v2946_v13 = vpop.permute.xlu1 %2945 }
 0x656   : > { %4476 = vpow2.f32 %v2383_v3 }
 0x657   : > { %4125 = vmatmul.mubr.msk.f32.vlgmr.msra.gmra.mrb[26].mxu0 %vm743_vm1, %v2710_v4 }
 0x658   : > { %4134 = vmatprep.mubr.msk.f32.mxu0 %vm4744_vm0, %v4743_v12 }
 0x659   : > { %v2868_v5 = vpop.permute.xlu0 %2867  ;;  %v2944_v16 = vpop.permute.xlu1 %2943 }
 0x65a   : > { %4133 = vmatpush3.xpose.msk.msra.mxu0 %vm743_vm1, %v2868_v5  ;;  %v2391_v5 = vsel %vm1048_vm2, %v5334_v1, 0.0 }
 0x65b   : > { %4142 = vmatprep.subr.mxu0 %v4743_v12 }
 0x65c   : > { %v4475_v6 = vpop.eup %4474 }
 0x65d   : > { %4110 = vmatmul.mubr.msk.f32.vlgmr.msra.gmra.mrb[30].mxu1 %vm1048_vm2, %v4475_v6  ;;  %v2866_v7 = vpop.permute.xlu0 %2865 }
 0x65e   : > { %4118 = vmatpush3.msra.mxu1 %v2626_v58  ;;  %4135 = vmatmul.mubr.msk.f32.vlgmr.msra.gmra.mrb[28].mxu0 %vm743_vm1, %v2866_v7  ;;  %v2385_v58 = vsel %vm1048_vm2, %v5327_v61, 0.0 }
 0x65f   : > { %4119 = vmatprep.mubr.msk.f32.mxu1 %vm4744_vm0, %v4743_v12  ;;  %4127 = vmatprep.subr.mxu1 %v4743_v12 }
 0x660   : > { %v4477_v11 = vpop.eup %4476  ;;  %4144 = vmatprep.mubr.msk.f32.mxu0 %vm4744_vm0, %v4743_v12 }
 0x661   : > { %4120 = vmatmul.mubr.msk.f32.vlgmr.msra.gmra.mrb[32].mxu1 %vm1048_vm2, %v4477_v11 }
 0x662   : > { %4129 = vmatprep.mubr.msk.f32.mxu1 %vm4744_vm0, %v4743_v12 }
 0x665   : > { %4128 = vmatpush3.xpose.msk.msra.mxu1 %vm743_vm1, %v2790_v30 }
 0x666   : > { %4137 = vmatprep.subr.mxu1 %v4743_v12 }
 0x668   : > { %4130 = vmatmul.mubr.msk.f32.vlgmr.msra.gmra.mrb[34].mxu1 %vm743_vm1, %v2788_v9 }
 0x669   : > { %4138 = vmatpush3.xpose.msk.msra.mxu1 %vm743_vm1, %v2946_v13  ;;  %4139 = vmatprep.mubr.msk.f32.mxu1 %vm4744_vm0, %v4743_v12 }
 0x66a   : > { %4147 = vmatprep.subr.mxu1 %v4743_v12 }
 0x66c   : > { %4140 = vmatmul.mubr.msk.f32.vlgmr.msra.gmra.mrb[36].mxu1 %vm743_vm1, %v2944_v16 }
 0x66d   : > { %4149 = vmatprep.mubr.msk.f32.mxu1 %vm4744_vm0, %v4743_v12 }
 0x71e   : > { %v5367_v17 = vpop.f32.mrb[22].mxu0 }
 0x71f   : > { %v4106_v20 = vpop.f32.mrb[23].mxu0 }
 0x726   : > { %v5369_v24 = vpop.f32.mrb[24].mxu0 }
 0x727   : > { %v4116_v25 = vpop.f32.mrb[25].mxu0 }
 0x728   : > { %v1079_v25 = vsel %vm1048_vm2, %v5192_v14, 0.0 }
 0x72a   : > { %v2783_v28 = vpop.f32.mrb[26].mxu0 }
 0x72b   : > { %v4126_v32 = vpop.f32.mrb[27].mxu0  ;;  %v3021_v36 = vsel %vm1048_vm2, %v2783_v28, -inf }
 0x72c   : > { %3022 = vmax.xlane.f32.xlu0 %v3021_v36  ;;  %v1082_v32 = vsel %vm1048_vm2, %v5200_v15, 0.0 }
 0x730   : > { %v5372_v40 = vpop.f32.mrb[30].mxu1 }
 0x731   : > { %v4111_v44 = vpop.f32.mrb[31].mxu1  ;;  %v2939_v45 = vpop.f32.mrb[28].mxu0 }
 0x732   : > { %v4136_v47 = vpop.f32.mrb[29].mxu0  ;;  %v3027_v48 = vsel %vm1048_vm2, %v2939_v45, -inf }
 0x733   : > { %3028 = vmax.xlane.f32.xlu0 %v3027_v48 }
 0x734   : > { %v5375_v49 = vpop.f32.mrb[32].mxu1 }
 0x735   : > { %v4121_v50 = vpop.f32.mrb[33].mxu1 }
 0x73b   : > { %v2861_v51 = vpop.f32.mrb[34].mxu1 }
 0x73c   : > { %v4131_v52 = vpop.f32.mrb[35].mxu1  ;;  %v3024_v53 = vsel %vm1048_vm2, %v2861_v51, -inf }
 0x73d   : > { %3025 = vmax.xlane.f32.xlu1 %v3024_v53 }
 0x73f   : > { %v3017_v54 = vpop.f32.mrb[36].mxu1 }
 0x740   : > { %v4141_v55 = vpop.f32.mrb[37].mxu1  ;;  %v3030_v56 = vsel %vm1048_vm2, %v3017_v54, -inf }
 0x741   : > { %3031 = vmax.xlane.f32.xlu0 %v3030_v56 }
 0x74e   : > { %3133 = vrot.lane.b32.xlu1 %v5125_v37, %s4747_s18  ;;  %v1730_v37 = vsel %vm1048_vm2, %v5283_v10, 0.0 }
 0x752   : > { %3209 = vrot.lane.b32.xlu1 %v5133_v43, %s4747_s18 }
 0x756   : > { %3285 = vrot.lane.b32.xlu1 %v5130_v41, %s4747_s18  ;;  %v2388_v41 = vsel %vm1048_vm2, %v4475_v6, 0.0 }
 0x757   : > { %3057 = vrot.lane.b32.xlu0 %v5127_v39, %s4747_s18  ;;  %v2394_v39 = vsel %vm1048_vm2, %v4477_v11, 0.0  ;;  %v1073_v11 = vsel %vm1048_vm2, %v5167_v63, 0.0  ;;  %v1076_v63 = vsel %vm1048_vm2, %v5175_v0, 0.0 }
 0x776   : > { %1722 = vadd.xlane.f32.xlu0 %v1721_v57 }
 0x77a   : > { %1725 = vadd.xlane.f32.xlu1 %v1724_v31  ;;  %2386 = vadd.xlane.f32.xlu0 %v2385_v58  ;;  %v3432_v58 = vld [vmem:[#allocation10 + $0x8] sm:$0xff] }
 0x77e   : > { %1731 = vadd.xlane.f32.xlu1 %v1730_v37  ;;  %2389 = vadd.xlane.f32.xlu0 %v2388_v41  ;;  %v3433_v37 = vld [vmem:[#allocation10 + $0x10] sm:$0xff] }
 0x782   : > { %2395 = vadd.xlane.f32.xlu1 %v2394_v39  ;;  %v3434_v39 = vld [vmem:[#allocation10 + $0x18] sm:$0xff] }
 0x7b9   : > { %v3023_v43 = vpop.xlane.xlu0 %3022 }
 0x7ba   : > { %v3033_v59 = vsub.f32 %v2783_v28, %v3023_v43  ;;  %v4300_v43 = vpack.c.bf16 %v3434_v39, %v3433_v37 }
 0x7bc   : > { %v3037_v27 = vmul.f32 1.442695, %v3033_v59  ;;  %v3436_v59 = vld [vmem:[#allocation10 + $0x28] sm:$0xff] }
 0x7be   : > { %4478 = vpow2.f32 %v3037_v27 }
 0x7c0   : > { %v3029_v8 = vpop.xlane.xlu0 %3028 }
 0x7c1   : > { %v3035_v22 = vsub.f32 %v2939_v45, %v3029_v8 }
 0x7c3   : > { %v3041_v60 = vmul.f32 1.442695, %v3035_v22 }
 0x7c5   : > { %4480 = vpow2.f32 %v3041_v60 }
 0x7c8   : > { %v4479_v30 = vpop.eup %4478 }
 0x7c9   : > { %v3045_v61 = vsel %vm1048_vm2, %v4479_v30, 0.0 }
 0x7ca   : > { %v3026_v26 = vpop.xlane.xlu1 %3025  ;;  %3046 = vadd.xlane.f32.xlu0 %v3045_v61  ;;  %v3437_v61 = vld [vmem:[#allocation10 + $0x30] sm:$0xff] }
 0x7cb   : > { %v3034_v10 = vsub.f32 %v2861_v51, %v3026_v26  ;;  %v3438_v26 = vld [vmem:[#allocation10 + $0x38] sm:$0xff] }
 0x7cd   : > { %v3039_v33 = vmul.f32 1.442695, %v3034_v10 }
 0x7ce   : > { %v3134_v62 = vpop.permute.xlu1 %3133  ;;  %v3032_v2 = vpop.xlane.xlu0 %3031  ;;  %1728 = vadd.xlane.f32.xlu0 %v1727_v34 }
 0x7cf   : > { %4482 = vpow2.f32 %v3039_v33  ;;  %v3036_v3 = vsub.f32 %v3017_v54, %v3032_v2  ;;  %4148 = vmatpush3.msra.mxu1 %v3134_v62  ;;  %v4481_v6 = vpop.eup %4480  ;;  %v4308_v2 = vpack.c.bf16 %v3438_v26, %v3437_v61 }
 0x7d0   : > { %4157 = vmatprep.subr.mxu1 %v4743_v12  ;;  %v3051_v29 = vsel %vm1048_vm2, %v4481_v6, 0.0 }
 0x7d1   : > { %v3043_v4 = vmul.f32 1.442695, %v3036_v3  ;;  %v3439_v3 = vld [vmem:[#allocation10 + $0x40] sm:$0xff] }
 0x7d2   : > { %v3058_v7 = vpop.permute.xlu0 %3057  ;;  %2392 = vadd.xlane.f32.xlu0 %v2391_v5  ;;  %v3210_v9 = vpop.permute.xlu1 %3209  ;;  %v3441_v5 = vld [vmem:[#allocation10 + $0x50] sm:$0xff] }
 0x7d3   : > { %4484 = vpow2.f32 %v3043_v4  ;;  %4143 = vmatpush3.msra.mxu0 %v3058_v7 }
 0x7d4   : > { %4145 = vmatmul.mubr.msk.f32.vlgmr.msra.gmra.mrb[30].mxu0 %vm1048_vm2, %v4479_v30  ;;  %4152 = vmatprep.subr.mxu0 %v4743_v12 }
 0x7d5   : > { %4153 = vmatpush3.msra.mxu0 %v3210_v9  ;;  %4154 = vmatprep.mubr.msk.f32.mxu0 %vm4744_vm0, %v4743_v12  ;;  %v3443_v9 = vld [vmem:[#allocation10 + $0x60] sm:$0xff] }
 0x7d6   : > { %3052 = vadd.xlane.f32.xlu0 %v3051_v29  ;;  %v3286_v13 = vpop.permute.xlu1 %3285  ;;  %v3444_v29 = vld [vmem:[#allocation10 + $0x68] sm:$0xff] }
 0x7d8   : > { %4155 = vmatmul.mubr.msk.f32.vlgmr.msra.gmra.mrb[32].mxu0 %vm1048_vm2, %v4481_v6  ;;  %v3442_v6 = vld [vmem:[#allocation10 + $0x58] sm:$0xff] }
 0x7d9   : > { %v4483_v1 = vpop.eup %4482  ;;  %v4316_v7 = vpack.c.bf16 %v3442_v6, %v3441_v5 }
 0x7da   : > { %4150 = vmatmul.mubr.msk.f32.vlgmr.msra.gmra.mrb[38].mxu1 %vm1048_vm2, %v4483_v1  ;;  %v3048_v16 = vsel %vm1048_vm2, %v4483_v1, 0.0  ;;  %1074 = vadd.xlane.f32.xlu0 %v1073_v11  ;;  %v3445_v11 = vld [vmem:[#allocation10 + $0x70] sm:$0xff] }
 0x7db   : > { %4158 = vmatpush3.msra.mxu1 %v3286_v13  ;;  %3049 = vadd.xlane.f32.xlu1 %v3048_v16  ;;  %v3446_v13 = vld [vmem:[#allocation10 + $0x78] sm:$0xff] }
 0x7dc   : > { %4159 = vmatprep.mubr.msk.f32.mxu1 %vm4744_vm0, %v4743_v12 }
 0x7dd   : > { %v4485_v20 = vpop.eup %4484 }
 0x7de   : > { %4160 = vmatmul.mubr.msk.f32.vlgmr.msra.gmra.mrb[40].mxu1 %vm1048_vm2, %v4485_v20  ;;  %v3054_v28 = vsel %vm1048_vm2, %v4485_v20, 0.0  ;;  %1080 = vadd.xlane.f32.xlu0 %v1079_v25  ;;  %v4324_v20 = vpack.c.bf16 %v3446_v13, %v3445_v11 }
 0x7df   : > { %3055 = vadd.xlane.f32.xlu1 %v3054_v28 }
 0x7e3   : > { %1077 = vadd.xlane.f32.xlu1 %v1076_v63 }
 0x7e7   : > { %1083 = vadd.xlane.f32.xlu1 %v1082_v32 }
 0x803   : > { %v1723_v36 = vpop.xlane.xlu0 %1722 }
 0x804   : > { %4486 = vrcp.f32 %v1723_v36 }
 0x807   : > { %v1726_v12 = vpop.xlane.xlu1 %1725  ;;  %v2387_v44 = vpop.xlane.xlu0 %2386 }
 0x808   : > { %4488 = vrcp.f32 %v1726_v12 }
 0x809   : > { %4490 = vrcp.f32 %v2387_v44 }
 0x80b   : > { %v2390_v14 = vpop.xlane.xlu0 %2389  ;;  %v1732_v55 = vpop.xlane.xlu1 %1731 }
 0x80c   : > { %4492 = vrcp.f32 %v2390_v14 }
 0x80d   : > { %4494 = vrcp.f32 %v1732_v55 }
 0x80e   : > { %v4487_v45 = vpop.eup %4486 }
 0x80f   : > { %v2045_v48 = vmul.f32 %v4487_v45, %v5303_v18  ;;  %v2396_v57 = vpop.xlane.xlu1 %2395 }
 0x812   : > { %v4489_v47 = vpop.eup %4488 }
 0x813   : > { %v2046_v50 = vmul.f32 %v4489_v47, %v5308_v35  ;;  %v4491_v0 = vpop.eup %4490  ;;  %v3431_v35 = vld [vmem:[#allocation10] sm:$0xff] }
 0x814   : > { %v2705_v15 = vmul.f32 %v4491_v0, %v5367_v17  ;;  %v4296_v41 = vpack.c.bf16 %v3432_v58, %v3431_v35 }
 0x815   : > { %v4424_v51 = vpack.i.bf16 %v2046_v50, %v2045_v48 }
 0x816   : > { %v4493_v52 = vpop.eup %4492  ;;  %4297 = vmatprep.subr.bf16.mxu0 %v4296_v41 }
 0x817   : > { %4425 = vrot.lane.b32.xlu0 %v4424_v51, %s4747_s18  ;;  %v2706_v53 = vmul.f32 %v4493_v52, %v5372_v40  ;;  %v4495_v17 = vpop.eup %4494  ;;  %v3435_v40 = vld [vmem:[#allocation10 + $0x20] sm:$0xff]  ;;  %4299 = vmatpush3.bf16.msra.mxu0 %v4296_v41 }
 0x818   : > { %v2048_v22 = vmul.f32 %v4495_v17, %v5311_v46  ;;  %4301 = vmatprep.subr.bf16.mxu0 %v4300_v43  ;;  %v4304_v60 = vpack.c.bf16 %v3436_v59, %v3435_v40 }
 0x819   : > { %v4429_v54 = vpack.i.bf16 %v2706_v53, %v2705_v15 }
 0x81b   : > { %4430 = vrot.lane.b32.xlu1 %v4429_v54, %s4746_s29  ;;  %4303 = vmatpush3.bf16.msra.mxu0 %v4300_v43 }
 0x81c   : > { %4305 = vmatprep.subr.bf16.mxu0 %v4304_v60 }
 0x81f   : > { %4307 = vmatpush3.bf16.msra.mxu0 %v4304_v60 }
 0x820   : > { %4309 = vmatprep.subr.bf16.mxu0 %v4308_v2 }
 0x823   : > { %4311 = vmatpush3.bf16.msra.mxu0 %v4308_v2 }
 0x857   : > { %v3047_v56 = vpop.xlane.xlu0 %3046 }
 0x85b   : > { %v1729_v31 = vpop.xlane.xlu0 %1728 }
 0x85c   : > { %4496 = vrcp.f32 %v1729_v31 }
 0x85d   : > { %4498 = vrcp.f32 %v2396_v57 }
 0x85f   : > { %v2393_v18 = vpop.xlane.xlu0 %2392 }
 0x860   : > { %4500 = vrcp.f32 %v2393_v18 }
 0x861   : > { %4502 = vrcp.f32 %v3047_v56 }
 0x863   : > { %v3053_v1 = vpop.xlane.xlu0 %3052 }
 0x866   : > { %v4497_v27 = vpop.eup %4496 }
 0x867   : > { %v2047_v8 = vmul.f32 %v4497_v27, %v5305_v23  ;;  %v4499_v30 = vpop.eup %4498  ;;  %v3440_v23 = vld [vmem:[#allocation10 + $0x48] sm:$0xff]  ;;  %v1075_v55 = vpop.xlane.xlu0 %1074 }
 0x868   : > { %v2708_v62 = vmul.f32 %v4499_v30, %v5375_v49  ;;  %v4312_v46 = vpack.c.bf16 %v3440_v23, %v3439_v3  ;;  %v3050_v49 = vpop.xlane.xlu1 %3049 }
 0x869   : > { %v4434_v10 = vpack.i.bf16 %v2048_v22, %v2047_v8  ;;  %4504 = vrcp.f32 %v3050_v49 }
 0x86a   : > { %v4501_v33 = vpop.eup %4500  ;;  %4313 = vmatprep.subr.bf16.mxu0 %v4312_v46  ;;  %4506 = vrcp.f32 %v3053_v1 }
 0x86b   : > { %4435 = vrot.lane.b32.xlu1 %v4434_v10, %s4747_s18  ;;  %v2707_v34 = vmul.f32 %v4501_v33, %v5369_v24  ;;  %4315 = vmatpush3.bf16.msra.mxu0 %v4312_v46  ;;  %v4320_v24 = vpack.c.bf16 %v3444_v29, %v3443_v9  ;;  %v4503_v25 = vpop.eup %4502  ;;  %v1081_v57 = vpop.xlane.xlu0 %1080 }
 0x86c   : > { %4317 = vmatprep.subr.bf16.mxu0 %v4316_v7  ;;  %v3056_v16 = vpop.xlane.xlu1 %3055 }
 0x86d   : > { %v4444_v4 = vpack.i.bf16 %v2708_v62, %v2707_v34  ;;  %4508 = vrcp.f32 %v3056_v16 }
 0x86e   : > { %4510 = vrcp.f32 %v1075_v55 }
 0x86f   : > { %4445 = vrot.lane.b32.xlu0 %v4444_v4, %s4746_s29  ;;  %4319 = vmatpush3.bf16.msra.mxu0 %v4316_v7 }
 0x870   : > { %4321 = vmatprep.subr.bf16.mxu0 %v4320_v24  ;;  %v1078_v56 = vpop.xlane.xlu1 %1077 }
 0x871   : > { %4512 = vrcp.f32 %v1078_v56 }
 0x872   : > { %4514 = vrcp.f32 %v1081_v57 }
 0x873   : > { %4323 = vmatpush3.bf16.msra.mxu0 %v4320_v24  ;;  %v4505_v44 = vpop.eup %4504 }
 0x874   : > { %4325 = vmatprep.subr.bf16.mxu0 %v4324_v20  ;;  %v4507_v48 = vpop.eup %4506  ;;  %v1084_v31 = vpop.xlane.xlu1 %1083 }
 0x875   : > { %4516 = vrcp.f32 %v1084_v31 }
 0x877   : > { %4327 = vmatpush3.bf16.msra.mxu0 %v4324_v20  ;;  %v4509_v0 = vpop.eup %4508 }
 0x878   : > { %v4511_v58 = vpop.eup %4510 }
 0x879   : > { %v1381_v27 = vmul.f32 %v4511_v58, %v5217_v19 }
 0x87b   : > { %v4513_v37 = vpop.eup %4512 }
 0x87c   : > { %v1382_v43 = vmul.f32 %v4513_v37, %v5219_v21  ;;  %v4515_v8 = vpop.eup %4514 }
 0x87d   : > { %v1383_v46 = vmul.f32 %v4515_v8, %v5223_v38 }
 0x87f   : > { %v4517_v60 = vpop.eup %4516 }
 0x880   : > { %v1384_v5 = vmul.f32 %v4517_v60, %v5225_v42  ;;  %v3736_v42 = vld [vmem:[%s5516_s8] ss:$0 sm:$0xff] }
 0x889   : > { %v4426_v35 = vpop.permute.xlu0 %4425 }
 0x88a   : > { %v4428_v41 = vunpack.i.h.bf16 %v4426_v35  ;;  %v4427_v39 = vunpack.i.l.bf16 %v4426_v35 }
 0x88c   : > { %v3418_v30 = vsel %vm743_vm1, %v1382_v43, %v4428_v41  ;;  %v3417_v26 = vsel %vm743_vm1, %v1381_v27, %v4427_v39 }
 0x88d   : > { %v4431_v18 = vpop.permute.xlu1 %4430 }
 0x88e   : > { %v4433_v40 = vunpack.i.h.bf16 %v4431_v18  ;;  %v4432_v59 = vunpack.i.l.bf16 %v4431_v18 }
 0x890   : > { %v3422_v3 = vsel %vm3421_vm3, %v3417_v26, %v4432_v59  ;;  %v3423_v19 = vsel %vm3421_vm3, %v3418_v30, %v4433_v40 }
 0x8a7   : > { %v3129_v28 = vpop.f32.mrb[30].mxu0 }
 0x8a8   : > { %v3365_v63 = vmul.f32 %v4503_v25, %v3129_v28  ;;  %v4146_v32 = vpop.f32.mrb[31].mxu0 }
 0x8ab   : > { %v3281_v36 = vpop.f32.mrb[32].mxu0 }
 0x8ac   : > { %v4156_v12 = vpop.f32.mrb[33].mxu0  ;;  %v3367_v52 = vmul.f32 %v4507_v48, %v3281_v36 }
 0x8ad   : > { %v3205_v14 = vpop.f32.mrb[38].mxu1 }
 0x8ae   : > { %v3366_v45 = vmul.f32 %v4505_v44, %v3205_v14  ;;  %v4151_v47 = vpop.f32.mrb[39].mxu1 }
 0x8b0   : > { %v4439_v50 = vpack.i.bf16 %v3366_v45, %v3365_v63 }
 0x8b1   : > { %v3357_v51 = vpop.f32.mrb[40].mxu1 }
 0x8b2   : > { %v3368_v15 = vmul.f32 %v4509_v0, %v3357_v51  ;;  %v4161_v53 = vpop.f32.mrb[41].mxu1  ;;  %4440 = vrot.lane.b32.xlu1 %v4439_v50, %s4745_s20 }
 0x8b4   : > { %v4449_v54 = vpack.i.bf16 %v3368_v15, %v3367_v52 }
 0x8b6   : > { %4450 = vrot.lane.b32.xlu1 %v4449_v54, %s4745_s20  ;;  %s4664_s20 = sshll.u32 %s4748_s22, 4  ;;  %s4665_s20 = int_to_ptr.vmem [resolvable:$false] %s4664_s20 }
 0x8b7   : > { %s4666_s29 = scalar_lea.vmem %s4665_s20, 1024  ;;  %p4667_p12 = scmp.lt.s32.totalorder %s5459_s9, %s4665_s20 }
 0x8b8   : > { %p4668_p1 = scmp.lt.s32.totalorder %s4666_s29, %s4660_s13 }
 0x8ba   : > { %p4669_p2 = por %p4668_p1, %p4667_p12 }
 0x8bc   : > { %p4670_p13 = pnand %p4669_p2, %p4663_p7 }
 0x8dd   : > { %v4436_v17 = vpop.permute.xlu1 %4435 }
 0x8de   : > { %v4438_v10 = vunpack.i.h.bf16 %v4436_v17  ;;  %v4437_v33 = vunpack.i.l.bf16 %v4436_v17 }
 0x8e0   : > { %v3419_v29 = vsel %vm743_vm1, %v1383_v46, %v4437_v33  ;;  %v3420_v24 = vsel %vm743_vm1, %v1384_v5, %v4438_v10 }
 0x8e1   : > { %v4446_v22 = vpop.permute.xlu0 %4445 }
 0x8e2   : > { %v4448_v2 = vunpack.i.h.bf16 %v4446_v22  ;;  %v4447_v21 = vunpack.i.l.bf16 %v4446_v22 }
 0x8e4   : > { %v3424_v49 = vsel %vm3421_vm3, %v3419_v29, %v4447_v21  ;;  %v3425_v1 = vsel %vm3421_vm3, %v3420_v24, %v4448_v2 }
 0x924   : > { %v4441_v61 = vpop.permute.xlu1 %4440 }
 0x925   : > { %v4443_v34 = vunpack.i.h.bf16 %v4441_v61  ;;  %v4442_v62 = vunpack.i.l.bf16 %v4441_v61 }
 0x927   : > { %v3427_v23 = vsel %vm3426_vm4, %v3422_v3, %v4442_v62  ;;  %v3428_v4 = vsel %vm3426_vm4, %v3423_v19, %v4443_v34 }
 0x928   : > { %4194 = vmatprep.mubr.f32.mxu0 %v3427_v23  ;;  %v4451_v6 = vpop.permute.xlu1 %4450 }
 0x929   : > { %v4453_v7 = vunpack.i.h.bf16 %v4451_v6  ;;  %v4452_v9 = vunpack.i.l.bf16 %v4451_v6  ;;  %4195 = vmatmul.mubr.f32.vlgmr.msra.gmra.mrb[34].mxu0 %v3428_v4 }
 0x92b   : > { %v3429_v11 = vsel %vm3426_vm4, %v3424_v49, %v4452_v9  ;;  %v3430_v38 = vsel %vm3426_vm4, %v3425_v1, %v4453_v7 }
 0x92c   : > { %4197 = vmatprep.mubr.f32.mxu0 %v3429_v11 }
 0x92d   : > { %4198 = vmatmul.mubr.f32.gmra.mrb[36].mxu0 %v3430_v38 }
 0x9fc   : > { %v4196_v13 = vpop.f32.mrb[34].mxu0 }
 0x9fd   : > { %v3526_v16 = vadd.f32 %v4196_v13, %v3736_v42  ;;  %v3520_v20 = vpop.f32.mrb[35].mxu0 }
 0x9fe   : > { %v3521_v25 = vadd.f32 %v3736_v42, %v3520_v20 }
 0x9ff   : > { %3540 = vst [vmem:[%s408_s24 + $0x8] sm:$0xff] %v3526_v16 }
 0xa00   : > { %3539 = vst [vmem:[%s408_s24] sm:$0xff] %v3521_v25  ;;  %v4199_v28 = vpop.f32.mrb[36].mxu0 }
 0xa01   : > { %v3536_v63 = vadd.f32 %v4199_v28, %v3736_v42  ;;  %v3530_v32 = vpop.f32.mrb[37].mxu0 }
 0xa02   : > { %v3531_v36 = vadd.f32 %v3736_v42, %v3530_v32 }
 0xa03   : > { %3542 = vst [vmem:[%s408_s24 + $0x18] sm:$0xff] %v3536_v63 }
 0xa04   : > { %3541 = vst [vmem:[%s408_s24 + $0x10] sm:$0xff] %v3531_v36 }
 0xa05   : > { %4673 = shalt.err (!%p4670_p13)
}
 0xa06   : > { %s4674_s18 = scalar_lea.hbm %s5464_s19, 512  ;;  %s4678_s24 = scalar_lea.hbm %s5541_s26, 1024 }
 0xa07   : > { %p4675_p9 = scmp.ne.s32.totalorder %s5464_s19, %s4674_s18  ;;  %p4679_p4 = scmp.lt.u32.totalorder %s5464_s19, %s5541_s26 }
 0xa08   : > { %p4680_p8 = scmp.lt.u32.totalorder %s4678_s24, %s4674_s18  ;;  %p4682_p3 = scmp.lt.u32.totalorder %s4674_s18, %s5464_s19 }
 0xa09   : > { %p4676_p0 = pnand %p4675_p9, %p4972_p10 }
 0xa0a   : > { %p4681_p6 = por %p4680_p8, %p4679_p4 }
 0xa0b   : > { %p4677_p11 = pneg %p4676_p0 }
 0xa0c   : > { %p4683_p5 = por %p4682_p3, %p4681_p6 }
 0xa0e   : > { %p4684_p7 = pnand %p4683_p5, %p4677_p11 }
 0xa10   : > { %4687 = shalt.err (!%p4684_p7)
}
 0xa11   : > { %s4749_s25 = smov 128   ;;  %s4750_s13 = smov 8  }
 0xa12   : > { %4346 = dma.vmem_to_hbm [thread:$0]  (%p4972_p10), %s5459_s9, 512, %s5464_s19, %s3544_s21, %s4749_s25, %s4749_s25, %s4750_s13  }
 0xa13 PF: > { %s5542_s22 = sld [smem:[#allocation16_spill]]  ;;  %s5543_s20 = sld [smem:[#allocation17_spill]] }
 0xa14   : > { %p5545_p1 = scmp.ge.s32.totalorder %s4734_s12, 2 }
 0xa19   : > { %s3572_s29 = sand.u32 1, %s5542_s22   ;;  %p5544_p12 = scmp.ne.s32.totalorder %s5543_s20, 0 }
 0xa1a   : > { %s3573_s18 = scalar_lea.sflag [#allocation4], %s3572_s29 }
 0xa1b   : > { %p4366_p2 = pnand %p5545_p1, %p5544_p12 }
 0xa1d   : > { %4717 = dma.done.wait (!%p4366_p2), %s3573_s18, 512  }
 0xa1e   : > { %4719 = vsyncadd (!%p4366_p2), %s3573_s18, 4294966784  ;;  %p24_p13 = scmp.ge.s32.totalorder %s4962_s14, 4   ;;  %s5546_s30 = smov %s4726_s10 }
 0xa1f   : > { %s5547_s10 = smov %s4730_s11  ;;  %s5548_s11 = smov %s4978_s28 }
 0xa20   : > { %s5549_s12 = smov %s4962_s14  ;;  %26 = sbr.rel (!%p24_p13) target bundleno = 9 (0x9), region = 117 }
 0xa27   :  { %3578 = vsyncpa [#allocation3], 1 }
 0xa28   :  { %3580 = vsyncpa [#allocation3 + $0x1], 1 }
 0xa29   :  { %3581 = vsyncpa [#allocation6], 1 }
 0xa2a   :  { %3582 = vsyncpa [#allocation9], 1 }
 0xa2b   :  { %3583 = vsyncpa [#allocation4], 1 }
 0xa2c   :  { %3585 = vsyncpa [#allocation4 + $0x1], 1 }

// kernel: tpu_custom_call.1
= control target key start
LH: loop header
LB: loop body
LE: loop exit
PB: predicated region body
PF: predicated region fallthrough
CT: control target
= control target key end

     0   :  { %s5508_s0 = inlined_call_operand.hbm [shape: f32[8,8,128], index: 0, kind: input, shape index: {}]   ;;  %s5509_s1 = inlined_call_operand.hbm [shape: f32[128,128], index: 1, kind: input, shape index: {}]   ;;  %s5510_s2 = inlined_call_operand.vmem [shape: f32[1,128], index: 2, kind: input, shape index: {}]   ;;  %s5511_s3 = inlined_call_operand.hbm [shape: f32[128,128], index: 3, kind: input, shape index: {}]   ;;  %s5512_s4 = inlined_call_operand.vmem [shape: f32[1,128], index: 4, kind: input, shape index: {}]   ;;  %s5513_s5 = inlined_call_operand.hbm [shape: f32[128,128], index: 5, kind: input, shape index: {}]   ;;  %s5514_s6 = inlined_call_operand.vmem [shape: f32[1,128], index: 6, kind: input, shape index: {}]   ;;  %s5515_s7 = inlined_call_operand.hbm [shape: f32[128,128], index: 7, kind: input, shape index: {}]   ;;  %s5516_s8 = inlined_call_operand.vmem [shape: f32[1,128], index: 8, kind: input, shape index: {}]   ;;  %s5517_s9 = inlined_call_operand.hbm [shape: f32[8,8,128], index: 9, kind: output, shape index: {}]  }
   0x1   :  { %5524 = sst [smem:[#allocation18_spill]] %s5517_s9 }
   0x2   :  { %14 = vsyncpa [#allocation3], 0 }
   0x3   :  { %16 = vsyncpa [#allocation3 + $0x1], 0 }
   0x4   :  { %17 = vsyncpa [#allocation6], 0 }
   0x5   :  { %18 = vsyncpa [#allocation9], 0 }
   0x6   :  { %19 = vsyncpa [#allocation4], 0 }
   0x7   :  { %21 = vsyncpa [#allocation4 + $0x1], 0  ;;  %s4801_s30 = smov 0   ;;  %s4803_s10 = smov 0  }
   0x8   :  { %s4805_s11 = smov 0   ;;  %s4807_s12 = smov 0  }
   0x9 LB: > { %5525 = sst [smem:[#allocation16_spill]] %s4722_s30  ;;  %s4822_s13 = sadd.s32 4294967295, %s4734_s12   ;;  %s4734_s12 = sphi %s4807_s12, %s5549_s12   ;;  %s4730_s11 = sphi %s4805_s11, %s5548_s11   ;;  %s4726_s10 = sphi %s4803_s10, %s5547_s10   ;;  %s4722_s30 = sphi %s4801_s30, %s5546_s30  }
   0xa   : > { %s3668_s14 = sadd.s32 4294967294, %s4734_s12   ;;  %p47_p0 = scmp.ne.s32.totalorder %s4726_s10, %s4722_s30 }
   0xb   : > { %p5518_p1 = scmp.eq.s32.totalorder %s4822_s13, 0  ;;  %p245_p3 = scmp.eq.s32.totalorder %s3668_s14, 1 }
   0xc   : > { %p3669_p5 = scmp.ge.s32.totalorder %s4734_s12, 1  ;;  %p252_p7 = scmp.lt.s32.totalorder %s4734_s12, 3 }
   0xd   : > { %p4831_p4 = por %p5518_p1, %p47_p0  ;;  %p4836_p6 = por %p245_p3, %p47_p0 }
   0xe   : > { %p4841_p8 = pnand %p3669_p5, %p252_p7  ;;  %s4736_s18 = smov [#allocation5]  }
   0xf   : > { %s5526_s15 = scalar_select %p4831_p4, 1, 0 }
  0x10   : > { %s5527_s16 = scalar_select %p4836_p6, 1, 0 }
  0x11   : > { %s5529_s17 = scalar_select %p4841_p8, 1, 0 }
  0x12   : > { %5528 = sst [smem:[#allocation17_spill]] %s5527_s16  ;;  %s264_s19 = sshll.u32 %s4736_s18, 4  ;;  %s4845_s19 = int_to_ptr.vmem [resolvable:$true] %s264_s19 }
  0x13   : > { %p4348_p9 = pneg %p4841_p8  ;;  %s4737_s21 = smov [#allocation8]  }
  0x14   : > { %s296_s22 = sshll.u32 %s4737_s21, 4  ;;  %s4738_s23 = smov [#allocation7]   ;;  %s4856_s22 = int_to_ptr.vmem [resolvable:$true] %s296_s22 }
  0x15   : > { %p4852_p11 = pnand %p4348_p9, %p5518_p1  ;;  %s4858_s24 = sshll.u32 %s4738_s23, 4  ;;  %s281_s24 = int_to_ptr.vmem [resolvable:$true] %s4858_s24 }
  0x16   : > { %s4518_s27 = scalar_lea.hbm %s5509_s1, 2048 }
  0x17   : > { %p4519_p12 = scmp.ne.s32.totalorder %s5509_s1, %s4518_s27  ;;  %p4868_p13 = pneg %p4852_p11 }
  0x18   : > { %p4525_p5 = scmp.lt.u32.totalorder %s4518_s27, %s5509_s1 }
  0x19   : > { %p4521_p0 = pnand %p4868_p13, %p4519_p12 }
  0x1b   : > { %p4522_p3 = pneg %p4521_p0 }
  0x1d   : > { %p4527_p7 = pnand %p4525_p5, %p4522_p3 }
  0x1f   : > { %4530 = shalt.err (!%p4527_p7)
}
  0x20   : > { %s4531_s23 = scalar_lea.vmem %s4845_s19, 2048  ;;  %p4539_p2 = scmp.lt.s32.totalorder %s4845_s19, %s4845_s19 }
  0x21   : > { %p4532_p9 = scmp.ne.s32.totalorder %s4845_s19, %s4531_s23  ;;  %p4540_p6 = scmp.lt.s32.totalorder %s4531_s23, %s4531_s23 }
  0x23   : > { %p4534_p10 = pnand %p4532_p9, %p4868_p13  ;;  %p4541_p12 = por %p4540_p6, %p4539_p2 }
  0x25   : > { %p4535_p1 = pneg %p4534_p10 }
  0x27   : > { %p4542_p0 = pnand %p4541_p12, %p4535_p1 }
  0x29   : > { %4545 = shalt.err (!%p4542_p0)
}
  0x2a   : > { %s4739_s25 = smov 128   ;;  %s4740_s26 = smov 8  }
  0x2b   : > { %4351 = dma.hbm_to_vmem [thread:$0]  (!%p4852_p11), %s5509_s1, 2048, %s4845_s19, [#allocation6], %s4739_s25, %s4739_s25, %s4740_s26  }
  0x2c   : > { %s4546_s21 = scalar_lea.hbm %s5513_s5, 2048 }
  0x2d   : > { %p4547_p1 = scmp.ne.s32.totalorder %s5513_s5, %s4546_s21  ;;  %p4553_p10 = scmp.lt.u32.totalorder %s4546_s21, %s5513_s5 }
  0x2f   : > { %p4549_p2 = pnand %p4547_p1, %p4868_p13 }
  0x31   : > { %p4550_p6 = pneg %p4549_p2 }
  0x33   : > { %p4555_p3 = pnand %p4553_p10, %p4550_p6 }
  0x35   : > { %4558 = shalt.err (!%p4555_p3)
}
  0x36   : > { %s4559_s19 = scalar_lea.vmem %s4856_s22, 2048  ;;  %p4567_p12 = scmp.lt.s32.totalorder %s4856_s22, %s4856_s22 }
  0x37   : > { %p4560_p5 = scmp.ne.s32.totalorder %s4856_s22, %s4559_s19  ;;  %p4568_p0 = scmp.lt.s32.totalorder %s4559_s19, %s4559_s19 }
  0x39   : > { %p4562_p7 = pnand %p4560_p5, %p4868_p13  ;;  %p4569_p1 = por %p4568_p0, %p4567_p12 }
  0x3b   : > { %p4563_p9 = pneg %p4562_p7 }
  0x3d   : > { %p4570_p2 = pnand %p4569_p1, %p4563_p9 }
  0x3f   : > { %4573 = shalt.err (!%p4570_p2)
}
  0x40   : > { %4357 = dma.hbm_to_vmem [thread:$0]  (!%p4852_p11), %s5513_s5, 2048, %s4856_s22, [#allocation9], %s4739_s25, %s4739_s25, %s4740_s26  }
  0x41   : > { %s4574_s28 = scalar_lea.hbm %s5511_s3, 2048 }
  0x42   : > { %p4575_p6 = scmp.ne.s32.totalorder %s5511_s3, %s4574_s28  ;;  %p4581_p5 = scmp.lt.u32.totalorder %s4574_s28, %s5511_s3 }
  0x44   : > { %p4577_p10 = pnand %p4575_p6, %p4868_p13 }
  0x46   : > { %p4578_p3 = pneg %p4577_p10 }
  0x48   : > { %p4583_p7 = pnand %p4581_p5, %p4578_p3 }
  0x4a   : > { %4586 = shalt.err (!%p4583_p7)
}
  0x4b   : > { %s4587_s19 = scalar_lea.vmem %s281_s24, 2048  ;;  %p4595_p1 = scmp.lt.s32.totalorder %s281_s24, %s281_s24 }
  0x4c   : > { %p4588_p9 = scmp.ne.s32.totalorder %s281_s24, %s4587_s19  ;;  %p4596_p2 = scmp.lt.s32.totalorder %s4587_s19, %s4587_s19 }
  0x4e   : > { %p4590_p12 = pnand %p4588_p9, %p4868_p13  ;;  %p4597_p4 = por %p4596_p2, %p4595_p1 }
  0x50   : > { %p4591_p0 = pneg %p4590_p12 }
  0x52   : > { %p4598_p8 = pnand %p4597_p4, %p4591_p0 }
  0x54   : > { %4601 = shalt.err (!%p4598_p8)
}
  0x55   : > { %4354 = dma.hbm_to_vmem [thread:$0]  (!%p4852_p11), %s5511_s3, 2048, %s281_s24, [#allocation6], %s4739_s25, %s4739_s25, %s4740_s26  }
  0x56   : > { %s4741_s30 = smov [#allocation10]   ;;  %s4602_s29 = scalar_lea.hbm %s5515_s7, 2048 }
  0x57   : > { %s312_s16 = sshll.u32 %s4741_s30, 4  ;;  %p4603_p4 = scmp.ne.s32.totalorder %s5515_s7, %s4602_s29  ;;  %s313_s16 = int_to_ptr.vmem [resolvable:$true] %s312_s16 }
  0x58   : > { %p4609_p10 = scmp.lt.u32.totalorder %s4602_s29, %s5515_s7 }
  0x59   : > { %p4605_p8 = pnand %p4603_p4, %p4868_p13 }
  0x5b   : > { %p4606_p6 = pneg %p4605_p8 }
  0x5d   : > { %p4611_p3 = pnand %p4609_p10, %p4606_p6 }
  0x5f   : > { %4614 = shalt.err (!%p4611_p3)
}
  0x60   : > { %s4615_s24 = scalar_lea.vmem %s313_s16, 2048  ;;  %p4623_p12 = scmp.lt.s32.totalorder %s313_s16, %s313_s16 }
  0x61   : > { %p4616_p5 = scmp.ne.s32.totalorder %s313_s16, %s4615_s24  ;;  %p4624_p0 = scmp.lt.s32.totalorder %s4615_s24, %s4615_s24 }
  0x63   : > { %p4618_p7 = pnand %p4616_p5, %p4868_p13  ;;  %p4625_p1 = por %p4624_p0, %p4623_p12 }
  0x65   : > { %p4619_p9 = pneg %p4618_p7 }
  0x67   : > { %p4626_p2 = pnand %p4625_p1, %p4619_p9 }
  0x69   : > { %4629 = shalt.err (!%p4626_p2)
}
  0x6a   : > { %4360 = dma.hbm_to_vmem [thread:$0]  (!%p4852_p11), %s5515_s7, 2048, %s313_s16, [#allocation9], %s4739_s25, %s4739_s25, %s4740_s26  }
  0x6b   : > { %s4962_s14 = sadd.s32 1, %s4734_s12   ;;  %s34_s20 = sadd.s32 1, %s4730_s11 }
  0x6c   : > { %s31_s30 = ssub.s32 %s4734_s12, %s4962_s14  ;;  %p41_p13 = scmp.ne.s32.totalorder %s4730_s11, %s4726_s10 }
  0x6d   : > { %p32_p4 = scmp.eq.s32.totalorder %s31_s30, 0  ;;  %p42_p8 = scmp.eq.s32.totalorder %s4734_s12, 0 }
  0x6e   : > { %p5532_p6 = scmp.eq.s32.totalorder %s4822_s13, 1  ;;  %p4373_p3 = scmp.lt.s32.totalorder %s4734_s12, 2 }
  0x6f   : > { %s4978_s28 = scalar_select %p32_p4, %s4730_s11, %s34_s20  }
  0x70   : > { %p4972_p10 = por %p5532_p6, %p41_p13  ;;  %p43_p5 = por %p42_p8, %p41_p13 }
  0x71   : > { %s329_s29 = sand.u32 1, %s4730_s11   ;;  %s3742_s16 = sshll.u32 %s4734_s12, 9 }
  0x72   : > { %s3675_s18 = sshll.u32 %s329_s29, 5  ;;  %s4985_s19 = scalar_lea.hbm %s5508_s0, %s3742_s16 }
  0x73   : > { %s333_s24 = scalar_lea.vmem [#allocation2], %s3675_s18  ;;  %p4989_p11 = pnand %p4373_p3, %p43_p5 }
  0x74   : > { %s340_s22 = sshll.u32 %s333_s24, 4  ;;  %s4993_s20 = scalar_lea.sflag [#allocation3], %s329_s29  ;;  %s4987_s22 = int_to_ptr.vmem [resolvable:$true] %s340_s22 }
  0x75   : > { %s4630_s30 = scalar_lea.hbm %s4985_s19, 512  ;;  %p4632_p9 = pneg %p4989_p11 }
  0x76   : > { %p4631_p7 = scmp.ne.s32.totalorder %s4985_s19, %s4630_s30  ;;  %s4635_s21 = scalar_lea.hbm %s5508_s0, 1024 }
  0x77   : > { %p4636_p1 = scmp.lt.u32.totalorder %s4985_s19, %s5508_s0  ;;  %p4637_p2 = scmp.lt.u32.totalorder %s4635_s21, %s4630_s30 }
  0x78   : > { %p4633_p12 = pnand %p4632_p9, %p4631_p7  ;;  %p4639_p4 = scmp.lt.u32.totalorder %s4630_s30, %s4985_s19 }
  0x79   : > { %p4638_p13 = por %p4637_p2, %p4636_p1 }
  0x7a   : > { %p4634_p0 = pneg %p4633_p12 }
  0x7b   : > { %p4640_p8 = por %p4639_p4, %p4638_p13 }
  0x7d   : > { %p4641_p6 = pnand %p4640_p8, %p4634_p0 }
  0x7f   : > { %4644 = shalt.err (!%p4641_p6)
}
  0x80   : > { %s4645_s29 = scalar_lea.vmem %s4987_s22, 512  ;;  %s4742_s18 = smov [#allocation2]  }
  0x81   : > { %p4646_p3 = scmp.ne.s32.totalorder %s4987_s22, %s4645_s29  ;;  %s4650_s16 = sshll.u32 %s4742_s18, 4  ;;  %s4651_s16 = int_to_ptr.vmem [resolvable:$false] %s4650_s16 }
  0x82   : > { %s4652_s23 = scalar_lea.vmem %s4651_s16, 1024  ;;  %p4653_p12 = scmp.lt.s32.totalorder %s4987_s22, %s4651_s16 }
  0x83   : > { %p4648_p5 = pnand %p4646_p3, %p4632_p9  ;;  %p4654_p1 = scmp.lt.s32.totalorder %s4652_s23, %s4645_s29 }
  0x85   : > { %p4649_p7 = pneg %p4648_p5  ;;  %p4655_p2 = por %p4654_p1, %p4653_p12 }
  0x87   : > { %p4656_p13 = pnand %p4655_p2, %p4649_p7 }
  0x89   : > { %4659 = shalt.err (!%p4656_p13)
}
  0x8a   : > { %4364 = dma.hbm_to_vmem [thread:$0]  (!%p4989_p11), %s4985_s19, 512, %s4987_s22, %s4993_s20, %s4739_s25, %s4739_s25, %s4740_s26  }
  0x8b   : > { %p5535_p9 = scmp.ne.s32.totalorder %s5529_s17, 0 }
  0x8c   : > { %s5027_s30 = sand.u32 (!%p5535_p9), 1, %s4726_s10   ;;  %p5536_p0 = scmp.ne.s32.totalorder (!%p5535_p9), %s5526_s15, 0 }
  0x8d   : > { %352 = sbr.rel (%p5535_p9) target bundleno = 2579 (0xa13), region = 56  ;;  %s3679_s21 = sshll.u32 (!%p5535_p9), %s5027_s30, 5 }
  0x8e   : > { %s355_s24 = scalar_lea.sflag (!%p5535_p9), [#allocation3], %s5027_s30  ;;  %s5033_s9 = scalar_lea.vmem (!%p5535_p9), [#allocation2], %s3679_s21 }
  0x94   : > { %4705 = dma.done.wait (%p5536_p0), %s355_s24, 512  }
  0x95   : > { %4707 = vsyncadd (%p5536_p0), %s355_s24, 4294966784  ;;  %p5537_p11 = scmp.eq.s32.totalorder %s4822_s13, 0 }
  0x97   : > { %4709 = dma.done.wait (%p5537_p11), [#allocation6], 4096   ;;  %p5538_p4 = pmov %p5537_p11 }
  0x99   : > { %4711 = vsyncadd (%p5538_p4), [#allocation6], 4294963200  ;;  %p5539_p8 = pmov %p5538_p4 }
  0x9a   : > { %p5540_p6 = pmov %p5538_p4 }
  0x9b   : > { %4713 = dma.done.wait (%p5539_p8), [#allocation9], 4096  }
  0x9c   : > { %4715 = vsyncadd (%p5540_p6), [#allocation9], 4294963200  ;;  %v415_v0 = vld [vmem:[#allocation5] sm:$0xff]  ;;  %v416_v1 = vld [vmem:[#allocation5 + $0x8] sm:$0xff]  ;;  %vm4744_vm0 = vmmov 0   ;;  %vm743_vm1 = vcmask 261120  }
  0x9d   : > { %v417_v2 = vld [vmem:[#allocation5 + $0x10] sm:$0xff]  ;;  %v4200_v3 = vpack.c.bf16 %v416_v1, %v415_v0  ;;  %v418_v4 = vld [vmem:[#allocation5 + $0x18] sm:$0xff]  ;;  %v419_v6 = vld [vmem:[#allocation5 + $0x20] sm:$0xff]  ;;  %vm1048_vm2 = vcmask 64512   ;;  %s4745_s20 = smov 96   ;;  %s4746_s29 = smov 64  }
  0x9e   : > { %v4204_v5 = vpack.c.bf16 %v418_v4, %v417_v2  ;;  %v420_v7 = vld [vmem:[#allocation5 + $0x28] sm:$0xff]  ;;  %v411_v9 = vld [vmem:[%s5033_s9] sm:$0xff]  ;;  %v421_v10 = vld [vmem:[#allocation5 + $0x30] sm:$0xff]  ;;  %s4747_s18 = smov 32   ;;  %vm3421_vm3 = vcmask 523264   ;;  %vm3426_vm4 = vcmask 785408  }
  0x9f   : > { %4201 = vmatprep.subr.bf16.mxu1 %v4200_v3  ;;  %v4208_v8 = vpack.c.bf16 %v420_v7, %v419_v6  ;;  %v422_v11 = vld [vmem:[#allocation5 + $0x38] sm:$0xff]  ;;  %3920 = vmatprep.mubr.f32.mxu1 %v411_v9  ;;  %v423_v13 = vld [vmem:[#allocation5 + $0x40] sm:$0xff]  ;;  %v424_v14 = vld [vmem:[#allocation5 + $0x48] sm:$0xff]  ;;  %s408_s24 = scalar_lea.vmem [#allocation11], %s3679_s21  ;;  %s3743_s15 = sshll.u32 %s4822_s13, 9 }
  0xa0   : > { %4203 = vmatpush3.bf16.msra.mxu1 %v4200_v3  ;;  %3996 = vmatprep.mubr.f32.mxu0 %v411_v9  ;;  %v4212_v12 = vpack.c.bf16 %v422_v11, %v421_v10  ;;  %v635_v15 = vld [vmem:[#allocation8] sm:$0xff]  ;;  %v636_v16 = vld [vmem:[#allocation8 + $0x8] sm:$0xff]  ;;  %v4216_v17 = vpack.c.bf16 %v424_v14, %v423_v13  ;;  %v425_v19 = vld [vmem:[#allocation5 + $0x50] sm:$0xff]  ;;  %s5541_s26 = sld [smem:[#allocation18_spill]]  ;;  %s3544_s21 = scalar_lea.sflag [#allocation4], %s5027_s30 }
  0xa1   : > { %4205 = vmatprep.subr.bf16.mxu1 %v4204_v5  ;;  %v4264_v18 = vpack.c.bf16 %v636_v16, %v635_v15  ;;  %v426_v20 = vld [vmem:[#allocation5 + $0x58] sm:$0xff]  ;;  %v427_v22 = vld [vmem:[#allocation5 + $0x60] sm:$0xff]  ;;  %v428_v23 = vld [vmem:[#allocation5 + $0x68] sm:$0xff]  ;;  %s4748_s22 = smov [#allocation11]  }
  0xa2   : > { %v4220_v21 = vpack.c.bf16 %v426_v20, %v425_v19  ;;  %v4224_v24 = vpack.c.bf16 %v428_v23, %v427_v22  ;;  %v429_v25 = vld [vmem:[#allocation5 + $0x70] sm:$0xff]  ;;  %v430_v26 = vld [vmem:[#allocation5 + $0x78] sm:$0xff]  ;;  %v527_v28 = vld [vmem:[#allocation7] sm:$0xff] }
  0xa3   : > { %4265 = vmatprep.subr.bf16.mxu0 %v4264_v18  ;;  %v4228_v27 = vpack.c.bf16 %v430_v26, %v429_v25  ;;  %v528_v29 = vld [vmem:[#allocation7 + $0x8] sm:$0xff]  ;;  %v529_v31 = vld [vmem:[#allocation7 + $0x10] sm:$0xff]  ;;  %v530_v32 = vld [vmem:[#allocation7 + $0x18] sm:$0xff] }
  0xa4   : > { %4207 = vmatpush3.bf16.msra.mxu1 %v4204_v5  ;;  %4267 = vmatpush3.bf16.msra.mxu0 %v4264_v18  ;;  %v4232_v30 = vpack.c.bf16 %v528_v29, %v527_v28  ;;  %v5049_v33 = vld [vmem:[%s5033_s9 + $0x8] sm:$0xff]  ;;  %v4236_v34 = vpack.c.bf16 %v530_v32, %v529_v31  ;;  %v5052_v35 = vld [vmem:[%s5033_s9 + $0x10] sm:$0xff]  ;;  %v531_v36 = vld [vmem:[#allocation7 + $0x20] sm:$0xff] }
  0xa5   : > { %4209 = vmatprep.subr.bf16.mxu1 %v4208_v8  ;;  %v532_v37 = vld [vmem:[#allocation7 + $0x28] sm:$0xff]  ;;  %v5057_v38 = vld [vmem:[%s5033_s9 + $0x18] sm:$0xff]  ;;  %v533_v40 = vld [vmem:[#allocation7 + $0x30] sm:$0xff]  ;;  %s3557_s9 = sshll.u32 %s408_s24, 4  ;;  %s5459_s9 = int_to_ptr.vmem [resolvable:$true] %s3557_s9 }
  0xa6   : > { %v4240_v39 = vpack.c.bf16 %v532_v37, %v531_v36  ;;  %v534_v41 = vld [vmem:[#allocation7 + $0x38] sm:$0xff]  ;;  %v535_v43 = vld [vmem:[#allocation7 + $0x40] sm:$0xff]  ;;  %v536_v44 = vld [vmem:[#allocation7 + $0x48] sm:$0xff]  ;;  %s5464_s19 = scalar_lea.hbm %s5541_s26, %s3743_s15  ;;  %s4660_s13 = scalar_lea.vmem %s5459_s9, 512 }
  0xa7   : > { %v4244_v42 = vpack.c.bf16 %v534_v41, %v533_v40  ;;  %v4248_v45 = vpack.c.bf16 %v536_v44, %v535_v43  ;;  %v537_v46 = vld [vmem:[#allocation7 + $0x50] sm:$0xff]  ;;  %v538_v47 = vld [vmem:[#allocation7 + $0x58] sm:$0xff]  ;;  %v539_v49 = vld [vmem:[#allocation7 + $0x60] sm:$0xff]  ;;  %p4661_p3 = scmp.ne.s32.totalorder %s5459_s9, %s4660_s13 }
  0xa8   : > { %4211 = vmatpush3.bf16.msra.mxu1 %v4208_v8  ;;  %v4252_v48 = vpack.c.bf16 %v538_v47, %v537_v46  ;;  %v540_v50 = vld [vmem:[#allocation7 + $0x68] sm:$0xff]  ;;  %v541_v52 = vld [vmem:[#allocation7 + $0x70] sm:$0xff]  ;;  %v542_v53 = vld [vmem:[#allocation7 + $0x78] sm:$0xff] }
  0xa9   : > { %4213 = vmatprep.subr.bf16.mxu1 %v4212_v12  ;;  %v4256_v51 = vpack.c.bf16 %v540_v50, %v539_v49  ;;  %v4260_v54 = vpack.c.bf16 %v542_v53, %v541_v52  ;;  %v637_v55 = vld [vmem:[#allocation8 + $0x10] sm:$0xff]  ;;  %v638_v56 = vld [vmem:[#allocation8 + $0x18] sm:$0xff]  ;;  %v639_v58 = vld [vmem:[#allocation8 + $0x20] sm:$0xff]  ;;  %p4662_p5 = pnand %p4661_p3, %p4972_p10 }
  0xaa   : > { %v4268_v57 = vpack.c.bf16 %v638_v56, %v637_v55  ;;  %v640_v59 = vld [vmem:[#allocation8 + $0x28] sm:$0xff]  ;;  %v641_v61 = vld [vmem:[#allocation8 + $0x30] sm:$0xff]  ;;  %v642_v62 = vld [vmem:[#allocation8 + $0x38] sm:$0xff] }
  0xab   : > { %v4272_v60 = vpack.c.bf16 %v640_v59, %v639_v58  ;;  %v4276_v63 = vpack.c.bf16 %v642_v62, %v641_v61  ;;  %v643_v0 = vld [vmem:[#allocation8 + $0x40] sm:$0xff]  ;;  %v644_v1 = vld [vmem:[#allocation8 + $0x48] sm:$0xff]  ;;  %v645_v3 = vld [vmem:[#allocation8 + $0x50] sm:$0xff]  ;;  %p4663_p7 = pneg %p4662_p5 }
  0xac   : > { %4215 = vmatpush3.bf16.msra.mxu1 %v4212_v12  ;;  %4269 = vmatprep.subr.bf16.mxu0 %v4268_v57  ;;  %v4280_v2 = vpack.c.bf16 %v644_v1, %v643_v0  ;;  %v646_v4 = vld [vmem:[#allocation8 + $0x58] sm:$0xff]  ;;  %v647_v6 = vld [vmem:[#allocation8 + $0x60] sm:$0xff]  ;;  %v648_v7 = vld [vmem:[#allocation8 + $0x68] sm:$0xff]  ;;  %v4743_v12 = vmov 0.0  }
  0xad   : > { %4217 = vmatprep.subr.bf16.mxu1 %v4216_v17  ;;  %4271 = vmatpush3.bf16.msra.mxu0 %v4268_v57  ;;  %v4284_v5 = vpack.c.bf16 %v646_v4, %v645_v3  ;;  %v4288_v8 = vpack.c.bf16 %v648_v7, %v647_v6  ;;  %v650_v10 = vld [vmem:[#allocation8 + $0x78] sm:$0xff]  ;;  %v3686_v18 = vld [vmem:[%s5512_s4] ss:$0 sm:$0xff] }
  0xae   : > { %4273 = vmatprep.subr.bf16.mxu0 %v4272_v60 }
  0xb0   : > { %4219 = vmatpush3.bf16.msra.mxu1 %v4216_v17  ;;  %v3685_v17 = vld [vmem:[%s5510_s2] ss:$0 sm:$0xff] }
  0xb1   : > { %4221 = vmatprep.subr.bf16.mxu1 %v4220_v21  ;;  %4275 = vmatpush3.bf16.msra.mxu0 %v4272_v60 }
  0xb2   : > { %4277 = vmatprep.subr.bf16.mxu0 %v4276_v63 }
  0xb4   : > { %4223 = vmatpush3.bf16.msra.mxu1 %v4220_v21 }
  0xb5   : > { %4225 = vmatprep.subr.bf16.mxu1 %v4224_v24  ;;  %4279 = vmatpush3.bf16.msra.mxu0 %v4276_v63 }
  0xb6   : > { %4281 = vmatprep.subr.bf16.mxu0 %v4280_v2 }
  0xb8   : > { %4227 = vmatpush3.bf16.msra.mxu1 %v4224_v24 }
  0xb9   : > { %4229 = vmatprep.subr.bf16.mxu1 %v4228_v27  ;;  %4283 = vmatpush3.bf16.msra.mxu0 %v4280_v2 }
  0xba   : > { %4285 = vmatprep.subr.bf16.mxu0 %v4284_v5 }
  0xbc   : > { %4231 = vmatpush3.bf16.msra.mxu1 %v4228_v27 }
  0xbd   : > { %4233 = vmatprep.subr.bf16.mxu1 %v4232_v30  ;;  %4287 = vmatpush3.bf16.msra.mxu0 %v4284_v5 }
  0xbe   : > { %4289 = vmatprep.subr.bf16.mxu0 %v4288_v8 }
  0xbf   : > { %3921 = vmatmul.mubr.f32.vlgmr.msra.gmra.mrb[0].mxu1 %v5049_v33 }
  0xc0   : > { %4235 = vmatpush3.bf16.msra.mxu1 %v4232_v30  ;;  %3923 = vmatprep.mubr.f32.mxu1 %v5052_v35 }
  0xc1   : > { %4237 = vmatprep.subr.bf16.mxu1 %v4236_v34  ;;  %4291 = vmatpush3.bf16.msra.mxu0 %v4288_v8 }
  0xc3   : > { %3924 = vmatmul.mubr.f32.gmra.mrb[2].mxu1 %v5057_v38 }
  0xc4   : > { %4239 = vmatpush3.bf16.msra.mxu1 %v4236_v34  ;;  %3958 = vmatprep.mubr.f32.mxu1 %v411_v9  ;;  %v649_v9 = vld [vmem:[#allocation8 + $0x70] sm:$0xff] }
  0xc5   : > { %4241 = vmatprep.subr.bf16.mxu1 %v4240_v39  ;;  %v4292_v11 = vpack.c.bf16 %v650_v10, %v649_v9 }
  0xc7   : > { %4293 = vmatprep.subr.bf16.mxu0 %v4292_v11 }
  0xc8   : > { %4243 = vmatpush3.bf16.msra.mxu1 %v4240_v39  ;;  %4295 = vmatpush3.bf16.msra.mxu0 %v4292_v11 }
  0xc9   : > { %4245 = vmatprep.subr.bf16.mxu1 %v4244_v42  ;;  %4002 = vmatprep.subr.mxu0 %v4743_v12 }
  0xcb   : > { %3997 = vmatmul.mubr.f32.vlgmr.msra.gmra.mrb[0].mxu0 %v5049_v33 }
  0xcc   : > { %4247 = vmatpush3.bf16.msra.mxu1 %v4244_v42  ;;  %3999 = vmatprep.mubr.f32.mxu0 %v5052_v35 }
  0xcd   : > { %4249 = vmatprep.subr.bf16.mxu1 %v4248_v45 }
  0xcf   : > { %4000 = vmatmul.mubr.f32.gmra.mrb[2].mxu0 %v5057_v38 }
  0xd0   : > { %4251 = vmatpush3.bf16.msra.mxu1 %v4248_v45  ;;  %4004 = vmatprep.mubr.msk.f32.mxu0 %vm4744_vm0, %v4743_v12 }
  0xd1   : > { %4253 = vmatprep.subr.bf16.mxu1 %v4252_v48 }
  0xd4   : > { %4255 = vmatpush3.bf16.msra.mxu1 %v4252_v48 }
  0xd5   : > { %4257 = vmatprep.subr.bf16.mxu1 %v4256_v51 }
  0xd8   : > { %4259 = vmatpush3.bf16.msra.mxu1 %v4256_v51 }
  0xd9   : > { %4261 = vmatprep.subr.bf16.mxu1 %v4260_v54 }
  0xdc   : > { %4263 = vmatpush3.bf16.msra.mxu1 %v4260_v54 }
  0xdd   : > { %4017 = vmatprep.subr.mxu1 %v4743_v12 }
  0xdf   : > { %3959 = vmatmul.mubr.f32.vlgmr.msra.gmra.mrb[4].mxu1 %v5049_v33 }
  0xe0   : > { %3961 = vmatprep.mubr.f32.mxu1 %v5052_v35  ;;  %v3687_v35 = vld [vmem:[%s5514_s6] ss:$0 sm:$0xff] }
  0xe3   : > { %3962 = vmatmul.mubr.f32.gmra.mrb[6].mxu1 %v5057_v38 }
  0xe4   : > { %4019 = vmatprep.mubr.msk.f32.mxu1 %vm4744_vm0, %v4743_v12 }
 0x192   : > { %v3922_v13 = vpop.f32.mrb[0].mxu1 }
 0x193   : > { %v504_v14 = vpop.f32.mrb[1].mxu1  ;;  %v510_v25 = vadd.f32 %v3922_v13, %v3685_v17 }
 0x194   : > { %v505_v20 = vadd.f32 %v3685_v17, %v504_v14 }
 0x195   : > { %v5099_v31 = vmul.f32 0.17677669, %v510_v25 }
 0x196   : > { %v3925_v15 = vpop.f32.mrb[2].mxu1  ;;  %v5082_v26 = vmul.f32 0.17677669, %v505_v20 }
 0x197   : > { %v514_v16 = vpop.f32.mrb[3].mxu1  ;;  %v520_v23 = vadd.f32 %v3925_v15, %v3685_v17 }
 0x198   : > { %v515_v32 = vadd.f32 %v3685_v17, %v514_v16 }
 0x199   : > { %v5093_v30 = vmul.f32 0.17677669, %v520_v23 }
 0x19a   : > { %v5115_v34 = vmul.f32 0.17677669, %v515_v32 }
 0x19e   : > { %v3998_v36 = vpop.f32.mrb[0].mxu0 }
 0x19f   : > { %v5125_v37 = vadd.f32 %v3998_v36, %v3687_v35  ;;  %v724_v38 = vpop.f32.mrb[1].mxu0 }
 0x1a0   : > { %v5127_v39 = vadd.f32 %v3687_v35, %v724_v38 }
 0x1a2   : > { %v4001_v40 = vpop.f32.mrb[2].mxu0 }
 0x1a3   : > { %v5130_v41 = vadd.f32 %v4001_v40, %v3687_v35  ;;  %v734_v42 = vpop.f32.mrb[3].mxu0 }
 0x1a4   : > { %v5133_v43 = vadd.f32 %v3687_v35, %v734_v42 }
 0x1b2   : > { %v3960_v19 = vpop.f32.mrb[4].mxu1 }
 0x1b3   : > { %v616_v21 = vpop.f32.mrb[5].mxu1  ;;  %v5087_v29 = vadd.f32 %v3960_v19, %v3686_v18 }
 0x1b4   : > { %v5078_v22 = vadd.f32 %v3686_v18, %v616_v21 }
 0x1b6   : > { %v3963_v24 = vpop.f32.mrb[6].mxu1  ;;  %4003 = vmatpush3.xpose.msk.msra.mxu0 %vm743_vm1, %v5078_v22 }
 0x1b7   : > { %v5084_v27 = vadd.f32 %v3963_v24, %v3686_v18  ;;  %v626_v28 = vpop.f32.mrb[7].mxu1  ;;  %4007 = vmatprep.subr.mxu0 %v4743_v12 }
 0x1b8   : > { %v5103_v33 = vadd.f32 %v3686_v18, %v626_v28 }
 0x1b9   : > { %4005 = vmatmul.mubr.msk.f32.vlgmr.msra.gmra.mrb[4].mxu0 %vm743_vm1, %v5082_v26  ;;  %4018 = vmatpush3.xpose.msk.msra.mxu1 %vm743_vm1, %v5084_v27 }
 0x1ba   : > { %4008 = vmatpush3.xpose.msk.msra.mxu0 %vm743_vm1, %v5087_v29  ;;  %4009 = vmatprep.mubr.msk.f32.mxu0 %vm4744_vm0, %v4743_v12 }
 0x1bb   : > { %4012 = vmatprep.subr.mxu0 %v4743_v12  ;;  %4022 = vmatprep.subr.mxu1 %v4743_v12 }
 0x1bc   : > { %4020 = vmatmul.mubr.msk.f32.vlgmr.msra.gmra.mrb[8].mxu1 %vm743_vm1, %v5093_v30 }
 0x1bd   : > { %4010 = vmatmul.mubr.msk.f32.vlgmr.msra.gmra.mrb[6].mxu0 %vm743_vm1, %v5099_v31  ;;  %4024 = vmatprep.mubr.msk.f32.mxu1 %vm4744_vm0, %v4743_v12 }
 0x1be   : > { %4013 = vmatpush3.xpose.msk.msra.mxu0 %vm743_vm1, %v5103_v33  ;;  %4014 = vmatprep.mubr.msk.f32.mxu0 %vm4744_vm0, %v4743_v12 }
 0x1bf   : > { %4042 = vmatprep.subr.mxu0 %v4743_v12  ;;  %4023 = vmatpush3.msra.mxu1 %v5127_v39 }
 0x1c0   : > { %4027 = vmatprep.subr.mxu1 %v4743_v12 }
 0x1c1   : > { %4015 = vmatmul.mubr.msk.f32.vlgmr.msra.gmra.mrb[8].mxu0 %vm743_vm1, %v5115_v34 }
 0x1c2   : > { %4044 = vmatprep.mubr.msk.f32.mxu0 %vm4744_vm0, %v4743_v12 }
 0x28c   : > { %v816_v44 = vpop.f32.mrb[4].mxu0 }
 0x28d   : > { %v4006_v45 = vpop.f32.mrb[5].mxu0  ;;  %v1049_v46 = vsel %vm1048_vm2, %v816_v44, -inf }
 0x28e   : > { %1050 = vmax.xlane.f32.xlu0 %v1049_v46 }
 0x28f   : > { %v1044_v47 = vpop.f32.mrb[8].mxu1 }
 0x290   : > { %v892_v48 = vpop.f32.mrb[6].mxu0  ;;  %v4021_v49 = vpop.f32.mrb[9].mxu1  ;;  %v1058_v50 = vsel %vm1048_vm2, %v1044_v47, -inf }
 0x291   : > { %1059 = vmax.xlane.f32.xlu1 %v1058_v50  ;;  %v4011_v51 = vpop.f32.mrb[7].mxu0  ;;  %v1052_v52 = vsel %vm1048_vm2, %v892_v48, -inf }
 0x292   : > { %1053 = vmax.xlane.f32.xlu0 %v1052_v52 }
 0x294   : > { %v968_v53 = vpop.f32.mrb[8].mxu0 }
 0x295   : > { %v4016_v54 = vpop.f32.mrb[9].mxu0  ;;  %v1055_v55 = vsel %vm1048_vm2, %v968_v53, -inf }
 0x2a2   : > { %1465 = vrot.lane.b32.xlu1 %v5087_v29, %s4745_s20 }
 0x2a8   : > { %1387 = vrot.lane.b32.xlu0 %v5078_v22, %s4745_s20 }
 0x2ac   : > { %1543 = vrot.lane.b32.xlu0 %v5103_v33, %s4745_s20 }
 0x2b0   : > { %1541 = vrot.lane.b32.xlu0 %v5115_v34, %s4745_s20 }
 0x2b4   : > { %1734 = vrot.lane.b32.xlu0 %v5127_v39, %s4745_s20 }
 0x2b8   : > { %2051 = vrot.lane.b32.xlu0 %v5078_v22, %s4746_s29 }
 0x2c6   : > { %1056 = vmax.xlane.f32.xlu1 %v1055_v55 }
 0x2d7   : > { %1385 = vrot.lane.b32.xlu1 %v5082_v26, %s4745_s20 }
 0x2db   : > { %1463 = vrot.lane.b32.xlu1 %v5099_v31, %s4745_s20 }
 0x2df   : > { %1621 = vrot.lane.b32.xlu1 %v5084_v27, %s4745_s20 }
 0x2e3   : > { %1619 = vrot.lane.b32.xlu1 %v5093_v30, %s4745_s20 }
 0x2e7   : > { %1811 = vrot.lane.b32.xlu1 %v5125_v37, %s4745_s20 }
 0x2eb   : > { %1888 = vrot.lane.b32.xlu1 %v5133_v43, %s4745_s20 }
 0x2ef   : > { %1965 = vrot.lane.b32.xlu1 %v5130_v41, %s4745_s20 }
 0x31b   : > { %v1051_v56 = vpop.xlane.xlu0 %1050 }
 0x31c   : > { %v1061_v57 = vsub.f32 %v816_v44, %v1051_v56 }
 0x31e   : > { %v1065_v58 = vmul.f32 1.442695, %v1061_v57  ;;  %v1060_v1 = vpop.xlane.xlu1 %1059 }
 0x31f   : > { %v1054_v59 = vpop.xlane.xlu0 %1053  ;;  %v1064_v5 = vsub.f32 %v1044_v47, %v1060_v1 }
 0x320   : > { %4454 = vpow2.f32 %v1065_v58  ;;  %v1062_v60 = vsub.f32 %v892_v48, %v1054_v59 }
 0x321   : > { %v1071_v10 = vmul.f32 1.442695, %v1064_v5 }
 0x322   : > { %v1067_v61 = vmul.f32 1.442695, %v1062_v60  ;;  %v1466_v2 = vpop.permute.xlu1 %1465 }
 0x323   : > { %v1388_v62 = vpop.permute.xlu0 %1387 }
 0x324   : > { %4456 = vpow2.f32 %v1067_v61  ;;  %4043 = vmatpush3.xpose.msk.msra.mxu0 %vm743_vm1, %v1388_v62 }
 0x325   : > { %4052 = vmatprep.subr.mxu0 %v4743_v12 }
 0x327   : > { %v1544_v3 = vpop.permute.xlu0 %1543 }
 0x32a   : > { %v5167_v63 = vpop.eup %4454 }
 0x32b   : > { %4025 = vmatmul.mubr.msk.f32.vlgmr.msra.gmra.mrb[10].mxu1 %vm1048_vm2, %v5167_v63  ;;  %v1542_v7 = vpop.permute.xlu0 %1541 }
 0x32c   : > { %4028 = vmatpush3.msra.mxu1 %v5125_v37  ;;  %4029 = vmatprep.mubr.msk.f32.mxu1 %vm4744_vm0, %v4743_v12 }
 0x32d   : > { %4032 = vmatprep.subr.mxu1 %v4743_v12 }
 0x32e   : > { %v5175_v0 = vpop.eup %4456 }
 0x32f   : > { %4030 = vmatmul.mubr.msk.f32.vlgmr.msra.gmra.mrb[12].mxu1 %vm1048_vm2, %v5175_v0  ;;  %v1735_v11 = vpop.permute.xlu0 %1734 }
 0x330   : > { %4033 = vmatpush3.msra.mxu1 %v5133_v43  ;;  %4034 = vmatprep.mubr.msk.f32.mxu1 %vm4744_vm0, %v4743_v12 }
 0x331   : > { %4037 = vmatprep.subr.mxu1 %v4743_v12 }
 0x333   : > { %v2052_v51 = vpop.permute.xlu0 %2051 }
 0x353   : > { %v1057_v4 = vpop.xlane.xlu1 %1056 }
 0x354   : > { %v1063_v6 = vsub.f32 %v968_v53, %v1057_v4 }
 0x356   : > { %v1069_v8 = vmul.f32 1.442695, %v1063_v6 }
 0x357   : > { %v1386_v9 = vpop.permute.xlu1 %1385 }
 0x358   : > { %4458 = vpow2.f32 %v1069_v8  ;;  %4045 = vmatmul.mubr.msk.f32.vlgmr.msra.gmra.mrb[10].mxu0 %vm743_vm1, %v1386_v9 }
 0x359   : > { %4053 = vmatpush3.xpose.msk.msra.mxu0 %vm743_vm1, %v1544_v3  ;;  %4054 = vmatprep.mubr.msk.f32.mxu0 %vm4744_vm0, %v4743_v12  ;;  %4460 = vpow2.f32 %v1071_v10 }
 0x35a   : > { %4062 = vmatprep.subr.mxu0 %v4743_v12 }
 0x35b   : > { %v1464_v13 = vpop.permute.xlu1 %1463 }
 0x35c   : > { %4055 = vmatmul.mubr.msk.f32.vlgmr.msra.gmra.mrb[12].mxu0 %vm743_vm1, %v1542_v7 }
 0x35d   : > { %4063 = vmatpush3.msra.mxu0 %v1735_v11  ;;  %4064 = vmatprep.mubr.msk.f32.mxu0 %vm4744_vm0, %v4743_v12 }
 0x35e   : > { %4072 = vmatprep.subr.mxu0 %v4743_v12 }
 0x35f   : > { %v1622_v16 = vpop.permute.xlu1 %1621 }
 0x362   : > { %v5192_v14 = vpop.eup %4458 }
 0x363   : > { %4035 = vmatmul.mubr.msk.f32.vlgmr.msra.gmra.mrb[14].mxu1 %vm1048_vm2, %v5192_v14  ;;  %v5200_v15 = vpop.eup %4460  ;;  %v1620_v17 = vpop.permute.xlu1 %1619 }
 0x364   : > { %4038 = vmatpush3.msra.mxu1 %v5130_v41  ;;  %4039 = vmatprep.mubr.msk.f32.mxu1 %vm4744_vm0, %v4743_v12 }
 0x365   : > { %4047 = vmatprep.subr.mxu1 %v4743_v12 }
 0x367   : > { %4040 = vmatmul.mubr.msk.f32.vlgmr.msra.gmra.mrb[16].mxu1 %vm1048_vm2, %v5200_v15  ;;  %v1812_v18 = vpop.permute.xlu1 %1811 }
 0x368   : > { %4049 = vmatprep.mubr.msk.f32.mxu1 %vm4744_vm0, %v4743_v12 }
 0x36b   : > { %4048 = vmatpush3.xpose.msk.msra.mxu1 %vm743_vm1, %v1466_v2  ;;  %v1889_v58 = vpop.permute.xlu1 %1888 }
 0x36c   : > { %4057 = vmatprep.subr.mxu1 %v4743_v12 }
 0x36e   : > { %4050 = vmatmul.mubr.msk.f32.vlgmr.msra.gmra.mrb[18].mxu1 %vm743_vm1, %v1464_v13 }
 0x36f   : > { %4058 = vmatpush3.xpose.msk.msra.mxu1 %vm743_vm1, %v1622_v16  ;;  %4059 = vmatprep.mubr.msk.f32.mxu1 %vm4744_vm0, %v4743_v12 }
 0x370   : > { %4067 = vmatprep.subr.mxu1 %v4743_v12 }
 0x372   : > { %4060 = vmatmul.mubr.msk.f32.vlgmr.msra.gmra.mrb[20].mxu1 %vm743_vm1, %v1620_v17 }
 0x373   : > { %4068 = vmatpush3.msra.mxu1 %v1812_v18  ;;  %4069 = vmatprep.mubr.msk.f32.mxu1 %vm4744_vm0, %v4743_v12 }
 0x374   : > { %4077 = vmatprep.subr.mxu1 %v4743_v12 }
 0x3fe   : > { %v5217_v19 = vpop.f32.mrb[10].mxu1 }
 0x3ff   : > { %v4026_v20 = vpop.f32.mrb[11].mxu1 }
 0x402   : > { %v5219_v21 = vpop.f32.mrb[12].mxu1 }
 0x403   : > { %v4031_v23 = vpop.f32.mrb[13].mxu1 }
 0x42b   : > { %v1459_v24 = vpop.f32.mrb[10].mxu0 }
 0x42c   : > { %v4046_v25 = vpop.f32.mrb[11].mxu0  ;;  %v1697_v28 = vsel %vm1048_vm2, %v1459_v24, -inf }
 0x42d   : > { %1698 = vmax.xlane.f32.xlu0 %v1697_v28 }
 0x42f   : > { %v1615_v32 = vpop.f32.mrb[12].mxu0 }
 0x430   : > { %v4056_v35 = vpop.f32.mrb[13].mxu0  ;;  %v1703_v36 = vsel %vm1048_vm2, %v1615_v32, -inf }
 0x431   : > { %1704 = vmax.xlane.f32.xlu0 %v1703_v36 }
 0x436   : > { %v5223_v38 = vpop.f32.mrb[14].mxu1 }
 0x437   : > { %v4036_v40 = vpop.f32.mrb[15].mxu1 }
 0x43a   : > { %v5225_v42 = vpop.f32.mrb[16].mxu1 }
 0x43b   : > { %v4041_v44 = vpop.f32.mrb[17].mxu1 }
 0x441   : > { %v1537_v45 = vpop.f32.mrb[18].mxu1 }
 0x442   : > { %v4051_v46 = vpop.f32.mrb[19].mxu1  ;;  %v1700_v47 = vsel %vm1048_vm2, %v1537_v45, -inf }
 0x443   : > { %1701 = vmax.xlane.f32.xlu1 %v1700_v47 }
 0x445   : > { %v1693_v48 = vpop.f32.mrb[20].mxu1 }
 0x446   : > { %v4061_v49 = vpop.f32.mrb[21].mxu1  ;;  %v1706_v50 = vsel %vm1048_vm2, %v1693_v48, -inf }
 0x447   : > { %1707 = vmax.xlane.f32.xlu0 %v1706_v50 }
 0x454   : > { %2129 = vrot.lane.b32.xlu1 %v5087_v29, %s4746_s29 }
 0x458   : > { %2127 = vrot.lane.b32.xlu1 %v5099_v31, %s4746_s29 }
 0x45c   : > { %2285 = vrot.lane.b32.xlu1 %v5084_v27, %s4746_s29 }
 0x45d   : > { %2049 = vrot.lane.b32.xlu0 %v5082_v26, %s4746_s29 }
 0x460   : > { %2283 = vrot.lane.b32.xlu1 %v5093_v30, %s4746_s29 }
 0x461   : > { %2207 = vrot.lane.b32.xlu0 %v5103_v33, %s4746_s29 }
 0x464   : > { %2473 = vrot.lane.b32.xlu1 %v5125_v37, %s4746_s29 }
 0x465   : > { %2205 = vrot.lane.b32.xlu0 %v5115_v34, %s4746_s29 }
 0x468   : > { %2549 = vrot.lane.b32.xlu1 %v5133_v43, %s4746_s29 }
 0x469   : > { %2397 = vrot.lane.b32.xlu0 %v5127_v39, %s4746_s29 }
 0x46c   : > { %2625 = vrot.lane.b32.xlu1 %v5130_v41, %s4746_s29 }
 0x46d   : > { %2711 = vrot.lane.b32.xlu0 %v5078_v22, %s4747_s18  ;;  %v1966_v22 = vpop.permute.xlu1 %1965 }
 0x470   : > { %2789 = vrot.lane.b32.xlu1 %v5087_v29, %s4747_s18 }
 0x4ba   : > { %v1699_v52 = vpop.xlane.xlu0 %1698 }
 0x4bb   : > { %v1709_v53 = vsub.f32 %v1459_v24, %v1699_v52 }
 0x4bd   : > { %v1713_v54 = vmul.f32 1.442695, %v1709_v53 }
 0x4be   : > { %v1705_v55 = vpop.xlane.xlu0 %1704 }
 0x4bf   : > { %4462 = vpow2.f32 %v1713_v54  ;;  %v1711_v56 = vsub.f32 %v1615_v32, %v1705_v55 }
 0x4c1   : > { %v1717_v57 = vmul.f32 1.442695, %v1711_v56 }
 0x4c3   : > { %4464 = vpow2.f32 %v1717_v57 }
 0x4c9   : > { %v5255_v59 = vpop.eup %4462 }
 0x4ca   : > { %4065 = vmatmul.mubr.msk.f32.vlgmr.msra.gmra.mrb[14].mxu0 %vm1048_vm2, %v5255_v59 }
 0x4cb   : > { %4073 = vmatpush3.msra.mxu0 %v1889_v58  ;;  %4074 = vmatprep.mubr.msk.f32.mxu0 %vm4744_vm0, %v4743_v12 }
 0x4cc   : > { %4082 = vmatprep.subr.mxu0 %v4743_v12 }
 0x4cd   : > { %v5262_v29 = vpop.eup %4464 }
 0x4ce   : > { %4075 = vmatmul.mubr.msk.f32.vlgmr.msra.gmra.mrb[16].mxu0 %vm1048_vm2, %v5262_v29 }
 0x4cf   : > { %4084 = vmatprep.mubr.msk.f32.mxu0 %vm4744_vm0, %v4743_v12 }
 0x4d0   : > { %v1702_v60 = vpop.xlane.xlu1 %1701 }
 0x4d1   : > { %v1710_v61 = vsub.f32 %v1537_v45, %v1702_v60 }
 0x4d2   : > { %4083 = vmatpush3.xpose.msk.msra.mxu0 %vm743_vm1, %v2052_v51 }
 0x4d3   : > { %v1715_v62 = vmul.f32 1.442695, %v1710_v61  ;;  %4092 = vmatprep.subr.mxu0 %v4743_v12 }
 0x4d4   : > { %v1708_v1 = vpop.xlane.xlu0 %1707  ;;  %v2130_v3 = vpop.permute.xlu1 %2129 }
 0x4d5   : > { %4466 = vpow2.f32 %v1715_v62  ;;  %v1712_v2 = vsub.f32 %v1693_v48, %v1708_v1 }
 0x4d7   : > { %v1719_v4 = vmul.f32 1.442695, %v1712_v2 }
 0x4d8   : > { %v2050_v5 = vpop.permute.xlu0 %2049  ;;  %v2128_v7 = vpop.permute.xlu1 %2127 }
 0x4d9   : > { %4468 = vpow2.f32 %v1719_v4  ;;  %4085 = vmatmul.mubr.msk.f32.vlgmr.msra.gmra.mrb[18].mxu0 %vm743_vm1, %v2050_v5 }
 0x4da   : > { %4094 = vmatprep.mubr.msk.f32.mxu0 %vm4744_vm0, %v4743_v12 }
 0x4dc   : > { %v2208_v6 = vpop.permute.xlu0 %2207  ;;  %v2286_v11 = vpop.permute.xlu1 %2285 }
 0x4dd   : > { %4093 = vmatpush3.xpose.msk.msra.mxu0 %vm743_vm1, %v2208_v6 }
 0x4de   : > { %4102 = vmatprep.subr.mxu0 %v4743_v12 }
 0x4df   : > { %v5275_v8 = vpop.eup %4466 }
 0x4e0   : > { %4070 = vmatmul.mubr.msk.f32.vlgmr.msra.gmra.mrb[22].mxu1 %vm1048_vm2, %v5275_v8  ;;  %v2206_v9 = vpop.permute.xlu0 %2205  ;;  %v2284_v16 = vpop.permute.xlu1 %2283 }
 0x4e1   : > { %4078 = vmatpush3.msra.mxu1 %v1966_v22  ;;  %4095 = vmatmul.mubr.msk.f32.vlgmr.msra.gmra.mrb[20].mxu0 %vm743_vm1, %v2206_v9 }
 0x4e2   : > { %4079 = vmatprep.mubr.msk.f32.mxu1 %vm4744_vm0, %v4743_v12  ;;  %4087 = vmatprep.subr.mxu1 %v4743_v12 }
 0x4e3   : > { %v5283_v10 = vpop.eup %4468  ;;  %4104 = vmatprep.mubr.msk.f32.mxu0 %vm4744_vm0, %v4743_v12 }
 0x4e4   : > { %4080 = vmatmul.mubr.msk.f32.vlgmr.msra.gmra.mrb[24].mxu1 %vm1048_vm2, %v5283_v10  ;;  %v2398_v13 = vpop.permute.xlu0 %2397  ;;  %v2474_v17 = vpop.permute.xlu1 %2473 }
 0x4e5   : > { %4103 = vmatpush3.msra.mxu0 %v2398_v13  ;;  %4089 = vmatprep.mubr.msk.f32.mxu1 %vm4744_vm0, %v4743_v12 }
 0x4e6   : > { %4112 = vmatprep.subr.mxu0 %v4743_v12 }
 0x4e8   : > { %4088 = vmatpush3.xpose.msk.msra.mxu1 %vm743_vm1, %v2130_v3  ;;  %v2712_v54 = vpop.permute.xlu0 %2711  ;;  %v2550_v57 = vpop.permute.xlu1 %2549 }
 0x4e9   : > { %4097 = vmatprep.subr.mxu1 %v4743_v12 }
 0x4eb   : > { %4090 = vmatmul.mubr.msk.f32.vlgmr.msra.gmra.mrb[26].mxu1 %vm743_vm1, %v2128_v7 }
 0x4ec   : > { %4098 = vmatpush3.xpose.msk.msra.mxu1 %vm743_vm1, %v2286_v11  ;;  %4099 = vmatprep.mubr.msk.f32.mxu1 %vm4744_vm0, %v4743_v12  ;;  %v2626_v58 = vpop.permute.xlu1 %2625 }
 0x4ed   : > { %4107 = vmatprep.subr.mxu1 %v4743_v12 }
 0x4ef   : > { %4100 = vmatmul.mubr.msk.f32.vlgmr.msra.gmra.mrb[28].mxu1 %vm743_vm1, %v2284_v16 }
 0x4f0   : > { %4108 = vmatpush3.msra.mxu1 %v2474_v17  ;;  %4109 = vmatprep.mubr.msk.f32.mxu1 %vm4744_vm0, %v4743_v12 }
 0x4f1   : > { %4117 = vmatprep.subr.mxu1 %v4743_v12 }
 0x59d   : > { %v5303_v18 = vpop.f32.mrb[14].mxu0 }
 0x59e   : > { %v4066_v20 = vpop.f32.mrb[15].mxu0 }
 0x5a1   : > { %v5305_v23 = vpop.f32.mrb[16].mxu0 }
 0x5a2   : > { %v4076_v24 = vpop.f32.mrb[17].mxu0 }
 0x5ac   : > { %v2123_v25 = vpop.f32.mrb[18].mxu0 }
 0x5ad   : > { %v4086_v28 = vpop.f32.mrb[19].mxu0  ;;  %v2361_v32 = vsel %vm1048_vm2, %v2123_v25, -inf }
 0x5ae   : > { %2362 = vmax.xlane.f32.xlu0 %v2361_v32 }
 0x5b3   : > { %v5308_v35 = vpop.f32.mrb[22].mxu1 }
 0x5b4   : > { %v4071_v36 = vpop.f32.mrb[23].mxu1  ;;  %v2279_v40 = vpop.f32.mrb[20].mxu0 }
 0x5b5   : > { %v4096_v44 = vpop.f32.mrb[21].mxu0  ;;  %v2367_v45 = vsel %vm1048_vm2, %v2279_v40, -inf }
 0x5b6   : > { %2368 = vmax.xlane.f32.xlu0 %v2367_v45 }
 0x5b7   : > { %v5311_v46 = vpop.f32.mrb[24].mxu1 }
 0x5b8   : > { %v4081_v47 = vpop.f32.mrb[25].mxu1 }
 0x5be   : > { %v2201_v48 = vpop.f32.mrb[26].mxu1 }
 0x5bf   : > { %v4091_v49 = vpop.f32.mrb[27].mxu1  ;;  %v2364_v50 = vsel %vm1048_vm2, %v2201_v48, -inf }
 0x5c0   : > { %2365 = vmax.xlane.f32.xlu1 %v2364_v50 }
 0x5c2   : > { %v2357_v51 = vpop.f32.mrb[28].mxu1 }
 0x5c3   : > { %v4101_v52 = vpop.f32.mrb[29].mxu1  ;;  %v2370_v53 = vsel %vm1048_vm2, %v2357_v51, -inf }
 0x5c4   : > { %2371 = vmax.xlane.f32.xlu0 %v2370_v53 }
 0x5d1   : > { %2787 = vrot.lane.b32.xlu1 %v5099_v31, %s4747_s18 }
 0x5d5   : > { %2945 = vrot.lane.b32.xlu1 %v5084_v27, %s4747_s18 }
 0x5d9   : > { %2943 = vrot.lane.b32.xlu1 %v5093_v30, %s4747_s18  ;;  %v2790_v30 = vpop.permute.xlu1 %2789 }
 0x5da   : > { %2709 = vrot.lane.b32.xlu0 %v5082_v26, %s4747_s18 }
 0x5de   : > { %2867 = vrot.lane.b32.xlu0 %v5103_v33, %s4747_s18 }
 0x5e2   : > { %2865 = vrot.lane.b32.xlu0 %v5115_v34, %s4747_s18 }
 0x63b   : > { %v2363_v55 = vpop.xlane.xlu0 %2362 }
 0x63c   : > { %v2373_v56 = vsub.f32 %v2123_v25, %v2363_v55 }
 0x63e   : > { %v2377_v31 = vmul.f32 1.442695, %v2373_v56 }
 0x640   : > { %4470 = vpow2.f32 %v2377_v31  ;;  %v1724_v31 = vsel %vm1048_vm2, %v5275_v8, 0.0 }
 0x643   : > { %v2369_v27 = vpop.xlane.xlu0 %2368 }
 0x644   : > { %v2375_v22 = vsub.f32 %v2279_v40, %v2369_v27 }
 0x646   : > { %v2381_v60 = vmul.f32 1.442695, %v2375_v22 }
 0x648   : > { %4472 = vpow2.f32 %v2381_v60 }
 0x64a   : > { %v5327_v61 = vpop.eup %4470 }
 0x64b   : > { %4105 = vmatmul.mubr.msk.f32.vlgmr.msra.gmra.mrb[22].mxu0 %vm1048_vm2, %v5327_v61 }
 0x64c   : > { %4113 = vmatpush3.msra.mxu0 %v2550_v57  ;;  %4114 = vmatprep.mubr.msk.f32.mxu0 %vm4744_vm0, %v4743_v12  ;;  %v1721_v57 = vsel %vm1048_vm2, %v5255_v59, 0.0 }
 0x64d   : > { %v2366_v26 = vpop.xlane.xlu1 %2365  ;;  %4122 = vmatprep.subr.mxu0 %v4743_v12 }
 0x64e   : > { %v2374_v33 = vsub.f32 %v2201_v48, %v2366_v26 }
 0x650   : > { %v2379_v34 = vmul.f32 1.442695, %v2374_v33 }
 0x651   : > { %v2372_v62 = vpop.xlane.xlu0 %2371  ;;  %v2788_v9 = vpop.permute.xlu1 %2787 }
 0x652   : > { %v5334_v1 = vpop.eup %4472  ;;  %4474 = vpow2.f32 %v2379_v34  ;;  %v2376_v2 = vsub.f32 %v2357_v51, %v2372_v62  ;;  %v1727_v34 = vsel %vm1048_vm2, %v5262_v29, 0.0 }
 0x653   : > { %4115 = vmatmul.mubr.msk.f32.vlgmr.msra.gmra.mrb[24].mxu0 %vm1048_vm2, %v5334_v1 }
 0x654   : > { %v2383_v3 = vmul.f32 1.442695, %v2376_v2  ;;  %4123 = vmatpush3.xpose.msk.msra.mxu0 %vm743_vm1, %v2712_v54  ;;  %4124 = vmatprep.mubr.msk.f32.mxu0 %vm4744_vm0, %v4743_v12 }
 0x655   : > { %v2710_v4 = vpop.permute.xlu0 %2709  ;;  %4132 = vmatprep.subr.mxu0 %v4743_v12  ;;  %v2946_v13 = vpop.permute.xlu1 %2945 }
 0x656   : > { %4476 = vpow2.f32 %v2383_v3 }
 0x657   : > { %4125 = vmatmul.mubr.msk.f32.vlgmr.msra.gmra.mrb[26].mxu0 %vm743_vm1, %v2710_v4 }
 0x658   : > { %4134 = vmatprep.mubr.msk.f32.mxu0 %vm4744_vm0, %v4743_v12 }
 0x659   : > { %v2868_v5 = vpop.permute.xlu0 %2867  ;;  %v2944_v16 = vpop.permute.xlu1 %2943 }
 0x65a   : > { %4133 = vmatpush3.xpose.msk.msra.mxu0 %vm743_vm1, %v2868_v5  ;;  %v2391_v5 = vsel %vm1048_vm2, %v5334_v1, 0.0 }
 0x65b   : > { %4142 = vmatprep.subr.mxu0 %v4743_v12 }
 0x65c   : > { %v4475_v6 = vpop.eup %4474 }
 0x65d   : > { %4110 = vmatmul.mubr.msk.f32.vlgmr.msra.gmra.mrb[30].mxu1 %vm1048_vm2, %v4475_v6  ;;  %v2866_v7 = vpop.permute.xlu0 %2865 }
 0x65e   : > { %4118 = vmatpush3.msra.mxu1 %v2626_v58  ;;  %4135 = vmatmul.mubr.msk.f32.vlgmr.msra.gmra.mrb[28].mxu0 %vm743_vm1, %v2866_v7  ;;  %v2385_v58 = vsel %vm1048_vm2, %v5327_v61, 0.0 }
 0x65f   : > { %4119 = vmatprep.mubr.msk.f32.mxu1 %vm4744_vm0, %v4743_v12  ;;  %4127 = vmatprep.subr.mxu1 %v4743_v12 }
 0x660   : > { %v4477_v11 = vpop.eup %4476  ;;  %4144 = vmatprep.mubr.msk.f32.mxu0 %vm4744_vm0, %v4743_v12 }
 0x661   : > { %4120 = vmatmul.mubr.msk.f32.vlgmr.msra.gmra.mrb[32].mxu1 %vm1048_vm2, %v4477_v11 }
 0x662   : > { %4129 = vmatprep.mubr.msk.f32.mxu1 %vm4744_vm0, %v4743_v12 }
 0x665   : > { %4128 = vmatpush3.xpose.msk.msra.mxu1 %vm743_vm1, %v2790_v30 }
 0x666   : > { %4137 = vmatprep.subr.mxu1 %v4743_v12 }
 0x668   : > { %4130 = vmatmul.mubr.msk.f32.vlgmr.msra.gmra.mrb[34].mxu1 %vm743_vm1, %v2788_v9 }
 0x669   : > { %4138 = vmatpush3.xpose.msk.msra.mxu1 %vm743_vm1, %v2946_v13  ;;  %4139 = vmatprep.mubr.msk.f32.mxu1 %vm4744_vm0, %v4743_v12 }
 0x66a   : > { %4147 = vmatprep.subr.mxu1 %v4743_v12 }
 0x66c   : > { %4140 = vmatmul.mubr.msk.f32.vlgmr.msra.gmra.mrb[36].mxu1 %vm743_vm1, %v2944_v16 }
 0x66d   : > { %4149 = vmatprep.mubr.msk.f32.mxu1 %vm4744_vm0, %v4743_v12 }
 0x71e   : > { %v5367_v17 = vpop.f32.mrb[22].mxu0 }
 0x71f   : > { %v4106_v20 = vpop.f32.mrb[23].mxu0 }
 0x726   : > { %v5369_v24 = vpop.f32.mrb[24].mxu0 }
 0x727   : > { %v4116_v25 = vpop.f32.mrb[25].mxu0 }
 0x728   : > { %v1079_v25 = vsel %vm1048_vm2, %v5192_v14, 0.0 }
 0x72a   : > { %v2783_v28 = vpop.f32.mrb[26].mxu0 }
 0x72b   : > { %v4126_v32 = vpop.f32.mrb[27].mxu0  ;;  %v3021_v36 = vsel %vm1048_vm2, %v2783_v28, -inf }
 0x72c   : > { %3022 = vmax.xlane.f32.xlu0 %v3021_v36  ;;  %v1082_v32 = vsel %vm1048_vm2, %v5200_v15, 0.0 }
 0x730   : > { %v5372_v40 = vpop.f32.mrb[30].mxu1 }
 0x731   : > { %v4111_v44 = vpop.f32.mrb[31].mxu1  ;;  %v2939_v45 = vpop.f32.mrb[28].mxu0 }
 0x732   : > { %v4136_v47 = vpop.f32.mrb[29].mxu0  ;;  %v3027_v48 = vsel %vm1048_vm2, %v2939_v45, -inf }
 0x733   : > { %3028 = vmax.xlane.f32.xlu0 %v3027_v48 }
 0x734   : > { %v5375_v49 = vpop.f32.mrb[32].mxu1 }
 0x735   : > { %v4121_v50 = vpop.f32.mrb[33].mxu1 }
 0x73b   : > { %v2861_v51 = vpop.f32.mrb[34].mxu1 }
 0x73c   : > { %v4131_v52 = vpop.f32.mrb[35].mxu1  ;;  %v3024_v53 = vsel %vm1048_vm2, %v2861_v51, -inf }
 0x73d   : > { %3025 = vmax.xlane.f32.xlu1 %v3024_v53 }
 0x73f   : > { %v3017_v54 = vpop.f32.mrb[36].mxu1 }
 0x740   : > { %v4141_v55 = vpop.f32.mrb[37].mxu1  ;;  %v3030_v56 = vsel %vm1048_vm2, %v3017_v54, -inf }
 0x741   : > { %3031 = vmax.xlane.f32.xlu0 %v3030_v56 }
 0x74e   : > { %3133 = vrot.lane.b32.xlu1 %v5125_v37, %s4747_s18  ;;  %v1730_v37 = vsel %vm1048_vm2, %v5283_v10, 0.0 }
 0x752   : > { %3209 = vrot.lane.b32.xlu1 %v5133_v43, %s4747_s18 }
 0x756   : > { %3285 = vrot.lane.b32.xlu1 %v5130_v41, %s4747_s18  ;;  %v2388_v41 = vsel %vm1048_vm2, %v4475_v6, 0.0 }
 0x757   : > { %3057 = vrot.lane.b32.xlu0 %v5127_v39, %s4747_s18  ;;  %v2394_v39 = vsel %vm1048_vm2, %v4477_v11, 0.0  ;;  %v1073_v11 = vsel %vm1048_vm2, %v5167_v63, 0.0  ;;  %v1076_v63 = vsel %vm1048_vm2, %v5175_v0, 0.0 }
 0x776   : > { %1722 = vadd.xlane.f32.xlu0 %v1721_v57 }
 0x77a   : > { %1725 = vadd.xlane.f32.xlu1 %v1724_v31  ;;  %2386 = vadd.xlane.f32.xlu0 %v2385_v58  ;;  %v3432_v58 = vld [vmem:[#allocation10 + $0x8] sm:$0xff] }
 0x77e   : > { %1731 = vadd.xlane.f32.xlu1 %v1730_v37  ;;  %2389 = vadd.xlane.f32.xlu0 %v2388_v41  ;;  %v3433_v37 = vld [vmem:[#allocation10 + $0x10] sm:$0xff] }
 0x782   : > { %2395 = vadd.xlane.f32.xlu1 %v2394_v39  ;;  %v3434_v39 = vld [vmem:[#allocation10 + $0x18] sm:$0xff] }
 0x7b9   : > { %v3023_v43 = vpop.xlane.xlu0 %3022 }
 0x7ba   : > { %v3033_v59 = vsub.f32 %v2783_v28, %v3023_v43  ;;  %v4300_v43 = vpack.c.bf16 %v3434_v39, %v3433_v37 }
 0x7bc   : > { %v3037_v27 = vmul.f32 1.442695, %v3033_v59  ;;  %v3436_v59 = vld [vmem:[#allocation10 + $0x28] sm:$0xff] }
 0x7be   : > { %4478 = vpow2.f32 %v3037_v27 }
 0x7c0   : > { %v3029_v8 = vpop.xlane.xlu0 %3028 }
 0x7c1   : > { %v3035_v22 = vsub.f32 %v2939_v45, %v3029_v8 }
 0x7c3   : > { %v3041_v60 = vmul.f32 1.442695, %v3035_v22 }
 0x7c5   : > { %4480 = vpow2.f32 %v3041_v60 }
 0x7c8   : > { %v4479_v30 = vpop.eup %4478 }
 0x7c9   : > { %v3045_v61 = vsel %vm1048_vm2, %v4479_v30, 0.0 }
 0x7ca   : > { %v3026_v26 = vpop.xlane.xlu1 %3025  ;;  %3046 = vadd.xlane.f32.xlu0 %v3045_v61  ;;  %v3437_v61 = vld [vmem:[#allocation10 + $0x30] sm:$0xff] }
 0x7cb   : > { %v3034_v10 = vsub.f32 %v2861_v51, %v3026_v26  ;;  %v3438_v26 = vld [vmem:[#allocation10 + $0x38] sm:$0xff] }
 0x7cd   : > { %v3039_v33 = vmul.f32 1.442695, %v3034_v10 }
 0x7ce   : > { %v3134_v62 = vpop.permute.xlu1 %3133  ;;  %v3032_v2 = vpop.xlane.xlu0 %3031  ;;  %1728 = vadd.xlane.f32.xlu0 %v1727_v34 }
 0x7cf   : > { %4482 = vpow2.f32 %v3039_v33  ;;  %v3036_v3 = vsub.f32 %v3017_v54, %v3032_v2  ;;  %4148 = vmatpush3.msra.mxu1 %v3134_v62  ;;  %v4481_v6 = vpop.eup %4480  ;;  %v4308_v2 = vpack.c.bf16 %v3438_v26, %v3437_v61 }
 0x7d0   : > { %4157 = vmatprep.subr.mxu1 %v4743_v12  ;;  %v3051_v29 = vsel %vm1048_vm2, %v4481_v6, 0.0 }
 0x7d1   : > { %v3043_v4 = vmul.f32 1.442695, %v3036_v3  ;;  %v3439_v3 = vld [vmem:[#allocation10 + $0x40] sm:$0xff] }
 0x7d2   : > { %v3058_v7 = vpop.permute.xlu0 %3057  ;;  %2392 = vadd.xlane.f32.xlu0 %v2391_v5  ;;  %v3210_v9 = vpop.permute.xlu1 %3209  ;;  %v3441_v5 = vld [vmem:[#allocation10 + $0x50] sm:$0xff] }
 0x7d3   : > { %4484 = vpow2.f32 %v3043_v4  ;;  %4143 = vmatpush3.msra.mxu0 %v3058_v7 }
 0x7d4   : > { %4145 = vmatmul.mubr.msk.f32.vlgmr.msra.gmra.mrb[30].mxu0 %vm1048_vm2, %v4479_v30  ;;  %4152 = vmatprep.subr.mxu0 %v4743_v12 }
 0x7d5   : > { %4153 = vmatpush3.msra.mxu0 %v3210_v9  ;;  %4154 = vmatprep.mubr.msk.f32.mxu0 %vm4744_vm0, %v4743_v12  ;;  %v3443_v9 = vld [vmem:[#allocation10 + $0x60] sm:$0xff] }
 0x7d6   : > { %3052 = vadd.xlane.f32.xlu0 %v3051_v29  ;;  %v3286_v13 = vpop.permute.xlu1 %3285  ;;  %v3444_v29 = vld [vmem:[#allocation10 + $0x68] sm:$0xff] }
 0x7d8   : > { %4155 = vmatmul.mubr.msk.f32.vlgmr.msra.gmra.mrb[32].mxu0 %vm1048_vm2, %v4481_v6  ;;  %v3442_v6 = vld [vmem:[#allocation10 + $0x58] sm:$0xff] }
 0x7d9   : > { %v4483_v1 = vpop.eup %4482  ;;  %v4316_v7 = vpack.c.bf16 %v3442_v6, %v3441_v5 }
 0x7da   : > { %4150 = vmatmul.mubr.msk.f32.vlgmr.msra.gmra.mrb[38].mxu1 %vm1048_vm2, %v4483_v1  ;;  %v3048_v16 = vsel %vm1048_vm2, %v4483_v1, 0.0  ;;  %1074 = vadd.xlane.f32.xlu0 %v1073_v11  ;;  %v3445_v11 = vld [vmem:[#allocation10 + $0x70] sm:$0xff] }
 0x7db   : > { %4158 = vmatpush3.msra.mxu1 %v3286_v13  ;;  %3049 = vadd.xlane.f32.xlu1 %v3048_v16  ;;  %v3446_v13 = vld [vmem:[#allocation10 + $0x78] sm:$0xff] }
 0x7dc   : > { %4159 = vmatprep.mubr.msk.f32.mxu1 %vm4744_vm0, %v4743_v12 }
 0x7dd   : > { %v4485_v20 = vpop.eup %4484 }
 0x7de   : > { %4160 = vmatmul.mubr.msk.f32.vlgmr.msra.gmra.mrb[40].mxu1 %vm1048_vm2, %v4485_v20  ;;  %v3054_v28 = vsel %vm1048_vm2, %v4485_v20, 0.0  ;;  %1080 = vadd.xlane.f32.xlu0 %v1079_v25  ;;  %v4324_v20 = vpack.c.bf16 %v3446_v13, %v3445_v11 }
 0x7df   : > { %3055 = vadd.xlane.f32.xlu1 %v3054_v28 }
 0x7e3   : > { %1077 = vadd.xlane.f32.xlu1 %v1076_v63 }
 0x7e7   : > { %1083 = vadd.xlane.f32.xlu1 %v1082_v32 }
 0x803   : > { %v1723_v36 = vpop.xlane.xlu0 %1722 }
 0x804   : > { %4486 = vrcp.f32 %v1723_v36 }
 0x807   : > { %v1726_v12 = vpop.xlane.xlu1 %1725  ;;  %v2387_v44 = vpop.xlane.xlu0 %2386 }
 0x808   : > { %4488 = vrcp.f32 %v1726_v12 }
 0x809   : > { %4490 = vrcp.f32 %v2387_v44 }
 0x80b   : > { %v2390_v14 = vpop.xlane.xlu0 %2389  ;;  %v1732_v55 = vpop.xlane.xlu1 %1731 }
 0x80c   : > { %4492 = vrcp.f32 %v2390_v14 }
 0x80d   : > { %4494 = vrcp.f32 %v1732_v55 }
 0x80e   : > { %v4487_v45 = vpop.eup %4486 }
 0x80f   : > { %v2045_v48 = vmul.f32 %v4487_v45, %v5303_v18  ;;  %v2396_v57 = vpop.xlane.xlu1 %2395 }
 0x812   : > { %v4489_v47 = vpop.eup %4488 }
 0x813   : > { %v2046_v50 = vmul.f32 %v4489_v47, %v5308_v35  ;;  %v4491_v0 = vpop.eup %4490  ;;  %v3431_v35 = vld [vmem:[#allocation10] sm:$0xff] }
 0x814   : > { %v2705_v15 = vmul.f32 %v4491_v0, %v5367_v17  ;;  %v4296_v41 = vpack.c.bf16 %v3432_v58, %v3431_v35 }
 0x815   : > { %v4424_v51 = vpack.i.bf16 %v2046_v50, %v2045_v48 }
 0x816   : > { %v4493_v52 = vpop.eup %4492  ;;  %4297 = vmatprep.subr.bf16.mxu0 %v4296_v41 }
 0x817   : > { %4425 = vrot.lane.b32.xlu0 %v4424_v51, %s4747_s18  ;;  %v2706_v53 = vmul.f32 %v4493_v52, %v5372_v40  ;;  %v4495_v17 = vpop.eup %4494  ;;  %v3435_v40 = vld [vmem:[#allocation10 + $0x20] sm:$0xff]  ;;  %4299 = vmatpush3.bf16.msra.mxu0 %v4296_v41 }
 0x818   : > { %v2048_v22 = vmul.f32 %v4495_v17, %v5311_v46  ;;  %4301 = vmatprep.subr.bf16.mxu0 %v4300_v43  ;;  %v4304_v60 = vpack.c.bf16 %v3436_v59, %v3435_v40 }
 0x819   : > { %v4429_v54 = vpack.i.bf16 %v2706_v53, %v2705_v15 }
 0x81b   : > { %4430 = vrot.lane.b32.xlu1 %v4429_v54, %s4746_s29  ;;  %4303 = vmatpush3.bf16.msra.mxu0 %v4300_v43 }
 0x81c   : > { %4305 = vmatprep.subr.bf16.mxu0 %v4304_v60 }
 0x81f   : > { %4307 = vmatpush3.bf16.msra.mxu0 %v4304_v60 }
 0x820   : > { %4309 = vmatprep.subr.bf16.mxu0 %v4308_v2 }
 0x823   : > { %4311 = vmatpush3.bf16.msra.mxu0 %v4308_v2 }
 0x857   : > { %v3047_v56 = vpop.xlane.xlu0 %3046 }
 0x85b   : > { %v1729_v31 = vpop.xlane.xlu0 %1728 }
 0x85c   : > { %4496 = vrcp.f32 %v1729_v31 }
 0x85d   : > { %4498 = vrcp.f32 %v2396_v57 }
 0x85f   : > { %v2393_v18 = vpop.xlane.xlu0 %2392 }
 0x860   : > { %4500 = vrcp.f32 %v2393_v18 }
 0x861   : > { %4502 = vrcp.f32 %v3047_v56 }
 0x863   : > { %v3053_v1 = vpop.xlane.xlu0 %3052 }
 0x866   : > { %v4497_v27 = vpop.eup %4496 }
 0x867   : > { %v2047_v8 = vmul.f32 %v4497_v27, %v5305_v23  ;;  %v4499_v30 = vpop.eup %4498  ;;  %v3440_v23 = vld [vmem:[#allocation10 + $0x48] sm:$0xff]  ;;  %v1075_v55 = vpop.xlane.xlu0 %1074 }
 0x868   : > { %v2708_v62 = vmul.f32 %v4499_v30, %v5375_v49  ;;  %v4312_v46 = vpack.c.bf16 %v3440_v23, %v3439_v3  ;;  %v3050_v49 = vpop.xlane.xlu1 %3049 }
 0x869   : > { %v4434_v10 = vpack.i.bf16 %v2048_v22, %v2047_v8  ;;  %4504 = vrcp.f32 %v3050_v49 }
 0x86a   : > { %v4501_v33 = vpop.eup %4500  ;;  %4313 = vmatprep.subr.bf16.mxu0 %v4312_v46  ;;  %4506 = vrcp.f32 %v3053_v1 }
 0x86b   : > { %4435 = vrot.lane.b32.xlu1 %v4434_v10, %s4747_s18  ;;  %v2707_v34 = vmul.f32 %v4501_v33, %v5369_v24  ;;  %4315 = vmatpush3.bf16.msra.mxu0 %v4312_v46  ;;  %v4320_v24 = vpack.c.bf16 %v3444_v29, %v3443_v9  ;;  %v4503_v25 = vpop.eup %4502  ;;  %v1081_v57 = vpop.xlane.xlu0 %1080 }
 0x86c   : > { %4317 = vmatprep.subr.bf16.mxu0 %v4316_v7  ;;  %v3056_v16 = vpop.xlane.xlu1 %3055 }
 0x86d   : > { %v4444_v4 = vpack.i.bf16 %v2708_v62, %v2707_v34  ;;  %4508 = vrcp.f32 %v3056_v16 }
 0x86e   : > { %4510 = vrcp.f32 %v1075_v55 }
 0x86f   : > { %4445 = vrot.lane.b32.xlu0 %v4444_v4, %s4746_s29  ;;  %4319 = vmatpush3.bf16.msra.mxu0 %v4316_v7 }
 0x870   : > { %4321 = vmatprep.subr.bf16.mxu0 %v4320_v24  ;;  %v1078_v56 = vpop.xlane.xlu1 %1077 }
 0x871   : > { %4512 = vrcp.f32 %v1078_v56 }
 0x872   : > { %4514 = vrcp.f32 %v1081_v57 }
 0x873   : > { %4323 = vmatpush3.bf16.msra.mxu0 %v4320_v24  ;;  %v4505_v44 = vpop.eup %4504 }
 0x874   : > { %4325 = vmatprep.subr.bf16.mxu0 %v4324_v20  ;;  %v4507_v48 = vpop.eup %4506  ;;  %v1084_v31 = vpop.xlane.xlu1 %1083 }
 0x875   : > { %4516 = vrcp.f32 %v1084_v31 }
 0x877   : > { %4327 = vmatpush3.bf16.msra.mxu0 %v4324_v20  ;;  %v4509_v0 = vpop.eup %4508 }
 0x878   : > { %v4511_v58 = vpop.eup %4510 }
 0x879   : > { %v1381_v27 = vmul.f32 %v4511_v58, %v5217_v19 }
 0x87b   : > { %v4513_v37 = vpop.eup %4512 }
 0x87c   : > { %v1382_v43 = vmul.f32 %v4513_v37, %v5219_v21  ;;  %v4515_v8 = vpop.eup %4514 }
 0x87d   : > { %v1383_v46 = vmul.f32 %v4515_v8, %v5223_v38 }
 0x87f   : > { %v4517_v60 = vpop.eup %4516 }
 0x880   : > { %v1384_v5 = vmul.f32 %v4517_v60, %v5225_v42  ;;  %v3736_v42 = vld [vmem:[%s5516_s8] ss:$0 sm:$0xff] }
 0x889   : > { %v4426_v35 = vpop.permute.xlu0 %4425 }
 0x88a   : > { %v4428_v41 = vunpack.i.h.bf16 %v4426_v35  ;;  %v4427_v39 = vunpack.i.l.bf16 %v4426_v35 }
 0x88c   : > { %v3418_v30 = vsel %vm743_vm1, %v1382_v43, %v4428_v41  ;;  %v3417_v26 = vsel %vm743_vm1, %v1381_v27, %v4427_v39 }
 0x88d   : > { %v4431_v18 = vpop.permute.xlu1 %4430 }
 0x88e   : > { %v4433_v40 = vunpack.i.h.bf16 %v4431_v18  ;;  %v4432_v59 = vunpack.i.l.bf16 %v4431_v18 }
 0x890   : > { %v3422_v3 = vsel %vm3421_vm3, %v3417_v26, %v4432_v59  ;;  %v3423_v19 = vsel %vm3421_vm3, %v3418_v30, %v4433_v40 }
 0x8a7   : > { %v3129_v28 = vpop.f32.mrb[30].mxu0 }
 0x8a8   : > { %v3365_v63 = vmul.f32 %v4503_v25, %v3129_v28  ;;  %v4146_v32 = vpop.f32.mrb[31].mxu0 }
 0x8ab   : > { %v3281_v36 = vpop.f32.mrb[32].mxu0 }
 0x8ac   : > { %v4156_v12 = vpop.f32.mrb[33].mxu0  ;;  %v3367_v52 = vmul.f32 %v4507_v48, %v3281_v36 }
 0x8ad   : > { %v3205_v14 = vpop.f32.mrb[38].mxu1 }
 0x8ae   : > { %v3366_v45 = vmul.f32 %v4505_v44, %v3205_v14  ;;  %v4151_v47 = vpop.f32.mrb[39].mxu1 }
 0x8b0   : > { %v4439_v50 = vpack.i.bf16 %v3366_v45, %v3365_v63 }
 0x8b1   : > { %v3357_v51 = vpop.f32.mrb[40].mxu1 }
 0x8b2   : > { %v3368_v15 = vmul.f32 %v4509_v0, %v3357_v51  ;;  %v4161_v53 = vpop.f32.mrb[41].mxu1  ;;  %4440 = vrot.lane.b32.xlu1 %v4439_v50, %s4745_s20 }
 0x8b4   : > { %v4449_v54 = vpack.i.bf16 %v3368_v15, %v3367_v52 }
 0x8b6   : > { %4450 = vrot.lane.b32.xlu1 %v4449_v54, %s4745_s20  ;;  %s4664_s20 = sshll.u32 %s4748_s22, 4  ;;  %s4665_s20 = int_to_ptr.vmem [resolvable:$false] %s4664_s20 }
 0x8b7   : > { %s4666_s29 = scalar_lea.vmem %s4665_s20, 1024  ;;  %p4667_p12 = scmp.lt.s32.totalorder %s5459_s9, %s4665_s20 }
 0x8b8   : > { %p4668_p1 = scmp.lt.s32.totalorder %s4666_s29, %s4660_s13 }
 0x8ba   : > { %p4669_p2 = por %p4668_p1, %p4667_p12 }
 0x8bc   : > { %p4670_p13 = pnand %p4669_p2, %p4663_p7 }
 0x8dd   : > { %v4436_v17 = vpop.permute.xlu1 %4435 }
 0x8de   : > { %v4438_v10 = vunpack.i.h.bf16 %v4436_v17  ;;  %v4437_v33 = vunpack.i.l.bf16 %v4436_v17 }
 0x8e0   : > { %v3419_v29 = vsel %vm743_vm1, %v1383_v46, %v4437_v33  ;;  %v3420_v24 = vsel %vm743_vm1, %v1384_v5, %v4438_v10 }
 0x8e1   : > { %v4446_v22 = vpop.permute.xlu0 %4445 }
 0x8e2   : > { %v4448_v2 = vunpack.i.h.bf16 %v4446_v22  ;;  %v4447_v21 = vunpack.i.l.bf16 %v4446_v22 }
 0x8e4   : > { %v3424_v49 = vsel %vm3421_vm3, %v3419_v29, %v4447_v21  ;;  %v3425_v1 = vsel %vm3421_vm3, %v3420_v24, %v4448_v2 }
 0x924   : > { %v4441_v61 = vpop.permute.xlu1 %4440 }
 0x925   : > { %v4443_v34 = vunpack.i.h.bf16 %v4441_v61  ;;  %v4442_v62 = vunpack.i.l.bf16 %v4441_v61 }
 0x927   : > { %v3427_v23 = vsel %vm3426_vm4, %v3422_v3, %v4442_v62  ;;  %v3428_v4 = vsel %vm3426_vm4, %v3423_v19, %v4443_v34 }
 0x928   : > { %4194 = vmatprep.mubr.f32.mxu0 %v3427_v23  ;;  %v4451_v6 = vpop.permute.xlu1 %4450 }
 0x929   : > { %v4453_v7 = vunpack.i.h.bf16 %v4451_v6  ;;  %v4452_v9 = vunpack.i.l.bf16 %v4451_v6  ;;  %4195 = vmatmul.mubr.f32.vlgmr.msra.gmra.mrb[34].mxu0 %v3428_v4 }
 0x92b   : > { %v3429_v11 = vsel %vm3426_vm4, %v3424_v49, %v4452_v9  ;;  %v3430_v38 = vsel %vm3426_vm4, %v3425_v1, %v4453_v7 }
 0x92c   : > { %4197 = vmatprep.mubr.f32.mxu0 %v3429_v11 }
 0x92d   : > { %4198 = vmatmul.mubr.f32.gmra.mrb[36].mxu0 %v3430_v38 }
 0x9fc   : > { %v4196_v13 = vpop.f32.mrb[34].mxu0 }
 0x9fd   : > { %v3526_v16 = vadd.f32 %v4196_v13, %v3736_v42  ;;  %v3520_v20 = vpop.f32.mrb[35].mxu0 }
 0x9fe   : > { %v3521_v25 = vadd.f32 %v3736_v42, %v3520_v20 }
 0x9ff   : > { %3540 = vst [vmem:[%s408_s24 + $0x8] sm:$0xff] %v3526_v16 }
 0xa00   : > { %3539 = vst [vmem:[%s408_s24] sm:$0xff] %v3521_v25  ;;  %v4199_v28 = vpop.f32.mrb[36].mxu0 }
 0xa01   : > { %v3536_v63 = vadd.f32 %v4199_v28, %v3736_v42  ;;  %v3530_v32 = vpop.f32.mrb[37].mxu0 }
 0xa02   : > { %v3531_v36 = vadd.f32 %v3736_v42, %v3530_v32 }
 0xa03   : > { %3542 = vst [vmem:[%s408_s24 + $0x18] sm:$0xff] %v3536_v63 }
 0xa04   : > { %3541 = vst [vmem:[%s408_s24 + $0x10] sm:$0xff] %v3531_v36 }
 0xa05   : > { %4673 = shalt.err (!%p4670_p13)
}
 0xa06   : > { %s4674_s18 = scalar_lea.hbm %s5464_s19, 512  ;;  %s4678_s24 = scalar_lea.hbm %s5541_s26, 1024 }
 0xa07   : > { %p4675_p9 = scmp.ne.s32.totalorder %s5464_s19, %s4674_s18  ;;  %p4679_p4 = scmp.lt.u32.totalorder %s5464_s19, %s5541_s26 }
 0xa08   : > { %p4680_p8 = scmp.lt.u32.totalorder %s4678_s24, %s4674_s18  ;;  %p4682_p3 = scmp.lt.u32.totalorder %s4674_s18, %s5464_s19 }
 0xa09   : > { %p4676_p0 = pnand %p4675_p9, %p4972_p10 }
 0xa0a   : > { %p4681_p6 = por %p4680_p8, %p4679_p4 }
 0xa0b   : > { %p4677_p11 = pneg %p4676_p0 }
 0xa0c   : > { %p4683_p5 = por %p4682_p3, %p4681_p6 }
 0xa0e   : > { %p4684_p7 = pnand %p4683_p5, %p4677_p11 }
 0xa10   : > { %4687 = shalt.err (!%p4684_p7)
}
 0xa11   : > { %s4749_s25 = smov 128   ;;  %s4750_s13 = smov 8  }
 0xa12   : > { %4346 = dma.vmem_to_hbm [thread:$0]  (%p4972_p10), %s5459_s9, 512, %s5464_s19, %s3544_s21, %s4749_s25, %s4749_s25, %s4750_s13  }
 0xa13 PF: > { %s5542_s22 = sld [smem:[#allocation16_spill]]  ;;  %s5543_s20 = sld [smem:[#allocation17_spill]] }
 0xa14   : > { %p5545_p1 = scmp.ge.s32.totalorder %s4734_s12, 2 }
 0xa19   : > { %s3572_s29 = sand.u32 1, %s5542_s22   ;;  %p5544_p12 = scmp.ne.s32.totalorder %s5543_s20, 0 }
 0xa1a   : > { %s3573_s18 = scalar_lea.sflag [#allocation4], %s3572_s29 }
 0xa1b   : > { %p4366_p2 = pnand %p5545_p1, %p5544_p12 }
 0xa1d   : > { %4717 = dma.done.wait (!%p4366_p2), %s3573_s18, 512  }
 0xa1e   : > { %4719 = vsyncadd (!%p4366_p2), %s3573_s18, 4294966784  ;;  %p24_p13 = scmp.ge.s32.totalorder %s4962_s14, 4   ;;  %s5546_s30 = smov %s4726_s10 }
 0xa1f   : > { %s5547_s10 = smov %s4730_s11  ;;  %s5548_s11 = smov %s4978_s28 }
 0xa20   : > { %s5549_s12 = smov %s4962_s14  ;;  %26 = sbr.rel (!%p24_p13) target bundleno = 9 (0x9), region = 117 }
 0xa27   :  { %3578 = vsyncpa [#allocation3], 1 }
 0xa28   :  { %3580 = vsyncpa [#allocation3 + $0x1], 1 }
 0xa29   :  { %3581 = vsyncpa [#allocation6], 1 }
 0xa2a   :  { %3582 = vsyncpa [#allocation9], 1 }
 0xa2b   :  { %3583 = vsyncpa [#allocation4], 1 }
 0xa2c   :  { %3585 = vsyncpa [#allocation4 + $0x1], 1 }

</bundles_post_ra>
